<compile_context>
chip_gen: v7x
topology: tpu7x:2x2x1
jax: 0.10.0
libtpu: 0.0.40
codegen_flags: <defaults>
</compile_context>

<pallas_src>
import functools

import jax
import jax.numpy as jnp
from jax import lax
from jax.experimental import pallas as pl
from jax.experimental.pallas import tpu as pltpu


# ----------------------------------------------------------------------------
# helpers
# ----------------------------------------------------------------------------
def _round_up(x, m):
    return ((x + m - 1) // m) * m


def _cdiv(a, b):
    return -(-a // b)


def _num_tensorcores():
    """Best-effort TensorCore count per device (2 on megacore chips like v7x)."""
    try:
        dev = jax.devices()[0]
        nc = getattr(dev, "num_cores", None)
        if nc:
            return max(1, int(nc))
        kind = str(getattr(dev, "device_kind", "")).lower()
        if any(k in kind for k in ("v4", "v5p", "v7")):
            return 2
    except Exception:
        pass
    return 1


def _row_tiles(M, max_tile, min_blocks=1):
    """Pick (tile, padded_M, grid): 8-aligned row blocks, <= max_tile rows each,
    and at least `min_blocks` blocks (so megacore chips shard the row axis)."""
    Mp = _round_up(M, 8)
    nb = max(min_blocks, _cdiv(Mp, max_tile))
    nb = max(1, min(nb, Mp // 8))
    tm = _round_up(_cdiv(Mp, nb), 8)
    grid = _cdiv(Mp, tm)
    return tm, tm * grid, grid


def _pad_rows(x, Mp):
    M = x.shape[0]
    if Mp == M:
        return x
    return jnp.pad(x, ((0, Mp - M), (0, 0)))


# ----------------------------------------------------------------------------
# Pallas kernels
# ----------------------------------------------------------------------------
def _res_stack_kernel(x_ref, w1_ref, b1_ref, w2_ref, b2_ref, o_ref, *, n_layers):
    """n_layers gated residual MLP blocks, activation slab kept on-chip."""
    x = x_ref[...]
    for l in range(n_layers):
        y = jnp.dot(x.astype(jnp.bfloat16), w1_ref[l],
                    preferred_element_type=jnp.float32) + b1_ref[l]
        y = y * jax.nn.sigmoid(y)                              # SiLU in f32
        x = x + jnp.dot(y.astype(jnp.bfloat16), w2_ref[l],
                        preferred_element_type=jnp.float32) + b2_ref[l]
    o_ref[...] = x


def residual_stack_pallas(x, w1, b1, w2, b2, max_tile=512, min_blocks=1):
    """Whole residual stack in ONE pallas_call.  x: (M, D) f32, w*: (NL, D, D) bf16."""
    M, D = x.shape
    NL = w1.shape[0]
    tm, Mp, grid = _row_tiles(M, max_tile, min_blocks)
    xp = _pad_rows(x.astype(jnp.float32), Mp)
    out = pl.pallas_call(
        functools.partial(_res_stack_kernel, n_layers=NL),
        out_shape=jax.ShapeDtypeStruct((Mp, D), jnp.float32),
        grid=(grid,),
        in_specs=[
            pl.BlockSpec((tm, D), lambda i: (i, 0)),
            pl.BlockSpec((NL, D, D), lambda i: (0, 0, 0)),
            pl.BlockSpec((NL, 1, D), lambda i: (0, 0, 0)),
            pl.BlockSpec((NL, D, D), lambda i: (0, 0, 0)),
            pl.BlockSpec((NL, 1, D), lambda i: (0, 0, 0)),
        ],
        out_specs=pl.BlockSpec((tm, D), lambda i: (i, 0)),
        compiler_params=pltpu.CompilerParams(dimension_semantics=("parallel",)),
    )(xp, w1, b1, w2, b2)
    return out[:M] if Mp != M else out


def _duration_kernel(x_ref, wi_ref, bi_ref, wh_ref, bh_ref, o_ref):
    """Fused duration regulator: input proj + SiLU, then all heads as one
    lane-dense matmul.  RAW head output is written; the softplus/sigmoid for the
    two scalar heads is applied in XLA on the extracted (B, L) columns only."""
    h = jnp.dot(x_ref[...].astype(jnp.bfloat16), wi_ref[...],
                preferred_element_type=jnp.float32) + bi_ref[...]
    h = h * jax.nn.sigmoid(h)                                  # SiLU in f32
    o_ref[...] = jnp.dot(h.astype(jnp.bfloat16), wh_ref[...],
                         preferred_element_type=jnp.float32) + bh_ref[...]


def duration_pallas(x, w_in, b_in, w_heads, b_heads, max_tile=512, min_blocks=1):
    M, K = x.shape
    DH = w_in.shape[1]
    N = w_heads.shape[1]
    tm, Mp, grid = _row_tiles(M, max_tile, min_blocks)
    xp = _pad_rows(x.astype(jnp.float32), Mp)
    out = pl.pallas_call(
        _duration_kernel,
        out_shape=jax.ShapeDtypeStruct((Mp, N), jnp.float32),
        grid=(grid,),
        in_specs=[
            pl.BlockSpec((tm, K), lambda i: (i, 0)),
            pl.BlockSpec((K, DH), lambda i: (0, 0)),
            pl.BlockSpec((1, DH), lambda i: (0, 0)),
            pl.BlockSpec((DH, N), lambda i: (0, 0)),
            pl.BlockSpec((1, N), lambda i: (0, 0)),
        ],
        out_specs=pl.BlockSpec((tm, N), lambda i: (i, 0)),
        compiler_params=pltpu.CompilerParams(dimension_semantics=("parallel",)),
    )(xp, w_in, b_in, w_heads, b_heads)
    return out[:M] if Mp != M else out


def _audio_stack_kernel(x_ref, ctx_ref, w1_ref, b1_ref, w2_ref, b2_ref,
                        wh_ref, bh_ref, o_ref, h_scratch, *, n_layers):
    """Audio residual stack (context add fused) + per-codebook logits head.

    Grid = (batch, time-block, codebook); the stack output is computed once per
    (batch, time-block) on codebook 0 and held in a VMEM scratch across the
    (innermost, 'arbitrary') codebook axis; the head is applied with a (H, CB)
    weight slice so the output is written directly in channels-first layout.
    """
    @pl.when(pl.program_id(2) == 0)
    def _():
        x = x_ref[0] + ctx_ref[0]                              # (tm, H) + (1, H)
        for l in range(n_layers):
            y = jnp.dot(x.astype(jnp.bfloat16), w1_ref[l],
                        preferred_element_type=jnp.float32) + b1_ref[l]
            y = y * jax.nn.sigmoid(y)
            x = x + jnp.dot(y.astype(jnp.bfloat16), w2_ref[l],
                            preferred_element_type=jnp.float32) + b2_ref[l]
        h_scratch[...] = x
    logits = jnp.dot(h_scratch[...].astype(jnp.bfloat16), wh_ref[0],
                     preferred_element_type=jnp.float32) + bh_ref[0]
    o_ref[0, 0] = logits.astype(o_ref.dtype)


def audio_stack_pallas(emb, ctx, w1, b1, w2, b2, w_head, b_head,
                       max_tile=256, min_blocks=1):
    """emb: (B, T, H) f32, ctx: (B, 1, H) f32, w_head: (C, H, CB) bf16.
    Returns (B, C, T, CB) bf16 logits, channels-first, no XLA transpose."""
    B, T, H = emb.shape
    NL = w1.shape[0]
    C, _, CB = w_head.shape
    tm, Tp, t_blocks = _row_tiles(T, max_tile, min_blocks)
    if Tp != T:
        emb = jnp.pad(emb, ((0, 0), (0, Tp - T), (0, 0)))
    out = pl.pallas_call(
        functools.partial(_audio_stack_kernel, n_layers=NL),
        out_shape=jax.ShapeDtypeStruct((B, C, Tp, CB), jnp.bfloat16),
        grid=(B, t_blocks, C),
        in_specs=[
            pl.BlockSpec((1, tm, H), lambda b, t, c: (b, t, 0)),
            pl.BlockSpec((1, 1, H), lambda b, t, c: (b, 0, 0)),
            pl.BlockSpec((NL, H, H), lambda b, t, c: (0, 0, 0)),
            pl.BlockSpec((NL, 1, H), lambda b, t, c: (0, 0, 0)),
            pl.BlockSpec((NL, H, H), lambda b, t, c: (0, 0, 0)),
            pl.BlockSpec((NL, 1, H), lambda b, t, c: (0, 0, 0)),
            pl.BlockSpec((1, H, CB), lambda b, t, c: (c, 0, 0)),
            pl.BlockSpec((1, 1, CB), lambda b, t, c: (c, 0, 0)),
        ],
        out_specs=pl.BlockSpec((1, 1, tm, CB), lambda b, t, c: (b, c, t, 0)),
        scratch_shapes=[pltpu.VMEM((tm, H), jnp.float32)],
        compiler_params=pltpu.CompilerParams(
            dimension_semantics=("parallel", "parallel", "arbitrary")),
    )(emb, ctx, w1, b1, w2, b2, w_head, b_head)
    return out[:, :, :T, :] if Tp != T else out


# ----------------------------------------------------------------------------
# Deterministic parameter init (synthetic, no checkpoint load)
# ----------------------------------------------------------------------------
def init_params(seed, *, vocab_size, embed_dim, hidden_dim, num_codebooks,
                codebook_size, style_dim, dur_hidden, text_layers, audio_layers):
    key = jax.random.PRNGKey(seed)

    def nxt():
        nonlocal key
        key, k = jax.random.split(key)
        return k

    def dense_bf16(shape, scale=0.02):
        return (scale * jax.random.normal(nxt(), shape)).astype(jnp.bfloat16)

    E, H = embed_dim, hidden_dim
    p = {}

    # text encoder (Mamba-encoder surrogate: bf16 embedding + gated residual MLPs)
    p["text_embed"] = dense_bf16((vocab_size, E))
    p["text_w1"] = dense_bf16((text_layers, E, E))
    p["text_b1"] = jnp.zeros((text_layers, 1, E), jnp.float32)
    p["text_w2"] = dense_bf16((text_layers, E, E))
    p["text_b2"] = jnp.zeros((text_layers, 1, E), jnp.float32)

    # duration regulator: input proj + fused heads (duration | confidence | regulated | pad)
    p["dur_w_in"] = dense_bf16((E + style_dim, dur_hidden))
    p["dur_b_in"] = jnp.zeros((1, dur_hidden), jnp.float32)
    n_raw = 2 + E
    n_pad = _round_up(n_raw, 128)
    p["dur_w_heads"] = jnp.concatenate(
        [dense_bf16((dur_hidden, 1)),                 # duration head
         dense_bf16((dur_hidden, 1)),                 # confidence head
         dense_bf16((dur_hidden, E)),                 # regulated-features head
         jnp.zeros((dur_hidden, n_pad - n_raw), jnp.bfloat16)], axis=1)
    p["dur_b_heads"] = jnp.zeros((1, n_pad), jnp.float32)

    # audio processor: bf16 flattened codebook table + residual MLPs + per-codebook head
    p["audio_embed_flat"] = dense_bf16((num_codebooks * codebook_size, H))
    p["audio_w1"] = dense_bf16((audio_layers, H, H))
    p["audio_b1"] = jnp.zeros((audio_layers, 1, H), jnp.float32)
    p["audio_w2"] = dense_bf16((audio_layers, H, H))
    p["audio_b2"] = jnp.zeros((audio_layers, 1, H), jnp.float32)
    p["audio_head_w"] = dense_bf16((num_codebooks, H, codebook_size))
    p["audio_head_b"] = jnp.zeros((num_codebooks, 1, codebook_size), jnp.float32)

    # style extractor + top-level
    p["style_w"] = dense_bf16((H, style_dim))
    p["style_b"] = jnp.zeros((1, style_dim), jnp.float32)
    p["text_proj_w"] = dense_bf16((E, H))
    p["text_proj_b"] = jnp.zeros((1, H), jnp.float32)
    p["default_style"] = (0.01 * jax.random.normal(nxt(), (style_dim,))).astype(jnp.float32)
    return p


# ----------------------------------------------------------------------------
# Forward pass (mirrors InfiniteTTSModel.forward)
# ----------------------------------------------------------------------------
def infinite_tts_forward(params, text_tokens, audio_tokens=None,
                         tokens_per_second=75.0):
    B, L = text_tokens.shape
    E = params["text_w1"].shape[-1]
    H = params["audio_w1"].shape[-1]
    STYLE = params["default_style"].shape[0]
    ncores = _num_tensorcores()

    # ---- text encoder: bf16 embedding gather (XLA) + fused gated-residual stack ----
    h = jnp.take(params["text_embed"], text_tokens, axis=0).astype(jnp.float32)  # (B,L,E)
    text_flat = residual_stack_pallas(h.reshape(B * L, E),
                                      params["text_w1"], params["text_b1"],
                                      params["text_w2"], params["text_b2"],
                                      min_blocks=ncores)
    text_features = text_flat.reshape(B, L, E)

    # NOTE: reference computes text_context = text_proj(mean(text_features)) but never
    # uses or returns it -> dead code, dropped (XLA would DCE it anyway).

    # ---- style embedding (tiny B-row math: plain XLA, no kernel launches) ----
    if audio_tokens is not None:
        # mean over dims [1,2]; pseudo_audio broadcast + mean over T is the identity
        audio_mean = jnp.mean(audio_tokens.astype(jnp.float32), axis=(1, 2))   # (B,)
        pooled = jnp.broadcast_to(audio_mean[:, None], (B, H))
        style_embedding = jnp.tanh(
            pooled @ params["style_w"].astype(jnp.float32) + params["style_b"])  # (B, 64)
    else:
        style_embedding = jnp.broadcast_to(params["default_style"][None, :], (B, STYLE))

    # ---- duration regulator (one fused kernel: proj + SiLU + all heads, raw out) ----
    style_exp = jnp.broadcast_to(style_embedding[:, None, :], (B, L, STYLE))
    dr_in = jnp.concatenate([text_features, style_exp], axis=-1).reshape(B * L, E + STYLE)
    raw = duration_pallas(dr_in, params["dur_w_in"], params["dur_b_in"],
                          params["dur_w_heads"], params["dur_b_heads"],
                          min_blocks=ncores)
    predicted_durations = jax.nn.softplus(raw[:, 0]).reshape(B, L)
    duration_confidence = jax.nn.sigmoid(raw[:, 1]).reshape(B, L)
    regulated_features = raw[:, 2:2 + E].reshape(B, L, E)
    duration_tokens = jnp.clip(
        jnp.round(predicted_durations * tokens_per_second), 1, 200).astype(jnp.int32)

    # ---- audio processor (only when audio tokens are given) ----
    if audio_tokens is not None:
        regulated_context = jnp.mean(regulated_features, axis=1)               # (B, E)
        # tiny B-row projection: plain XLA matmul (shared text_proj weights)
        regulated_context = (regulated_context @ params["text_proj_w"].astype(jnp.float32)
                             + params["text_proj_b"])                          # (B, H)
        _, C, T = audio_tokens.shape
        CB = params["audio_head_w"].shape[-1]
        # single gather on the flattened bf16 (C*CB, H) table, summed over codebooks
        idx = audio_tokens + (jnp.arange(C, dtype=audio_tokens.dtype) * CB)[None, :, None]
        emb = jnp.take(params["audio_embed_flat"], idx.reshape(-1), axis=0)
        emb = emb.reshape(B, C, T, H).astype(jnp.float32).sum(axis=1)          # (B, T, H)
        # fused: (+context) -> residual stack -> per-codebook head, channels-first bf16 out
        audio_logits = audio_stack_pallas(
            emb, regulated_context[:, None, :],
            params["audio_w1"], params["audio_b1"],
            params["audio_w2"], params["audio_b2"],
            params["audio_head_w"], params["audio_head_b"])                    # (B,C,T,CB) bf16
    else:
        audio_logits = None

    return {
        "logits": audio_logits,
        "predicted_durations": predicted_durations,
        "duration_tokens": duration_tokens,
        "duration_confidence": duration_confidence,
        "text_features": text_features,
        "regulated_features": regulated_features,
        "style_embedding": style_embedding,
        "infinite_processing": True,
    }


# ----------------------------------------------------------------------------
# Main
# ----------------------------------------------------------------------------
if __name__ == "__main__":
    # lane-dense config matching the module's constructor defaults
    VOCAB = 50
    E, HID = 128, 256
    NUM_CB, CB_SIZE = 4, 1024
    STYLE, DUR_HID = 64, 128

    params = init_params(
        seed=0, vocab_size=VOCAB, embed_dim=E, hidden_dim=HID,
        num_codebooks=NUM_CB, codebook_size=CB_SIZE, style_dim=STYLE,
        dur_hidden=DUR_HID, text_layers=4, audio_layers=3)

    key = jax.random.PRNGKey(0)
    k1, k2 = jax.random.split(key)
    B, L, T = 2, 8, 8
    text_tokens = jax.random.randint(k1, (B, L), 0, VOCAB, dtype=jnp.int32)
    audio_tokens = jax.random.randint(k2, (B, NUM_CB, T), 0, CB_SIZE, dtype=jnp.int32)

    fwd = jax.jit(lambda p, t, a: infinite_tts_forward(p, t, a))
    out = fwd(params, text_tokens, audio_tokens)
    jax.block_until_ready(out["logits"])
    jax.block_until_ready(out["predicted_durations"])

    assert out["logits"].shape == (B, NUM_CB, T, CB_SIZE)
    assert out["predicted_durations"].shape == (B, L)
    assert out["duration_tokens"].dtype == jnp.int32
    assert out["duration_confidence"].shape == (B, L)
    assert out["style_embedding"].shape == (B, STYLE)
    assert out["regulated_features"].shape == (B, L, E)
    print("KERNEL_OK")
</pallas_src>

<mosaic_0001>
module attributes {stable_mosaic.version = 11 : i64} {
  func.func @_res_stack_kernel(%arg0: i32, %arg1: memref<16x128xf32, #tpu.memory_space<vmem>>, %arg2: memref<4x128x128xbf16, #tpu.memory_space<vmem>>, %arg3: memref<4x1x128xf32, #tpu.memory_space<vmem>>, %arg4: memref<4x128x128xbf16, #tpu.memory_space<vmem>>, %arg5: memref<4x1x128xf32, #tpu.memory_space<vmem>>, %arg6: memref<16x128xf32, #tpu.memory_space<vmem>>) attributes {dimension_semantics = [#tpu.dimension_semantics<parallel>], iteration_bounds = array<i64: 1>, scalar_prefetch = 0 : i64, scratch_operands = 0 : i64, tpu.core_type = #tpu.core_type<tc>, window_params = [{transform_indices = @transform_0, window_bounds = array<i64: 16, 128>}, {pipeline_mode = #tpu.pipeline_mode<synchronous>, transform_indices = @transform_1, window_bounds = array<i64: 4, 128, 128>}, {pipeline_mode = #tpu.pipeline_mode<synchronous>, transform_indices = @transform_2, window_bounds = array<i64: 4, 1, 128>}, {pipeline_mode = #tpu.pipeline_mode<synchronous>, transform_indices = @transform_3, window_bounds = array<i64: 4, 128, 128>}, {pipeline_mode = #tpu.pipeline_mode<synchronous>, transform_indices = @transform_4, window_bounds = array<i64: 4, 1, 128>}, {transform_indices = @transform_5, window_bounds = array<i64: 16, 128>}]} {
    %c0 = arith.constant 0 : index
    %c0_0 = arith.constant 0 : index
    %0 = vector.load %arg1[%c0, %c0_0] : memref<16x128xf32, #tpu.memory_space<vmem>>, vector<16x128xf32>
    %1 = arith.truncf %0 : vector<16x128xf32> to vector<16x128xbf16>
    %c0_1 = arith.constant 0 : index
    %c0_2 = arith.constant 0 : index
    %c0_3 = arith.constant 0 : index
    %2 = vector.load %arg2[%c0_1, %c0_2, %c0_3] : memref<4x128x128xbf16, #tpu.memory_space<vmem>>, vector<1x128x128xbf16>
    %3 = vector.shape_cast %2 : vector<1x128x128xbf16> to vector<128x128xbf16>
    %cst = arith.constant dense<0.000000e+00> : vector<16x128xf32>
    %4 = tpu.matmul %1, %3, %cst {dimension_numbers = #tpu.dot_dimension_numbers<[1], [0], [0], [1], [0, 0, 1, 1], [], []>} : vector<16x128xbf16>, vector<128x128xbf16>, vector<16x128xf32> -> vector<16x128xf32>
    %c0_4 = arith.constant 0 : index
    %c0_5 = arith.constant 0 : index
    %c0_6 = arith.constant 0 : index
    %5 = vector.load %arg3[%c0_4, %c0_5, %c0_6] : memref<4x1x128xf32, #tpu.memory_space<vmem>>, vector<1x1x128xf32>
    %6 = vector.shape_cast %5 : vector<1x1x128xf32> to vector<1x128xf32>
    %7 = vector.broadcast %6 : vector<1x128xf32> to vector<16x128xf32>
    %8 = arith.addf %4, %7 : vector<16x128xf32>
    %9 = arith.negf %8 : vector<16x128xf32>
    %10 = math.exp %9 : vector<16x128xf32>
    %cst_7 = arith.constant 1.000000e+00 : f32
    %11 = vector.broadcast %cst_7 : f32 to vector<16x128xf32>
    %12 = arith.addf %11, %10 : vector<16x128xf32>
    %13 = arith.divf %11, %12 : vector<16x128xf32>
    %14 = arith.mulf %8, %13 : vector<16x128xf32>
    %15 = arith.truncf %14 : vector<16x128xf32> to vector<16x128xbf16>
    %c0_8 = arith.constant 0 : index
    %c0_9 = arith.constant 0 : index
    %c0_10 = arith.constant 0 : index
    %16 = vector.load %arg4[%c0_8, %c0_9, %c0_10] : memref<4x128x128xbf16, #tpu.memory_space<vmem>>, vector<1x128x128xbf16>
    %17 = vector.shape_cast %16 : vector<1x128x128xbf16> to vector<128x128xbf16>
    %cst_11 = arith.constant dense<0.000000e+00> : vector<16x128xf32>
    %18 = tpu.matmul %15, %17, %cst_11 {dimension_numbers = #tpu.dot_dimension_numbers<[1], [0], [0], [1], [0, 0, 1, 1], [], []>} : vector<16x128xbf16>, vector<128x128xbf16>, vector<16x128xf32> -> vector<16x128xf32>
    %19 = arith.addf %0, %18 : vector<16x128xf32>
    %c0_12 = arith.constant 0 : index
    %c0_13 = arith.constant 0 : index
    %c0_14 = arith.constant 0 : index
    %20 = vector.load %arg5[%c0_12, %c0_13, %c0_14] : memref<4x1x128xf32, #tpu.memory_space<vmem>>, vector<1x1x128xf32>
    %21 = vector.shape_cast %20 : vector<1x1x128xf32> to vector<1x128xf32>
    %22 = vector.broadcast %21 : vector<1x128xf32> to vector<16x128xf32>
    %23 = arith.addf %19, %22 : vector<16x128xf32>
    %24 = arith.truncf %23 : vector<16x128xf32> to vector<16x128xbf16>
    %c1 = arith.constant 1 : index
    %c0_15 = arith.constant 0 : index
    %c0_16 = arith.constant 0 : index
    %25 = vector.load %arg2[%c1, %c0_15, %c0_16] : memref<4x128x128xbf16, #tpu.memory_space<vmem>>, vector<1x128x128xbf16>
    %26 = vector.shape_cast %25 : vector<1x128x128xbf16> to vector<128x128xbf16>
    %cst_17 = arith.constant dense<0.000000e+00> : vector<16x128xf32>
    %27 = tpu.matmul %24, %26, %cst_17 {dimension_numbers = #tpu.dot_dimension_numbers<[1], [0], [0], [1], [0, 0, 1, 1], [], []>} : vector<16x128xbf16>, vector<128x128xbf16>, vector<16x128xf32> -> vector<16x128xf32>
    %c1_18 = arith.constant 1 : index
    %c0_19 = arith.constant 0 : index
    %c0_20 = arith.constant 0 : index
    %28 = vector.load %arg3[%c1_18, %c0_19, %c0_20] : memref<4x1x128xf32, #tpu.memory_space<vmem>>, vector<1x1x128xf32>
    %29 = vector.shape_cast %28 : vector<1x1x128xf32> to vector<1x128xf32>
    %30 = vector.broadcast %29 : vector<1x128xf32> to vector<16x128xf32>
    %31 = arith.addf %27, %30 : vector<16x128xf32>
    %32 = arith.negf %31 : vector<16x128xf32>
    %33 = math.exp %32 : vector<16x128xf32>
    %cst_21 = arith.constant 1.000000e+00 : f32
    %34 = vector.broadcast %cst_21 : f32 to vector<16x128xf32>
    %35 = arith.addf %34, %33 : vector<16x128xf32>
    %36 = arith.divf %34, %35 : vector<16x128xf32>
    %37 = arith.mulf %31, %36 : vector<16x128xf32>
    %38 = arith.truncf %37 : vector<16x128xf32> to vector<16x128xbf16>
    %c1_22 = arith.constant 1 : index
    %c0_23 = arith.constant 0 : index
    %c0_24 = arith.constant 0 : index
    %39 = vector.load %arg4[%c1_22, %c0_23, %c0_24] : memref<4x128x128xbf16, #tpu.memory_space<vmem>>, vector<1x128x128xbf16>
    %40 = vector.shape_cast %39 : vector<1x128x128xbf16> to vector<128x128xbf16>
    %cst_25 = arith.constant dense<0.000000e+00> : vector<16x128xf32>
    %41 = tpu.matmul %38, %40, %cst_25 {dimension_numbers = #tpu.dot_dimension_numbers<[1], [0], [0], [1], [0, 0, 1, 1], [], []>} : vector<16x128xbf16>, vector<128x128xbf16>, vector<16x128xf32> -> vector<16x128xf32>
    %42 = arith.addf %23, %41 : vector<16x128xf32>
    %c1_26 = arith.constant 1 : index
    %c0_27 = arith.constant 0 : index
    %c0_28 = arith.constant 0 : index
    %43 = vector.load %arg5[%c1_26, %c0_27, %c0_28] : memref<4x1x128xf32, #tpu.memory_space<vmem>>, vector<1x1x128xf32>
    %44 = vector.shape_cast %43 : vector<1x1x128xf32> to vector<1x128xf32>
    %45 = vector.broadcast %44 : vector<1x128xf32> to vector<16x128xf32>
    %46 = arith.addf %42, %45 : vector<16x128xf32>
    %47 = arith.truncf %46 : vector<16x128xf32> to vector<16x128xbf16>
    %c2 = arith.constant 2 : index
    %c0_29 = arith.constant 0 : index
    %c0_30 = arith.constant 0 : index
    %48 = vector.load %arg2[%c2, %c0_29, %c0_30] : memref<4x128x128xbf16, #tpu.memory_space<vmem>>, vector<1x128x128xbf16>
    %49 = vector.shape_cast %48 : vector<1x128x128xbf16> to vector<128x128xbf16>
    %cst_31 = arith.constant dense<0.000000e+00> : vector<16x128xf32>
    %50 = tpu.matmul %47, %49, %cst_31 {dimension_numbers = #tpu.dot_dimension_numbers<[1], [0], [0], [1], [0, 0, 1, 1], [], []>} : vector<16x128xbf16>, vector<128x128xbf16>, vector<16x128xf32> -> vector<16x128xf32>
    %c2_32 = arith.constant 2 : index
    %c0_33 = arith.constant 0 : index
    %c0_34 = arith.constant 0 : index
    %51 = vector.load %arg3[%c2_32, %c0_33, %c0_34] : memref<4x1x128xf32, #tpu.memory_space<vmem>>, vector<1x1x128xf32>
    %52 = vector.shape_cast %51 : vector<1x1x128xf32> to vector<1x128xf32>
    %53 = vector.broadcast %52 : vector<1x128xf32> to vector<16x128xf32>
    %54 = arith.addf %50, %53 : vector<16x128xf32>
    %55 = arith.negf %54 : vector<16x128xf32>
    %56 = math.exp %55 : vector<16x128xf32>
    %cst_35 = arith.constant 1.000000e+00 : f32
    %57 = vector.broadcast %cst_35 : f32 to vector<16x128xf32>
    %58 = arith.addf %57, %56 : vector<16x128xf32>
    %59 = arith.divf %57, %58 : vector<16x128xf32>
    %60 = arith.mulf %54, %59 : vector<16x128xf32>
    %61 = arith.truncf %60 : vector<16x128xf32> to vector<16x128xbf16>
    %c2_36 = arith.constant 2 : index
    %c0_37 = arith.constant 0 : index
    %c0_38 = arith.constant 0 : index
    %62 = vector.load %arg4[%c2_36, %c0_37, %c0_38] : memref<4x128x128xbf16, #tpu.memory_space<vmem>>, vector<1x128x128xbf16>
    %63 = vector.shape_cast %62 : vector<1x128x128xbf16> to vector<128x128xbf16>
    %cst_39 = arith.constant dense<0.000000e+00> : vector<16x128xf32>
    %64 = tpu.matmul %61, %63, %cst_39 {dimension_numbers = #tpu.dot_dimension_numbers<[1], [0], [0], [1], [0, 0, 1, 1], [], []>} : vector<16x128xbf16>, vector<128x128xbf16>, vector<16x128xf32> -> vector<16x128xf32>
    %65 = arith.addf %46, %64 : vector<16x128xf32>
    %c2_40 = arith.constant 2 : index
    %c0_41 = arith.constant 0 : index
    %c0_42 = arith.constant 0 : index
    %66 = vector.load %arg5[%c2_40, %c0_41, %c0_42] : memref<4x1x128xf32, #tpu.memory_space<vmem>>, vector<1x1x128xf32>
    %67 = vector.shape_cast %66 : vector<1x1x128xf32> to vector<1x128xf32>
    %68 = vector.broadcast %67 : vector<1x128xf32> to vector<16x128xf32>
    %69 = arith.addf %65, %68 : vector<16x128xf32>
    %70 = arith.truncf %69 : vector<16x128xf32> to vector<16x128xbf16>
    %c3 = arith.constant 3 : index
    %c0_43 = arith.constant 0 : index
    %c0_44 = arith.constant 0 : index
    %71 = vector.load %arg2[%c3, %c0_43, %c0_44] : memref<4x128x128xbf16, #tpu.memory_space<vmem>>, vector<1x128x128xbf16>
    %72 = vector.shape_cast %71 : vector<1x128x128xbf16> to vector<128x128xbf16>
    %cst_45 = arith.constant dense<0.000000e+00> : vector<16x128xf32>
    %73 = tpu.matmul %70, %72, %cst_45 {dimension_numbers = #tpu.dot_dimension_numbers<[1], [0], [0], [1], [0, 0, 1, 1], [], []>} : vector<16x128xbf16>, vector<128x128xbf16>, vector<16x128xf32> -> vector<16x128xf32>
    %c3_46 = arith.constant 3 : index
    %c0_47 = arith.constant 0 : index
    %c0_48 = arith.constant 0 : index
    %74 = vector.load %arg3[%c3_46, %c0_47, %c0_48] : memref<4x1x128xf32, #tpu.memory_space<vmem>>, vector<1x1x128xf32>
    %75 = vector.shape_cast %74 : vector<1x1x128xf32> to vector<1x128xf32>
    %76 = vector.broadcast %75 : vector<1x128xf32> to vector<16x128xf32>
    %77 = arith.addf %73, %76 : vector<16x128xf32>
    %78 = arith.negf %77 : vector<16x128xf32>
    %79 = math.exp %78 : vector<16x128xf32>
    %cst_49 = arith.constant 1.000000e+00 : f32
    %80 = vector.broadcast %cst_49 : f32 to vector<16x128xf32>
    %81 = arith.addf %80, %79 : vector<16x128xf32>
    %82 = arith.divf %80, %81 : vector<16x128xf32>
    %83 = arith.mulf %77, %82 : vector<16x128xf32>
    %84 = arith.truncf %83 : vector<16x128xf32> to vector<16x128xbf16>
    %c3_50 = arith.constant 3 : index
    %c0_51 = arith.constant 0 : index
    %c0_52 = arith.constant 0 : index
    %85 = vector.load %arg4[%c3_50, %c0_51, %c0_52] : memref<4x128x128xbf16, #tpu.memory_space<vmem>>, vector<1x128x128xbf16>
    %86 = vector.shape_cast %85 : vector<1x128x128xbf16> to vector<128x128xbf16>
    %cst_53 = arith.constant dense<0.000000e+00> : vector<16x128xf32>
    %87 = tpu.matmul %84, %86, %cst_53 {dimension_numbers = #tpu.dot_dimension_numbers<[1], [0], [0], [1], [0, 0, 1, 1], [], []>} : vector<16x128xbf16>, vector<128x128xbf16>, vector<16x128xf32> -> vector<16x128xf32>
    %88 = arith.addf %69, %87 : vector<16x128xf32>
    %c3_54 = arith.constant 3 : index
    %c0_55 = arith.constant 0 : index
    %c0_56 = arith.constant 0 : index
    %89 = vector.load %arg5[%c3_54, %c0_55, %c0_56] : memref<4x1x128xf32, #tpu.memory_space<vmem>>, vector<1x1x128xf32>
    %90 = vector.shape_cast %89 : vector<1x1x128xf32> to vector<1x128xf32>
    %91 = vector.broadcast %90 : vector<1x128xf32> to vector<16x128xf32>
    %92 = arith.addf %88, %91 : vector<16x128xf32>
    %c0_57 = arith.constant 0 : index
    %c0_58 = arith.constant 0 : index
    %93 = vector.load %arg6[%c0_57, %c0_58] : memref<16x128xf32, #tpu.memory_space<vmem>>, vector<16x128xf32>
    tpu.vector_store %arg6[%c0_57, %c0_58], %92 {strides = array<i32>} : memref<16x128xf32, #tpu.memory_space<vmem>>, vector<16x128xf32>,
    return
  }
  func.func @transform_0(%arg0: i32) -> (i32, i32) {
    %c0_i32 = arith.constant 0 : i32
    %c0_i32_0 = arith.constant 0 : i32
    return %arg0, %c0_i32 : i32, i32
  }
  func.func @transform_1(%arg0: i32) -> (i32, i32, i32) {
    %c0_i32 = arith.constant 0 : i32
    %c0_i32_0 = arith.constant 0 : i32
    %c0_i32_1 = arith.constant 0 : i32
    %c0_i32_2 = arith.constant 0 : i32
    return %c0_i32, %c0_i32_0, %c0_i32_1 : i32, i32, i32
  }
  func.func @transform_2(%arg0: i32) -> (i32, i32, i32) {
    %c0_i32 = arith.constant 0 : i32
    %c0_i32_0 = arith.constant 0 : i32
    %c0_i32_1 = arith.constant 0 : i32
    %c0_i32_2 = arith.constant 0 : i32
    return %c0_i32, %c0_i32_0, %c0_i32_1 : i32, i32, i32
  }
  func.func @transform_3(%arg0: i32) -> (i32, i32, i32) {
    %c0_i32 = arith.constant 0 : i32
    %c0_i32_0 = arith.constant 0 : i32
    %c0_i32_1 = arith.constant 0 : i32
    %c0_i32_2 = arith.constant 0 : i32
    return %c0_i32, %c0_i32_0, %c0_i32_1 : i32, i32, i32
  }
  func.func @transform_4(%arg0: i32) -> (i32, i32, i32) {
    %c0_i32 = arith.constant 0 : i32
    %c0_i32_0 = arith.constant 0 : i32
    %c0_i32_1 = arith.constant 0 : i32
    %c0_i32_2 = arith.constant 0 : i32
    return %c0_i32, %c0_i32_0, %c0_i32_1 : i32, i32, i32
  }
  func.func @transform_5(%arg0: i32) -> (i32, i32) {
    %c0_i32 = arith.constant 0 : i32
    %c0_i32_0 = arith.constant 0 : i32
    return %arg0, %c0_i32 : i32, i32
  }
}

module attributes {stable_mosaic.version = 11 : i64} {
  func.func @_duration_kernel(%arg0: i32, %arg1: memref<16x192xf32, #tpu.memory_space<vmem>>, %arg2: memref<192x128xbf16, #tpu.memory_space<vmem>>, %arg3: memref<1x128xf32, #tpu.memory_space<vmem>>, %arg4: memref<128x256xbf16, #tpu.memory_space<vmem>>, %arg5: memref<1x256xf32, #tpu.memory_space<vmem>>, %arg6: memref<16x256xf32, #tpu.memory_space<vmem>>) attributes {dimension_semantics = [#tpu.dimension_semantics<parallel>], iteration_bounds = array<i64: 1>, scalar_prefetch = 0 : i64, scratch_operands = 0 : i64, tpu.core_type = #tpu.core_type<tc>, window_params = [{transform_indices = @transform_0, window_bounds = array<i64: 16, 192>}, {pipeline_mode = #tpu.pipeline_mode<synchronous>, transform_indices = @transform_1, window_bounds = array<i64: 192, 128>}, {pipeline_mode = #tpu.pipeline_mode<synchronous>, transform_indices = @transform_2, window_bounds = array<i64: 1, 128>}, {pipeline_mode = #tpu.pipeline_mode<synchronous>, transform_indices = @transform_3, window_bounds = array<i64: 128, 256>}, {pipeline_mode = #tpu.pipeline_mode<synchronous>, transform_indices = @transform_4, window_bounds = array<i64: 1, 256>}, {transform_indices = @transform_5, window_bounds = array<i64: 16, 256>}]} {
    %c0 = arith.constant 0 : index
    %c0_0 = arith.constant 0 : index
    %0 = vector.load %arg1[%c0, %c0_0] : memref<16x192xf32, #tpu.memory_space<vmem>>, vector<16x192xf32>
    %1 = arith.truncf %0 : vector<16x192xf32> to vector<16x192xbf16>
    %c0_1 = arith.constant 0 : index
    %c0_2 = arith.constant 0 : index
    %2 = vector.load %arg2[%c0_1, %c0_2] : memref<192x128xbf16, #tpu.memory_space<vmem>>, vector<192x128xbf16>
    %cst = arith.constant dense<0.000000e+00> : vector<16x128xf32>
    %3 = tpu.matmul %1, %2, %cst {dimension_numbers = #tpu.dot_dimension_numbers<[1], [0], [0], [1], [0, 0, 1, 1], [], []>} : vector<16x192xbf16>, vector<192x128xbf16>, vector<16x128xf32> -> vector<16x128xf32>
    %c0_3 = arith.constant 0 : index
    %c0_4 = arith.constant 0 : index
    %4 = vector.load %arg3[%c0_3, %c0_4] : memref<1x128xf32, #tpu.memory_space<vmem>>, vector<1x128xf32>
    %5 = vector.broadcast %4 : vector<1x128xf32> to vector<16x128xf32>
    %6 = arith.addf %3, %5 : vector<16x128xf32>
    %7 = arith.negf %6 : vector<16x128xf32>
    %8 = math.exp %7 : vector<16x128xf32>
    %cst_5 = arith.constant 1.000000e+00 : f32
    %9 = vector.broadcast %cst_5 : f32 to vector<16x128xf32>
    %10 = arith.addf %9, %8 : vector<16x128xf32>
    %11 = arith.divf %9, %10 : vector<16x128xf32>
    %12 = arith.mulf %6, %11 : vector<16x128xf32>
    %13 = arith.truncf %12 : vector<16x128xf32> to vector<16x128xbf16>
    %c0_6 = arith.constant 0 : index
    %c0_7 = arith.constant 0 : index
    %14 = vector.load %arg4[%c0_6, %c0_7] : memref<128x256xbf16, #tpu.memory_space<vmem>>, vector<128x256xbf16>
    %cst_8 = arith.constant dense<0.000000e+00> : vector<16x256xf32>
    %15 = tpu.matmul %13, %14, %cst_8 {dimension_numbers = #tpu.dot_dimension_numbers<[1], [0], [0], [1], [0, 0, 1, 1], [], []>} : vector<16x128xbf16>, vector<128x256xbf16>, vector<16x256xf32> -> vector<16x256xf32>
    %c0_9 = arith.constant 0 : index
    %c0_10 = arith.constant 0 : index
    %16 = vector.load %arg5[%c0_9, %c0_10] : memref<1x256xf32, #tpu.memory_space<vmem>>, vector<1x256xf32>
    %17 = vector.broadcast %16 : vector<1x256xf32> to vector<16x256xf32>
    %18 = arith.addf %15, %17 : vector<16x256xf32>
    %c0_11 = arith.constant 0 : index
    %c0_12 = arith.constant 0 : index
    %19 = vector.load %arg6[%c0_11, %c0_12] : memref<16x256xf32, #tpu.memory_space<vmem>>, vector<16x256xf32>
    tpu.vector_store %arg6[%c0_11, %c0_12], %18 {strides = array<i32>} : memref<16x256xf32, #tpu.memory_space<vmem>>, vector<16x256xf32>,
    return
  }
  func.func @transform_0(%arg0: i32) -> (i32, i32) {
    %c0_i32 = arith.constant 0 : i32
    %c0_i32_0 = arith.constant 0 : i32
    return %arg0, %c0_i32 : i32, i32
  }
  func.func @transform_1(%arg0: i32) -> (i32, i32) {
    %c0_i32 = arith.constant 0 : i32
    %c0_i32_0 = arith.constant 0 : i32
    %c0_i32_1 = arith.constant 0 : i32
    return %c0_i32, %c0_i32_0 : i32, i32
  }
  func.func @transform_2(%arg0: i32) -> (i32, i32) {
    %c0_i32 = arith.constant 0 : i32
    %c0_i32_0 = arith.constant 0 : i32
    %c0_i32_1 = arith.constant 0 : i32
    return %c0_i32, %c0_i32_0 : i32, i32
  }
  func.func @transform_3(%arg0: i32) -> (i32, i32) {
    %c0_i32 = arith.constant 0 : i32
    %c0_i32_0 = arith.constant 0 : i32
    %c0_i32_1 = arith.constant 0 : i32
    return %c0_i32, %c0_i32_0 : i32, i32
  }
  func.func @transform_4(%arg0: i32) -> (i32, i32) {
    %c0_i32 = arith.constant 0 : i32
    %c0_i32_0 = arith.constant 0 : i32
    %c0_i32_1 = arith.constant 0 : i32
    return %c0_i32, %c0_i32_0 : i32, i32
  }
  func.func @transform_5(%arg0: i32) -> (i32, i32) {
    %c0_i32 = arith.constant 0 : i32
    %c0_i32_0 = arith.constant 0 : i32
    return %arg0, %c0_i32 : i32, i32
  }
}

module attributes {stable_mosaic.version = 11 : i64} {
  func.func @_audio_stack_kernel(%arg0: i32, %arg1: i32, %arg2: i32, %arg3: memref<1x8x256xf32, #tpu.memory_space<vmem>>, %arg4: memref<1x1x256xf32, #tpu.memory_space<vmem>>, %arg5: memref<3x256x256xbf16, #tpu.memory_space<vmem>>, %arg6: memref<3x1x256xf32, #tpu.memory_space<vmem>>, %arg7: memref<3x256x256xbf16, #tpu.memory_space<vmem>>, %arg8: memref<3x1x256xf32, #tpu.memory_space<vmem>>, %arg9: memref<1x256x1024xbf16, #tpu.memory_space<vmem>>, %arg10: memref<1x1x1024xf32, #tpu.memory_space<vmem>>, %arg11: memref<1x1x8x1024xbf16, #tpu.memory_space<vmem>>, %arg12: memref<8x256xf32, #tpu.memory_space<vmem>>) attributes {dimension_semantics = [#tpu.dimension_semantics<parallel>, #tpu.dimension_semantics<parallel>, #tpu.dimension_semantics<arbitrary>], iteration_bounds = array<i64: 2, 1, 4>, scalar_prefetch = 0 : i64, scratch_operands = 1 : i64, tpu.core_type = #tpu.core_type<tc>, window_params = [{transform_indices = @transform_0, window_bounds = array<i64: 1, 8, 256>}, {transform_indices = @transform_1, window_bounds = array<i64: 1, 1, 256>}, {pipeline_mode = #tpu.pipeline_mode<synchronous>, transform_indices = @transform_2, window_bounds = array<i64: 3, 256, 256>}, {pipeline_mode = #tpu.pipeline_mode<synchronous>, transform_indices = @transform_3, window_bounds = array<i64: 3, 1, 256>}, {pipeline_mode = #tpu.pipeline_mode<synchronous>, transform_indices = @transform_4, window_bounds = array<i64: 3, 256, 256>}, {pipeline_mode = #tpu.pipeline_mode<synchronous>, transform_indices = @transform_5, window_bounds = array<i64: 3, 1, 256>}, {transform_indices = @transform_6, window_bounds = array<i64: 1, 256, 1024>}, {transform_indices = @transform_7, window_bounds = array<i64: 1, 1, 1024>}, {transform_indices = @transform_8, window_bounds = array<i64: 1, 1, 8, 1024>}]} {
    %c0_i32 = arith.constant 0 : i32
    %0 = arith.cmpi eq, %arg2, %c0_i32 : i32
    %1 = arith.extui %0 : i1 to i32
    %c0_i32_0 = arith.constant 0 : i32
    %2 = arith.cmpi ne, %1, %c0_i32_0 : i32
    scf.if %2 {
      %c0_12 = arith.constant 0 : index
      %c0_13 = arith.constant 0 : index
      %c0_14 = arith.constant 0 : index
      %16 = vector.load %arg3[%c0_12, %c0_13, %c0_14] : memref<1x8x256xf32, #tpu.memory_space<vmem>>, vector<1x8x256xf32>
      %17 = vector.shape_cast %16 : vector<1x8x256xf32> to vector<8x256xf32>
      %c0_15 = arith.constant 0 : index
      %c0_16 = arith.constant 0 : index
      %c0_17 = arith.constant 0 : index
      %18 = vector.load %arg4[%c0_15, %c0_16, %c0_17] : memref<1x1x256xf32, #tpu.memory_space<vmem>>, vector<1x1x256xf32>
      %19 = vector.shape_cast %18 : vector<1x1x256xf32> to vector<1x256xf32>
      %20 = vector.broadcast %19 : vector<1x256xf32> to vector<8x256xf32>
      %21 = arith.addf %17, %20 : vector<8x256xf32>
      %22 = arith.truncf %21 : vector<8x256xf32> to vector<8x256xbf16>
      %c0_18 = arith.constant 0 : index
      %c0_19 = arith.constant 0 : index
      %c0_20 = arith.constant 0 : index
      %23 = vector.load %arg5[%c0_18, %c0_19, %c0_20] : memref<3x256x256xbf16, #tpu.memory_space<vmem>>, vector<1x256x256xbf16>
      %24 = vector.shape_cast %23 : vector<1x256x256xbf16> to vector<256x256xbf16>
      %cst_21 = arith.constant dense<0.000000e+00> : vector<8x256xf32>
      %25 = tpu.matmul %22, %24, %cst_21 {dimension_numbers = #tpu.dot_dimension_numbers<[1], [0], [0], [1], [0, 0, 1, 1], [], []>} : vector<8x256xbf16>, vector<256x256xbf16>, vector<8x256xf32> -> vector<8x256xf32>
      %c0_22 = arith.constant 0 : index
      %c0_23 = arith.constant 0 : index
      %c0_24 = arith.constant 0 : index
      %26 = vector.load %arg6[%c0_22, %c0_23, %c0_24] : memref<3x1x256xf32, #tpu.memory_space<vmem>>, vector<1x1x256xf32>
      %27 = vector.shape_cast %26 : vector<1x1x256xf32> to vector<1x256xf32>
      %28 = vector.broadcast %27 : vector<1x256xf32> to vector<8x256xf32>
      %29 = arith.addf %25, %28 : vector<8x256xf32>
      %30 = arith.negf %29 : vector<8x256xf32>
      %31 = math.exp %30 : vector<8x256xf32>
      %cst_25 = arith.constant 1.000000e+00 : f32
      %32 = vector.broadcast %cst_25 : f32 to vector<8x256xf32>
      %33 = arith.addf %32, %31 : vector<8x256xf32>
      %34 = arith.divf %32, %33 : vector<8x256xf32>
      %35 = arith.mulf %29, %34 : vector<8x256xf32>
      %36 = arith.truncf %35 : vector<8x256xf32> to vector<8x256xbf16>
      %c0_26 = arith.constant 0 : index
      %c0_27 = arith.constant 0 : index
      %c0_28 = arith.constant 0 : index
      %37 = vector.load %arg7[%c0_26, %c0_27, %c0_28] : memref<3x256x256xbf16, #tpu.memory_space<vmem>>, vector<1x256x256xbf16>
      %38 = vector.shape_cast %37 : vector<1x256x256xbf16> to vector<256x256xbf16>
      %cst_29 = arith.constant dense<0.000000e+00> : vector<8x256xf32>
      %39 = tpu.matmul %36, %38, %cst_29 {dimension_numbers = #tpu.dot_dimension_numbers<[1], [0], [0], [1], [0, 0, 1, 1], [], []>} : vector<8x256xbf16>, vector<256x256xbf16>, vector<8x256xf32> -> vector<8x256xf32>
      %40 = arith.addf %21, %39 : vector<8x256xf32>
      %c0_30 = arith.constant 0 : index
      %c0_31 = arith.constant 0 : index
      %c0_32 = arith.constant 0 : index
      %41 = vector.load %arg8[%c0_30, %c0_31, %c0_32] : memref<3x1x256xf32, #tpu.memory_space<vmem>>, vector<1x1x256xf32>
      %42 = vector.shape_cast %41 : vector<1x1x256xf32> to vector<1x256xf32>
      %43 = vector.broadcast %42 : vector<1x256xf32> to vector<8x256xf32>
      %44 = arith.addf %40, %43 : vector<8x256xf32>
      %45 = arith.truncf %44 : vector<8x256xf32> to vector<8x256xbf16>
      %c1 = arith.constant 1 : index
      %c0_33 = arith.constant 0 : index
      %c0_34 = arith.constant 0 : index
      %46 = vector.load %arg5[%c1, %c0_33, %c0_34] : memref<3x256x256xbf16, #tpu.memory_space<vmem>>, vector<1x256x256xbf16>
      %47 = vector.shape_cast %46 : vector<1x256x256xbf16> to vector<256x256xbf16>
      %cst_35 = arith.constant dense<0.000000e+00> : vector<8x256xf32>
      %48 = tpu.matmul %45, %47, %cst_35 {dimension_numbers = #tpu.dot_dimension_numbers<[1], [0], [0], [1], [0, 0, 1, 1], [], []>} : vector<8x256xbf16>, vector<256x256xbf16>, vector<8x256xf32> -> vector<8x256xf32>
      %c1_36 = arith.constant 1 : index
      %c0_37 = arith.constant 0 : index
      %c0_38 = arith.constant 0 : index
      %49 = vector.load %arg6[%c1_36, %c0_37, %c0_38] : memref<3x1x256xf32, #tpu.memory_space<vmem>>, vector<1x1x256xf32>
      %50 = vector.shape_cast %49 : vector<1x1x256xf32> to vector<1x256xf32>
      %51 = vector.broadcast %50 : vector<1x256xf32> to vector<8x256xf32>
      %52 = arith.addf %48, %51 : vector<8x256xf32>
      %53 = arith.negf %52 : vector<8x256xf32>
      %54 = math.exp %53 : vector<8x256xf32>
      %cst_39 = arith.constant 1.000000e+00 : f32
      %55 = vector.broadcast %cst_39 : f32 to vector<8x256xf32>
      %56 = arith.addf %55, %54 : vector<8x256xf32>
      %57 = arith.divf %55, %56 : vector<8x256xf32>
      %58 = arith.mulf %52, %57 : vector<8x256xf32>
      %59 = arith.truncf %58 : vector<8x256xf32> to vector<8x256xbf16>
      %c1_40 = arith.constant 1 : index
      %c0_41 = arith.constant 0 : index
      %c0_42 = arith.constant 0 : index
      %60 = vector.load %arg7[%c1_40, %c0_41, %c0_42] : memref<3x256x256xbf16, #tpu.memory_space<vmem>>, vector<1x256x256xbf16>
      %61 = vector.shape_cast %60 : vector<1x256x256xbf16> to vector<256x256xbf16>
      %cst_43 = arith.constant dense<0.000000e+00> : vector<8x256xf32>
      %62 = tpu.matmul %59, %61, %cst_43 {dimension_numbers = #tpu.dot_dimension_numbers<[1], [0], [0], [1], [0, 0, 1, 1], [], []>} : vector<8x256xbf16>, vector<256x256xbf16>, vector<8x256xf32> -> vector<8x256xf32>
      %63 = arith.addf %44, %62 : vector<8x256xf32>
      %c1_44 = arith.constant 1 : index
      %c0_45 = arith.constant 0 : index
      %c0_46 = arith.constant 0 : index
      %64 = vector.load %arg8[%c1_44, %c0_45, %c0_46] : memref<3x1x256xf32, #tpu.memory_space<vmem>>, vector<1x1x256xf32>
      %65 = vector.shape_cast %64 : vector<1x1x256xf32> to vector<1x256xf32>
      %66 = vector.broadcast %65 : vector<1x256xf32> to vector<8x256xf32>
      %67 = arith.addf %63, %66 : vector<8x256xf32>
      %68 = arith.truncf %67 : vector<8x256xf32> to vector<8x256xbf16>
      %c2 = arith.constant 2 : index
      %c0_47 = arith.constant 0 : index
      %c0_48 = arith.constant 0 : index
      %69 = vector.load %arg5[%c2, %c0_47, %c0_48] : memref<3x256x256xbf16, #tpu.memory_space<vmem>>, vector<1x256x256xbf16>
      %70 = vector.shape_cast %69 : vector<1x256x256xbf16> to vector<256x256xbf16>
      %cst_49 = arith.constant dense<0.000000e+00> : vector<8x256xf32>
      %71 = tpu.matmul %68, %70, %cst_49 {dimension_numbers = #tpu.dot_dimension_numbers<[1], [0], [0], [1], [0, 0, 1, 1], [], []>} : vector<8x256xbf16>, vector<256x256xbf16>, vector<8x256xf32> -> vector<8x256xf32>
      %c2_50 = arith.constant 2 : index
      %c0_51 = arith.constant 0 : index
      %c0_52 = arith.constant 0 : index
      %72 = vector.load %arg6[%c2_50, %c0_51, %c0_52] : memref<3x1x256xf32, #tpu.memory_space<vmem>>, vector<1x1x256xf32>
      %73 = vector.shape_cast %72 : vector<1x1x256xf32> to vector<1x256xf32>
      %74 = vector.broadcast %73 : vector<1x256xf32> to vector<8x256xf32>
      %75 = arith.addf %71, %74 : vector<8x256xf32>
      %76 = arith.negf %75 : vector<8x256xf32>
      %77 = math.exp %76 : vector<8x256xf32>
      %cst_53 = arith.constant 1.000000e+00 : f32
      %78 = vector.broadcast %cst_53 : f32 to vector<8x256xf32>
      %79 = arith.addf %78, %77 : vector<8x256xf32>
      %80 = arith.divf %78, %79 : vector<8x256xf32>
      %81 = arith.mulf %75, %80 : vector<8x256xf32>
      %82 = arith.truncf %81 : vector<8x256xf32> to vector<8x256xbf16>
      %c2_54 = arith.constant 2 : index
      %c0_55 = arith.constant 0 : index
      %c0_56 = arith.constant 0 : index
      %83 = vector.load %arg7[%c2_54, %c0_55, %c0_56] : memref<3x256x256xbf16, #tpu.memory_space<vmem>>, vector<1x256x256xbf16>
      %84 = vector.shape_cast %83 : vector<1x256x256xbf16> to vector<256x256xbf16>
      %cst_57 = arith.constant dense<0.000000e+00> : vector<8x256xf32>
      %85 = tpu.matmul %82, %84, %cst_57 {dimension_numbers = #tpu.dot_dimension_numbers<[1], [0], [0], [1], [0, 0, 1, 1], [], []>} : vector<8x256xbf16>, vector<256x256xbf16>, vector<8x256xf32> -> vector<8x256xf32>
      %86 = arith.addf %67, %85 : vector<8x256xf32>
      %c2_58 = arith.constant 2 : index
      %c0_59 = arith.constant 0 : index
      %c0_60 = arith.constant 0 : index
      %87 = vector.load %arg8[%c2_58, %c0_59, %c0_60] : memref<3x1x256xf32, #tpu.memory_space<vmem>>, vector<1x1x256xf32>
      %88 = vector.shape_cast %87 : vector<1x1x256xf32> to vector<1x256xf32>
      %89 = vector.broadcast %88 : vector<1x256xf32> to vector<8x256xf32>
      %90 = arith.addf %86, %89 : vector<8x256xf32>
      %c0_61 = arith.constant 0 : index
      %c0_62 = arith.constant 0 : index
      %91 = vector.load %arg12[%c0_61, %c0_62] : memref<8x256xf32, #tpu.memory_space<vmem>>, vector<8x256xf32>
      tpu.vector_store %arg12[%c0_61, %c0_62], %90 {strides = array<i32>} : memref<8x256xf32, #tpu.memory_space<vmem>>, vector<8x256xf32>,
    } else {
    }
    %c0 = arith.constant 0 : index
    %c0_1 = arith.constant 0 : index
    %3 = vector.load %arg12[%c0, %c0_1] : memref<8x256xf32, #tpu.memory_space<vmem>>, vector<8x256xf32>
    %4 = arith.truncf %3 : vector<8x256xf32> to vector<8x256xbf16>
    %c0_2 = arith.constant 0 : index
    %c0_3 = arith.constant 0 : index
    %c0_4 = arith.constant 0 : index
    %5 = vector.load %arg9[%c0_2, %c0_3, %c0_4] : memref<1x256x1024xbf16, #tpu.memory_space<vmem>>, vector<1x256x1024xbf16>
    %6 = vector.shape_cast %5 : vector<1x256x1024xbf16> to vector<256x1024xbf16>
    %cst = arith.constant dense<0.000000e+00> : vector<8x1024xf32>
    %7 = tpu.matmul %4, %6, %cst {dimension_numbers = #tpu.dot_dimension_numbers<[1], [0], [0], [1], [0, 0, 1, 1], [], []>} : vector<8x256xbf16>, vector<256x1024xbf16>, vector<8x1024xf32> -> vector<8x1024xf32>
    %c0_5 = arith.constant 0 : index
    %c0_6 = arith.constant 0 : index
    %c0_7 = arith.constant 0 : index
    %8 = vector.load %arg10[%c0_5, %c0_6, %c0_7] : memref<1x1x1024xf32, #tpu.memory_space<vmem>>, vector<1x1x1024xf32>
    %9 = vector.shape_cast %8 : vector<1x1x1024xf32> to vector<1x1024xf32>
    %10 = vector.broadcast %9 : vector<1x1024xf32> to vector<8x1024xf32>
    %11 = arith.addf %7, %10 : vector<8x1024xf32>
    %12 = arith.truncf %11 : vector<8x1024xf32> to vector<8x1024xbf16>
    %c0_8 = arith.constant 0 : index
    %c0_9 = arith.constant 0 : index
    %c0_10 = arith.constant 0 : index
    %c0_11 = arith.constant 0 : index
    %13 = vector.load %arg11[%c0_8, %c0_9, %c0_10, %c0_11] : memref<1x1x8x1024xbf16, #tpu.memory_space<vmem>>, vector<1x1x8x1024xbf16>
    %14 = vector.shape_cast %13 : vector<1x1x8x1024xbf16> to vector<8x1024xbf16>
    %15 = vector.shape_cast %12 : vector<8x1024xbf16> to vector<1x1x8x1024xbf16>
    tpu.vector_store %arg11[%c0_8, %c0_9, %c0_10, %c0_11], %15 {strides = array<i32>} : memref<1x1x8x1024xbf16, #tpu.memory_space<vmem>>, vector<1x1x8x1024xbf16>,
    return
  }
  func.func @transform_0(%arg0: i32, %arg1: i32, %arg2: i32) -> (i32, i32, i32) {
    %c0_i32 = arith.constant 0 : i32
    %c0_i32_0 = arith.constant 0 : i32
    return %arg0, %arg1, %c0_i32 : i32, i32, i32
  }
  func.func @transform_1(%arg0: i32, %arg1: i32, %arg2: i32) -> (i32, i32, i32) {
    %c0_i32 = arith.constant 0 : i32
    %c0_i32_0 = arith.constant 0 : i32
    %c0_i32_1 = arith.constant 0 : i32
    return %arg0, %c0_i32, %c0_i32_0 : i32, i32, i32
  }
  func.func @transform_2(%arg0: i32, %arg1: i32, %arg2: i32) -> (i32, i32, i32) {
    %c0_i32 = arith.constant 0 : i32
    %c0_i32_0 = arith.constant 0 : i32
    %c0_i32_1 = arith.constant 0 : i32
    %c0_i32_2 = arith.constant 0 : i32
    return %c0_i32, %c0_i32_0, %c0_i32_1 : i32, i32, i32
  }
  func.func @transform_3(%arg0: i32, %arg1: i32, %arg2: i32) -> (i32, i32, i32) {
    %c0_i32 = arith.constant 0 : i32
    %c0_i32_0 = arith.constant 0 : i32
    %c0_i32_1 = arith.constant 0 : i32
    %c0_i32_2 = arith.constant 0 : i32
    return %c0_i32, %c0_i32_0, %c0_i32_1 : i32, i32, i32
  }
  func.func @transform_4(%arg0: i32, %arg1: i32, %arg2: i32) -> (i32, i32, i32) {
    %c0_i32 = arith.constant 0 : i32
    %c0_i32_0 = arith.constant 0 : i32
    %c0_i32_1 = arith.constant 0 : i32
    %c0_i32_2 = arith.constant 0 : i32
    return %c0_i32, %c0_i32_0, %c0_i32_1 : i32, i32, i32
  }
  func.func @transform_5(%arg0: i32, %arg1: i32, %arg2: i32) -> (i32, i32, i32) {
    %c0_i32 = arith.constant 0 : i32
    %c0_i32_0 = arith.constant 0 : i32
    %c0_i32_1 = arith.constant 0 : i32
    %c0_i32_2 = arith.constant 0 : i32
    return %c0_i32, %c0_i32_0, %c0_i32_1 : i32, i32, i32
  }
  func.func @transform_6(%arg0: i32, %arg1: i32, %arg2: i32) -> (i32, i32, i32) {
    %c0_i32 = arith.constant 0 : i32
    %c0_i32_0 = arith.constant 0 : i32
    %c0_i32_1 = arith.constant 0 : i32
    return %arg2, %c0_i32, %c0_i32_0 : i32, i32, i32
  }
  func.func @transform_7(%arg0: i32, %arg1: i32, %arg2: i32) -> (i32, i32, i32) {
    %c0_i32 = arith.constant 0 : i32
    %c0_i32_0 = arith.constant 0 : i32
    %c0_i32_1 = arith.constant 0 : i32
    return %arg2, %c0_i32, %c0_i32_0 : i32, i32, i32
  }
  func.func @transform_8(%arg0: i32, %arg1: i32, %arg2: i32) -> (i32, i32, i32, i32) {
    %c0_i32 = arith.constant 0 : i32
    %c0_i32_0 = arith.constant 0 : i32
    return %arg0, %arg2, %arg1, %c0_i32 : i32, i32, i32, i32
  }
}

</mosaic_0001>

<bundles_post_ra>
// kernel: _lambda_.4
= control target key start
LH: loop header
LB: loop body
LE: loop exit
PB: predicated region body
PF: predicated region fallthrough
CT: control target
= control target key end

     0   :  { %10 = vsyncpa [#allocation3], 0  ;;  %s700_s0 = inlined_call_operand.vmem [shape: f32[16,192], index: 0, kind: input, shape index: {}]   ;;  %s701_s1 = inlined_call_operand.hbm [shape: bf16[192,128], index: 1, kind: input, shape index: {}]   ;;  %s702_s2 = inlined_call_operand.hbm [shape: f32[1,128], index: 2, kind: input, shape index: {}]   ;;  %s703_s3 = inlined_call_operand.hbm [shape: bf16[128,256], index: 3, kind: input, shape index: {}]   ;;  %s704_s4 = inlined_call_operand.hbm [shape: f32[1,256], index: 4, kind: input, shape index: {}]   ;;  %s705_s5 = inlined_call_operand.vmem [shape: f32[16,256], index: 5, kind: output, shape index: {}]  }
   0x1   :  { %11 = vsyncpa [#allocation5], 0 }
   0x2   :  { %12 = vsyncpa [#allocation8], 0  ;;  %s582_s18 = smov [#allocation4]   ;;  %s583_s20 = smov [#allocation2]  }
   0x3   :  { %s33_s19 = sshll.u32 %s582_s18, 4  ;;  %s20_s21 = sshll.u32 %s583_s20, 4  ;;  %s34_s19 = int_to_ptr.vmem [resolvable:$true] %s33_s19  ;;  %s621_s21 = int_to_ptr.vmem [resolvable:$true] %s20_s21 }
   0x4   :  { %s488_s24 = scalar_lea.hbm %s702_s2, 16 }
   0x5   :  { %p489_p0 = scmp.ne.s32.totalorder %s702_s2, %s488_s24  ;;  %p492_p1 = scmp.lt.u32.totalorder %s488_s24, %s702_s2 }
   0x7   :  { %p494_p2 = pnand %p492_p1, %p489_p0 }
   0x9   :  { %497 = shalt.err (!%p494_p2)
}
   0xa   :  { %s498_s29 = scalar_lea.vmem %s34_s19, 16  ;;  %s502_s30 = scalar_lea.vmem %s34_s19, 32 }
   0xb   :  { %p499_p3 = scmp.ne.s32.totalorder %s34_s19, %s498_s29  ;;  %p503_p4 = scmp.lt.s32.totalorder %s34_s19, %s34_s19 }
   0xc   :  { %p504_p5 = scmp.lt.s32.totalorder %s502_s30, %s498_s29 }
   0xe   :  { %p505_p6 = por %p504_p5, %p503_p4 }
  0x10   :  { %p506_p7 = pnand %p505_p6, %p499_p3 }
  0x12   :  { %509 = shalt.err (!%p506_p7)
}
  0x13   :  { %36 = dma.hbm_to_vmem [thread:$0]  %s702_s2, 16, %s34_s19, [#allocation5]  }
  0x14   :  { %s510_s10 = scalar_lea.hbm %s701_s1, 1536 }
  0x15   :  { %p511_p8 = scmp.ne.s32.totalorder %s701_s1, %s510_s10  ;;  %p514_p9 = scmp.lt.u32.totalorder %s510_s10, %s701_s1 }
  0x17   :  { %p516_p10 = pnand %p514_p9, %p511_p8 }
  0x19   :  { %519 = shalt.err (!%p516_p10)
}
  0x1a   :  { %s520_s15 = scalar_lea.vmem %s621_s21, 1536  ;;  %p525_p12 = scmp.lt.s32.totalorder %s621_s21, %s621_s21 }
  0x1b   :  { %p521_p11 = scmp.ne.s32.totalorder %s621_s21, %s520_s15  ;;  %p526_p13 = scmp.lt.s32.totalorder %s520_s15, %s520_s15 }
  0x1d   :  { %p527_p0 = por %p526_p13, %p525_p12 }
  0x1f   :  { %p528_p1 = pnand %p527_p0, %p521_p11 }
  0x21   :  { %531 = shalt.err (!%p528_p1)
}
  0x22   :  { %s584_s2 = smov 64   ;;  %s585_s16 = smov 4  }
  0x23   :  { %26 = dma.hbm_to_vmem [thread:$0]  %s701_s1, 1536, %s621_s21, [#allocation3], %s584_s2, %s584_s2, %s585_s16  }
  0x24   :  { %s586_s19 = smov [#allocation6]   ;;  %s532_s24 = scalar_lea.hbm %s703_s3, 2048 }
  0x25   :  { %s42_s20 = sshll.u32 %s586_s19, 4  ;;  %p533_p2 = scmp.ne.s32.totalorder %s703_s3, %s532_s24  ;;  %s43_s20 = int_to_ptr.vmem [resolvable:$true] %s42_s20 }
  0x26   :  { %p536_p3 = scmp.lt.u32.totalorder %s532_s24, %s703_s3 }
  0x28   :  { %p538_p4 = pnand %p536_p3, %p533_p2 }
  0x2a   :  { %541 = shalt.err (!%p538_p4)
}
  0x2b   :  { %s542_s29 = scalar_lea.vmem %s43_s20, 2048  ;;  %p547_p6 = scmp.lt.s32.totalorder %s43_s20, %s43_s20 }
  0x2c   :  { %p543_p5 = scmp.ne.s32.totalorder %s43_s20, %s542_s29  ;;  %p548_p7 = scmp.lt.s32.totalorder %s542_s29, %s542_s29 }
  0x2e   :  { %p549_p8 = por %p548_p7, %p547_p6 }
  0x30   :  { %p550_p9 = pnand %p549_p8, %p543_p5 }
  0x32   :  { %553 = shalt.err (!%p550_p9)
}
  0x33   :  { %s587_s1 = smov 128   ;;  %s588_s21 = smov 8  }
  0x34   :  { %48 = dma.hbm_to_vmem [thread:$0]  %s703_s3, 2048, %s43_s20, [#allocation5], %s587_s1, %s587_s1, %s588_s21  }
  0x35   :  { %s589_s7 = smov [#allocation7]   ;;  %s554_s11 = scalar_lea.hbm %s704_s4, 32 }
  0x36   :  { %s55_s8 = sshll.u32 %s589_s7, 4  ;;  %p555_p10 = scmp.ne.s32.totalorder %s704_s4, %s554_s11  ;;  %s56_s8 = int_to_ptr.vmem [resolvable:$true] %s55_s8 }
  0x37   :  { %p558_p11 = scmp.lt.u32.totalorder %s554_s11, %s704_s4 }
  0x39   :  { %p560_p12 = pnand %p558_p11, %p555_p10 }
  0x3b   :  { %563 = shalt.err (!%p560_p12)
}
  0x3c   :  { %s564_s2 = scalar_lea.vmem %s56_s8, 32  ;;  %p569_p0 = scmp.lt.s32.totalorder %s56_s8, %s56_s8 }
  0x3d   :  { %p565_p13 = scmp.ne.s32.totalorder %s56_s8, %s564_s2  ;;  %p570_p1 = scmp.lt.s32.totalorder %s564_s2, %s564_s2 }
  0x3f   :  { %p571_p2 = por %p570_p1, %p569_p0 }
  0x41   :  { %p572_p3 = pnand %p571_p2, %p565_p13 }
  0x43   :  { %575 = shalt.err (!%p572_p3)
}
  0x44   :  { %58 = dma.hbm_to_vmem [thread:$0]  %s704_s4, 32, %s56_s8, [#allocation8]  }
  0x45   :  { %576 = dma.done.wait [#allocation3], 1536  }
  0x46   :  { %577 = vsyncadd [#allocation3], 4294965760 }
  0x47   :  { %578 = dma.done.wait [#allocation5], 2064  }
  0x48   :  { %579 = vsyncadd [#allocation5], 4294965232 }
  0x49   :  { %580 = dma.done.wait [#allocation8], 32  }
  0x4a   :  { %581 = vsyncadd [#allocation8], 4294967264  ;;  %v590_v0 = vmov 0   ;;  %v444_v1 = vld [vmem:[#allocation2] sm:$0xff]   ;;  %v445_v2 = vld [vmem:[#allocation2 + $0x8] sm:$0xff]   ;;  %vm181_vm0 = vcmask 523264   ;;  %v259_v53 = vlaneseq }
  0x4b   :  { %185 = vmatprep.subr.bf16.mxu0 %v590_v0  ;;  %381 = vmatprep.mubr.bf16.mxu1 %v590_v0  ;;  %v446_v3 = vld [vmem:[#allocation2 + $0x10] sm:$0xff]   ;;  %v447_v4 = vld [vmem:[#allocation2 + $0x18] sm:$0xff]   ;;  %v73_v5 = vld [vmem:[%s700_s0 + $0x8] sm:$0xff] }
  0x4c   :  { %186 = vmatpush1.bf16.msra.mxu0 %v444_v1  ;;  %v75_v6 = vld [vmem:[%s700_s0 + $0x18] sm:$0xff]  ;;  %v448_v7 = vld [vmem:[#allocation2 + $0x20] sm:$0xff]   ;;  %v449_v9 = vld [vmem:[#allocation2 + $0x28] sm:$0xff]   ;;  %v260_v54 = vshrl.u32 %v259_v53, 7 }
  0x4d   :  { %187 = vmatprep.subr.bf16.mxu0 %v590_v0  ;;  %v77_v8 = vpack.c.bf16 %v75_v6, %v73_v5  ;;  %v450_v10 = vld [vmem:[#allocation2 + $0x30] sm:$0xff]   ;;  %v451_v11 = vld [vmem:[#allocation2 + $0x38] sm:$0xff]   ;;  %v452_v12 = vld [vmem:[#allocation2 + $0x40] sm:$0xff]  }
  0x4e   :  { %v453_v13 = vld [vmem:[#allocation2 + $0x48] sm:$0xff]   ;;  %v454_v14 = vld [vmem:[#allocation2 + $0x50] sm:$0xff]   ;;  %v455_v15 = vld [vmem:[#allocation2 + $0x58] sm:$0xff]   ;;  %v261_v55 = vsub.s32 0, %v260_v54  ;;  %v265_v57 = vsub.s32 1, %v260_v54 }
  0x4f   :  { %416 = vmatprep.mubr.msk.bf16.mxu0 %vm181_vm0, %v77_v8  ;;  %v72_v16 = vld [vmem:[%s700_s0] sm:$0xff]  ;;  %v74_v17 = vld [vmem:[%s700_s0 + $0x10] sm:$0xff] }
  0x50   :  { %188 = vmatpush1.bf16.msra.mxu0 %v445_v2  ;;  %v76_v18 = vpack.c.bf16 %v74_v17, %v72_v16  ;;  %v456_v19 = vld [vmem:[#allocation6 + $0x4] ss:$8 sps:$4 sm:$0xff]   ;;  %v458_v20 = vld [vmem:[#allocation6] ss:$8 sps:$4 sm:$0xff]   ;;  %v459_v21 = vld [vmem:[#allocation6 + $0x14] ss:$8 sps:$4 sm:$0xff]  }
  0x51   :  { %189 = vmatprep.subr.bf16.mxu0 %v590_v0  ;;  %349 = vmatprep.subr.bf16.mxu1 %v456_v19  ;;  %v461_v22 = vld [vmem:[#allocation6 + $0x10] ss:$8 sps:$4 sm:$0xff]   ;;  %v462_v23 = vld [vmem:[#allocation6 + $0x24] ss:$8 sps:$4 sm:$0xff]   ;;  %v464_v24 = vld [vmem:[#allocation6 + $0x20] ss:$8 sps:$4 sm:$0xff]  }
  0x52   :  { %350 = vmatpush1.bf16.msra.mxu1 %v458_v20  ;;  %v465_v25 = vld [vmem:[#allocation6 + $0x34] ss:$8 sps:$4 sm:$0xff]   ;;  %v467_v26 = vld [vmem:[#allocation6 + $0x30] ss:$8 sps:$4 sm:$0xff]   ;;  %v468_v27 = vld [vmem:[#allocation6 + $0x44] ss:$8 sps:$4 sm:$0xff]  }
  0x53   :  { %351 = vmatprep.subr.bf16.mxu1 %v459_v21  ;;  %v470_v28 = vld [vmem:[#allocation6 + $0x40] ss:$8 sps:$4 sm:$0xff]   ;;  %v471_v29 = vld [vmem:[#allocation6 + $0x54] ss:$8 sps:$4 sm:$0xff]   ;;  %v473_v30 = vld [vmem:[#allocation6 + $0x50] ss:$8 sps:$4 sm:$0xff]  }
  0x54   :  { %190 = vmatpush1.bf16.msra.mxu0 %v446_v3  ;;  %v474_v31 = vld [vmem:[#allocation6 + $0x64] ss:$8 sps:$4 sm:$0xff]   ;;  %v476_v32 = vld [vmem:[#allocation6 + $0x60] ss:$8 sps:$4 sm:$0xff]   ;;  %v477_v33 = vld [vmem:[#allocation6 + $0x74] ss:$8 sps:$4 sm:$0xff]  }
  0x55   :  { %191 = vmatprep.subr.bf16.mxu0 %v590_v0  ;;  %v479_v34 = vld [vmem:[#allocation6 + $0x70] ss:$8 sps:$4 sm:$0xff]   ;;  %v403_v35 = vld [vmem:[#allocation4] ss:$0 sm:$0xff]  ;;  %v257_v56 = vld [vmem:[#allocation7] sm:$0x3] }
  0x56   :  { %352 = vmatpush1.bf16.msra.mxu1 %v461_v22  ;;  %v262_v58 = vrot.slane %v257_v56, %v261_v55  ;;  %v266_v59 = vrot.slane %v257_v56, %v265_v57 }
  0x57   :  { %353 = vmatprep.subr.bf16.mxu1 %v462_v23 }
  0x58   :  { %192 = vmatpush1.bf16.msra.mxu0 %v447_v4 }
  0x59   :  { %193 = vmatprep.subr.bf16.mxu0 %v590_v0 }
  0x5a   :  { %354 = vmatpush1.bf16.msra.mxu1 %v464_v24 }
  0x5b   :  { %355 = vmatprep.subr.bf16.mxu1 %v465_v25 }
  0x5c   :  { %194 = vmatpush1.bf16.msra.mxu0 %v448_v7 }
  0x5d   :  { %195 = vmatprep.subr.bf16.mxu0 %v590_v0 }
  0x5e   :  { %356 = vmatpush1.bf16.msra.mxu1 %v467_v26 }
  0x5f   :  { %357 = vmatprep.subr.bf16.mxu1 %v468_v27 }
  0x60   :  { %196 = vmatpush1.bf16.msra.mxu0 %v449_v9 }
  0x61   :  { %197 = vmatprep.subr.bf16.mxu0 %v590_v0 }
  0x62   :  { %358 = vmatpush1.bf16.msra.mxu1 %v470_v28 }
  0x63   :  { %359 = vmatprep.subr.bf16.mxu1 %v471_v29 }
  0x64   :  { %198 = vmatpush1.bf16.msra.mxu0 %v450_v10 }
  0x65   :  { %199 = vmatprep.subr.bf16.mxu0 %v590_v0 }
  0x66   :  { %360 = vmatpush1.bf16.msra.mxu1 %v473_v30 }
  0x67   :  { %361 = vmatprep.subr.bf16.mxu1 %v474_v31 }
  0x68   :  { %200 = vmatpush1.bf16.msra.mxu0 %v451_v11 }
  0x69   :  { %201 = vmatprep.subr.bf16.mxu0 %v590_v0 }
  0x6a   :  { %362 = vmatpush1.bf16.msra.mxu1 %v476_v32 }
  0x6b   :  { %363 = vmatprep.subr.bf16.mxu1 %v477_v33 }
  0x6c   :  { %202 = vmatpush1.bf16.msra.mxu0 %v452_v12 }
  0x6d   :  { %203 = vmatprep.subr.bf16.mxu0 %v590_v0 }
  0x6e   :  { %364 = vmatpush1.bf16.msra.mxu1 %v479_v34 }
  0x70   :  { %204 = vmatpush1.bf16.msra.mxu0 %v453_v13 }
  0x71   :  { %205 = vmatprep.subr.bf16.mxu0 %v590_v0 }
  0x74   :  { %206 = vmatpush1.bf16.msra.mxu0 %v454_v14 }
  0x75   :  { %207 = vmatprep.subr.bf16.mxu0 %v590_v0 }
  0x78   :  { %208 = vmatpush1.bf16.msra.mxu0 %v455_v15 }
  0x7b   :  { %218 = vmatmul.mubr.bf16.vlgmr.msra.gmra.mrb[0].mxu0 %v76_v18 }
 0x14e   :  { %v219_v36 = vpop.f32.mrb[0].mxu0 }
 0x14f   :  { %v220_v37 = vadd.f32 %v403_v35, %v219_v36  ;;  %v221_v38 = vpop.f32.mrb[1].mxu0 }
 0x150   :  { %v222_v39 = vpop.f32.mrb[2].mxu0 }
 0x151   :  { %v417_v40 = vmul.f32 -1.442695, %v220_v37  ;;  %v223_v41 = vadd.f32 %v403_v35, %v222_v39  ;;  %v224_v42 = vpop.f32.mrb[3].mxu0 }
 0x153   :  { %480 = vpow2.f32 %v417_v40  ;;  %v418_v43 = vmul.f32 -1.442695, %v223_v41 }
 0x155   :  { %482 = vpow2.f32 %v418_v43 }
 0x15d   :  { %v481_v44 = vpop.eup %480 }
 0x15e   :  { %v232_v45 = vadd.f32 1.0, %v481_v44 }
 0x15f   :  { %v483_v46 = vpop.eup %482 }
 0x160   :  { %484 = vrcp.f32 %v232_v45  ;;  %v233_v47 = vadd.f32 1.0, %v483_v46 }
 0x162   :  { %486 = vrcp.f32 %v233_v47 }
 0x16a   :  { %v485_v48 = vpop.eup %484 }
 0x16b   :  { %v238_v50 = vmul.f32 %v485_v48, %v220_v37 }
 0x16c   :  { %v487_v49 = vpop.eup %486 }
 0x16d   :  { %v239_v51 = vmul.f32 %v487_v49, %v223_v41 }
 0x16f   :  { %v240_v52 = vpack.c.bf16 %v239_v51, %v238_v50 }
 0x171   :  { %382 = vmatmul.mubr.bf16.vlgmr.msra.gmra.mrb[0].mxu1 %v240_v52 }
 0x244   :  { %v383_v60 = vpop.f32.mrb[0].mxu1 }
 0x245   :  { %v384_v61 = vadd.f32 %v383_v60, %v262_v58  ;;  %v385_v62 = vpop.f32.mrb[1].mxu1 }
 0x246   :  { %v386_v63 = vadd.f32 %v385_v62, %v266_v59  ;;  %v387_v0 = vpop.f32.mrb[2].mxu1 }
 0x247   :  { %392 = vst [vmem:[%s705_s5] sm:$0xff] %v384_v61  ;;  %v388_v1 = vadd.f32 %v387_v0, %v262_v58  ;;  %v389_v2 = vpop.f32.mrb[3].mxu1 }
 0x248   :  { %393 = vst [vmem:[%s705_s5 + $0x8] sm:$0xff] %v386_v63  ;;  %v390_v3 = vadd.f32 %v389_v2, %v266_v59 }
 0x249   :  { %394 = vst [vmem:[%s705_s5 + $0x10] sm:$0xff] %v388_v1 }
 0x24a   :  { %395 = vst [vmem:[%s705_s5 + $0x18] sm:$0xff] %v390_v3 }
 0x24b   :  { %400 = vsyncpa [#allocation3], 1 }
 0x24c   :  { %401 = vsyncpa [#allocation5], 1 }
 0x24d   :  { %402 = vsyncpa [#allocation8], 1 }

// kernel: _lambda_.3
= control target key start
LH: loop header
LB: loop body
LE: loop exit
PB: predicated region body
PF: predicated region fallthrough
CT: control target
= control target key end

     0   :  { %10 = vsyncpa [#allocation3], 0  ;;  %s1804_s0 = inlined_call_operand.vmem [shape: f32[16,128], index: 0, kind: input, shape index: {}]   ;;  %s1805_s1 = inlined_call_operand.hbm [shape: bf16[4,128,128], index: 1, kind: input, shape index: {}]   ;;  %s1806_s2 = inlined_call_operand.hbm [shape: f32[4,1,128], index: 2, kind: input, shape index: {}]   ;;  %s1807_s3 = inlined_call_operand.hbm [shape: bf16[4,128,128], index: 3, kind: input, shape index: {}]   ;;  %s1808_s4 = inlined_call_operand.hbm [shape: f32[4,1,128], index: 4, kind: input, shape index: {}]   ;;  %s1809_s5 = inlined_call_operand.vmem [shape: f32[16,128], index: 5, kind: output, shape index: {}]  }
   0x1   :  { %11 = vsyncpa [#allocation5], 0 }
   0x2   :  { %12 = vsyncpa [#allocation8], 0  ;;  %s1587_s18 = smov [#allocation4]   ;;  %s1493_s22 = scalar_lea.hbm %s1806_s2, 64 }
   0x3   :  { %s32_s19 = sshll.u32 %s1587_s18, 4  ;;  %p1494_p0 = scmp.ne.s32.totalorder %s1806_s2, %s1493_s22  ;;  %s33_s19 = int_to_ptr.vmem [resolvable:$true] %s32_s19 }
   0x4   :  { %p1497_p1 = scmp.lt.u32.totalorder %s1493_s22, %s1806_s2 }
   0x6   :  { %p1499_p2 = pnand %p1497_p1, %p1494_p0 }
   0x8   :  { %1502 = shalt.err (!%p1499_p2)
}
   0x9   :  { %s1503_s27 = scalar_lea.vmem %s33_s19, 64  ;;  %p1508_p4 = scmp.lt.s32.totalorder %s33_s19, %s33_s19 }
   0xa   :  { %p1504_p3 = scmp.ne.s32.totalorder %s33_s19, %s1503_s27  ;;  %p1509_p5 = scmp.lt.s32.totalorder %s1503_s27, %s1503_s27 }
   0xc   :  { %p1510_p6 = por %p1509_p5, %p1508_p4 }
   0xe   :  { %p1511_p7 = pnand %p1510_p6, %p1504_p3 }
  0x10   :  { %1514 = shalt.err (!%p1511_p7)
}
  0x11   :  { %s1588_s28 = smov 16   ;;  %s1589_s29 = smov 1  }
  0x12   :  { %38 = dma.hbm_to_vmem [thread:$0]  %s1806_s2, 64, %s33_s19, [#allocation5], %s1588_s28, %s1588_s28, %s1589_s29  }
  0x13   :  { %s1590_s7 = smov [#allocation2]   ;;  %s1515_s11 = scalar_lea.hbm %s1805_s1, 4096 }
  0x14   :  { %s20_s8 = sshll.u32 %s1590_s7, 4  ;;  %p1516_p8 = scmp.ne.s32.totalorder %s1805_s1, %s1515_s11  ;;  %s21_s8 = int_to_ptr.vmem [resolvable:$true] %s20_s8 }
  0x15   :  { %p1519_p9 = scmp.lt.u32.totalorder %s1515_s11, %s1805_s1 }
  0x17   :  { %p1521_p10 = pnand %p1519_p9, %p1516_p8 }
  0x19   :  { %1524 = shalt.err (!%p1521_p10)
}
  0x1a   :  { %s1525_s16 = scalar_lea.vmem %s21_s8, 4096  ;;  %p1530_p12 = scmp.lt.s32.totalorder %s21_s8, %s21_s8 }
  0x1b   :  { %p1526_p11 = scmp.ne.s32.totalorder %s21_s8, %s1525_s16  ;;  %p1531_p13 = scmp.lt.s32.totalorder %s1525_s16, %s1525_s16 }
  0x1d   :  { %p1532_p0 = por %p1531_p13, %p1530_p12 }
  0x1f   :  { %p1533_p1 = pnand %p1532_p0, %p1526_p11 }
  0x21   :  { %1536 = shalt.err (!%p1533_p1)
}
  0x22   :  { %s1591_s2 = smov 64   ;;  %s1592_s17 = smov 4  }
  0x23   :  { %26 = dma.hbm_to_vmem [thread:$0]  %s1805_s1, 4096, %s21_s8, [#allocation3], %s1591_s2, %s1591_s2, %s1592_s17  }
  0x24   :  { %s1593_s20 = smov [#allocation6]   ;;  %s1594_s22 = smov [#allocation7]  }
  0x25   :  { %s44_s21 = sshll.u32 %s1593_s20, 4  ;;  %s56_s23 = sshll.u32 %s1594_s22, 4  ;;  %s45_s21 = int_to_ptr.vmem [resolvable:$true] %s44_s21  ;;  %s1654_s23 = int_to_ptr.vmem [resolvable:$true] %s56_s23 }
  0x26   :  { %s1537_s26 = scalar_lea.hbm %s1807_s3, 4096 }
  0x27   :  { %p1538_p2 = scmp.ne.s32.totalorder %s1807_s3, %s1537_s26  ;;  %p1541_p3 = scmp.lt.u32.totalorder %s1537_s26, %s1807_s3 }
  0x29   :  { %p1543_p4 = pnand %p1541_p3, %p1538_p2 }
  0x2b   :  { %1546 = shalt.err (!%p1543_p4)
}
  0x2c   :  { %s1547_s1 = scalar_lea.vmem %s45_s21, 4096  ;;  %p1552_p6 = scmp.lt.s32.totalorder %s45_s21, %s45_s21 }
  0x2d   :  { %p1548_p5 = scmp.ne.s32.totalorder %s45_s21, %s1547_s1  ;;  %p1553_p7 = scmp.lt.s32.totalorder %s1547_s1, %s1547_s1 }
  0x2f   :  { %p1554_p8 = por %p1553_p7, %p1552_p6 }
  0x31   :  { %p1555_p9 = pnand %p1554_p8, %p1548_p5 }
  0x33   :  { %1558 = shalt.err (!%p1555_p9)
}
  0x34   :  { %50 = dma.hbm_to_vmem [thread:$0]  %s1807_s3, 4096, %s45_s21, [#allocation5], %s1591_s2, %s1591_s2, %s1592_s17  }
  0x35   :  { %s1559_s12 = scalar_lea.hbm %s1808_s4, 64 }
  0x36   :  { %p1560_p10 = scmp.ne.s32.totalorder %s1808_s4, %s1559_s12  ;;  %p1563_p11 = scmp.lt.u32.totalorder %s1559_s12, %s1808_s4 }
  0x38   :  { %p1565_p12 = pnand %p1563_p11, %p1560_p10 }
  0x3a   :  { %1568 = shalt.err (!%p1565_p12)
}
  0x3b   :  { %s1569_s18 = scalar_lea.vmem %s1654_s23, 64  ;;  %p1574_p0 = scmp.lt.s32.totalorder %s1654_s23, %s1654_s23 }
  0x3c   :  { %p1570_p13 = scmp.ne.s32.totalorder %s1654_s23, %s1569_s18  ;;  %p1575_p1 = scmp.lt.s32.totalorder %s1569_s18, %s1569_s18 }
  0x3e   :  { %p1576_p2 = por %p1575_p1, %p1574_p0 }
  0x40   :  { %p1577_p3 = pnand %p1576_p2, %p1570_p13 }
  0x42   :  { %1580 = shalt.err (!%p1577_p3)
}
  0x43   :  { %62 = dma.hbm_to_vmem [thread:$0]  %s1808_s4, 64, %s1654_s23, [#allocation8], %s1588_s28, %s1588_s28, %s1589_s29  }
  0x44   :  { %1581 = dma.done.wait [#allocation3], 4096  }
  0x45   :  { %1582 = vsyncadd [#allocation3], 4294963200 }
  0x46   :  { %1583 = dma.done.wait [#allocation5], 4160  }
  0x47   :  { %1584 = vsyncadd [#allocation5], 4294963136 }
  0x48   :  { %1585 = dma.done.wait [#allocation8], 64  }
  0x49   :  { %1586 = vsyncadd [#allocation8], 4294967232  ;;  %v1595_v0 = vmov 0.0   ;;  %vm1596_vm0 = vmmov 0   ;;  %v1397_v1 = vld [vmem:[#allocation2] sm:$0xff]   ;;  %v1398_v2 = vld [vmem:[#allocation2 + $0x8] sm:$0xff]  }
  0x4a   :  { %1227 = vmatprep.subr.bf16.mxu0 %v1595_v0  ;;  %1243 = vmatprep.mubr.msk.bf16.mxu0 %vm1596_vm0, %v1595_v0  ;;  %v1399_v3 = vld [vmem:[#allocation2 + $0x10] sm:$0xff]   ;;  %v1400_v4 = vld [vmem:[#allocation2 + $0x18] sm:$0xff]   ;;  %v1401_v5 = vld [vmem:[#allocation2 + $0x20] sm:$0xff]  }
  0x4b   :  { %1247 = vmatprep.subr.bf16.mxu1 %v1595_v0  ;;  %1263 = vmatprep.mubr.msk.bf16.mxu1 %vm1596_vm0, %v1595_v0  ;;  %v1402_v6 = vld [vmem:[#allocation2 + $0x28] sm:$0xff]   ;;  %v1403_v7 = vld [vmem:[#allocation2 + $0x30] sm:$0xff]   ;;  %v1404_v8 = vld [vmem:[#allocation2 + $0x38] sm:$0xff]  }
  0x4c   :  { %1228 = vmatpush3.bf16.msra.mxu0 %v1397_v1  ;;  %v1703_v9 = vld [vmem:[%s1804_s0] sm:$0xff]  ;;  %v1708_v10 = vld [vmem:[%s1804_s0 + $0x8] sm:$0xff]  ;;  %v1407_v14 = vld [vmem:[#allocation6 + $0x10] sm:$0xff]  }
  0x4d   :  { %1229 = vmatprep.subr.bf16.mxu0 %v1595_v0  ;;  %v78_v11 = vpack.c.bf16 %v1708_v10, %v1703_v9  ;;  %v1405_v12 = vld [vmem:[#allocation6] sm:$0xff]   ;;  %v1406_v13 = vld [vmem:[#allocation6 + $0x8] sm:$0xff]   ;;  %v1408_v15 = vld [vmem:[#allocation6 + $0x18] sm:$0xff]  }
  0x4e   :  { %1248 = vmatpush3.bf16.msra.mxu1 %v1405_v12  ;;  %v1409_v16 = vld [vmem:[#allocation6 + $0x20] sm:$0xff]   ;;  %v1410_v17 = vld [vmem:[#allocation6 + $0x28] sm:$0xff]   ;;  %v1411_v18 = vld [vmem:[#allocation6 + $0x30] sm:$0xff]  }
  0x4f   :  { %1249 = vmatprep.subr.bf16.mxu1 %v1595_v0  ;;  %v1412_v19 = vld [vmem:[#allocation6 + $0x38] sm:$0xff]   ;;  %v1414_v21 = vld [vmem:[#allocation2 + $0x48] sm:$0xff]   ;;  %v1415_v22 = vld [vmem:[#allocation2 + $0x50] sm:$0xff]  }
  0x50   :  { %1230 = vmatpush3.bf16.msra.mxu0 %v1398_v2  ;;  %v1413_v20 = vld [vmem:[#allocation2 + $0x40] sm:$0xff]   ;;  %v1416_v23 = vld [vmem:[#allocation2 + $0x58] sm:$0xff]   ;;  %v1418_v25 = vld [vmem:[#allocation2 + $0x68] sm:$0xff]  }
  0x51   :  { %1231 = vmatprep.subr.bf16.mxu0 %v1595_v0  ;;  %v1417_v24 = vld [vmem:[#allocation2 + $0x60] sm:$0xff]   ;;  %v1419_v44 = vld [vmem:[#allocation2 + $0x70] sm:$0xff]   ;;  %v1420_v45 = vld [vmem:[#allocation2 + $0x78] sm:$0xff]  }
  0x52   :  { %1250 = vmatpush3.bf16.msra.mxu1 %v1406_v13  ;;  %v1075_v26 = vld [vmem:[#allocation4] ss:$0 sm:$0xff]  ;;  %v1094_v49 = vld [vmem:[#allocation7] ss:$0 sm:$0xff]  ;;  %v1422_v57 = vld [vmem:[#allocation6 + $0x48] sm:$0xff]  }
  0x53   :  { %1251 = vmatprep.subr.bf16.mxu1 %v1595_v0  ;;  %v1421_v56 = vld [vmem:[#allocation6 + $0x40] sm:$0xff]   ;;  %v1423_v58 = vld [vmem:[#allocation6 + $0x50] sm:$0xff]   ;;  %v1424_v59 = vld [vmem:[#allocation6 + $0x58] sm:$0xff]  }
  0x54   :  { %1232 = vmatpush3.bf16.msra.mxu0 %v1399_v3  ;;  %v1425_v60 = vld [vmem:[#allocation6 + $0x60] sm:$0xff]   ;;  %v1426_v61 = vld [vmem:[#allocation6 + $0x68] sm:$0xff]   ;;  %v1427_v62 = vld [vmem:[#allocation6 + $0x70] sm:$0xff]  }
  0x55   :  { %1233 = vmatprep.subr.bf16.mxu0 %v1595_v0  ;;  %v1428_v63 = vld [vmem:[#allocation6 + $0x78] sm:$0xff]   ;;  %v1430_v2 = vld [vmem:[#allocation2 + $0x88] sm:$0xff]   ;;  %v1431_v3 = vld [vmem:[#allocation2 + $0x90] sm:$0xff]  }
  0x56   :  { %1252 = vmatpush3.bf16.msra.mxu1 %v1407_v14  ;;  %v1429_v1 = vld [vmem:[#allocation2 + $0x80] sm:$0xff]  }
  0x57   :  { %1253 = vmatprep.subr.bf16.mxu1 %v1595_v0 }
  0x58   :  { %1234 = vmatpush3.bf16.msra.mxu0 %v1400_v4  ;;  %v1432_v4 = vld [vmem:[#allocation2 + $0x98] sm:$0xff]  }
  0x59   :  { %1235 = vmatprep.subr.bf16.mxu0 %v1595_v0 }
  0x5a   :  { %1254 = vmatpush3.bf16.msra.mxu1 %v1408_v15 }
  0x5b   :  { %1255 = vmatprep.subr.bf16.mxu1 %v1595_v0 }
  0x5c   :  { %1236 = vmatpush3.bf16.msra.mxu0 %v1401_v5  ;;  %v1433_v5 = vld [vmem:[#allocation2 + $0xa0] sm:$0xff]  }
  0x5d   :  { %1237 = vmatprep.subr.bf16.mxu0 %v1595_v0 }
  0x5e   :  { %1256 = vmatpush3.bf16.msra.mxu1 %v1409_v16 }
  0x5f   :  { %1257 = vmatprep.subr.bf16.mxu1 %v1595_v0 }
  0x60   :  { %1238 = vmatpush3.bf16.msra.mxu0 %v1402_v6  ;;  %v1434_v6 = vld [vmem:[#allocation2 + $0xa8] sm:$0xff]  }
  0x61   :  { %1239 = vmatprep.subr.bf16.mxu0 %v1595_v0 }
  0x62   :  { %1258 = vmatpush3.bf16.msra.mxu1 %v1410_v17 }
  0x63   :  { %1259 = vmatprep.subr.bf16.mxu1 %v1595_v0 }
  0x64   :  { %1240 = vmatpush3.bf16.msra.mxu0 %v1403_v7  ;;  %v1095_v7 = vld [vmem:[#allocation4 + $0x1] ss:$0 sm:$0xff] }
  0x65   :  { %1241 = vmatprep.subr.bf16.mxu0 %v1595_v0 }
  0x66   :  { %1260 = vmatpush3.bf16.msra.mxu1 %v1411_v18 }
  0x67   :  { %1261 = vmatprep.subr.bf16.mxu1 %v1595_v0 }
  0x68   :  { %1242 = vmatpush3.bf16.msra.mxu0 %v1404_v8 }
  0x69   :  { %1267 = vmatprep.subr.bf16.mxu0 %v1595_v0 }
  0x6a   :  { %1262 = vmatpush3.bf16.msra.mxu1 %v1412_v19 }
  0x6b   :  { %1244 = vmatmul.mubr.bf16.vlgmr.msra.gmra.mrb[0].mxu0 %v78_v11  ;;  %1287 = vmatprep.subr.bf16.mxu1 %v1595_v0 }
  0x6c   :  { %1283 = vmatprep.mubr.msk.bf16.mxu0 %vm1596_vm0, %v1595_v0  ;;  %1268 = vmatpush3.bf16.msra.mxu0 %v1413_v20 }
  0x6d   :  { %1269 = vmatprep.subr.bf16.mxu0 %v1595_v0 }
  0x70   :  { %1270 = vmatpush3.bf16.msra.mxu0 %v1414_v21 }
  0x71   :  { %1271 = vmatprep.subr.bf16.mxu0 %v1595_v0 }
  0x74   :  { %1272 = vmatpush3.bf16.msra.mxu0 %v1415_v22 }
  0x75   :  { %1273 = vmatprep.subr.bf16.mxu0 %v1595_v0 }
  0x78   :  { %1274 = vmatpush3.bf16.msra.mxu0 %v1416_v23 }
  0x79   :  { %1275 = vmatprep.subr.bf16.mxu0 %v1595_v0 }
  0x7c   :  { %1276 = vmatpush3.bf16.msra.mxu0 %v1417_v24 }
  0x7d   :  { %1277 = vmatprep.subr.bf16.mxu0 %v1595_v0 }
  0x80   :  { %1278 = vmatpush3.bf16.msra.mxu0 %v1418_v25  ;;  %v1435_v25 = vld [vmem:[#allocation2 + $0xb0] sm:$0xff]  }
  0x81   :  { %1279 = vmatprep.subr.bf16.mxu0 %v1595_v0 }
  0x84   :  { %1280 = vmatpush3.bf16.msra.mxu0 %v1419_v44  ;;  %v1444_v44 = vld [vmem:[#allocation6 + $0xb8] sm:$0xff]  }
  0x85   :  { %1281 = vmatprep.subr.bf16.mxu0 %v1595_v0 }
  0x88   :  { %1282 = vmatpush3.bf16.msra.mxu0 %v1420_v45  ;;  %v1445_v45 = vld [vmem:[#allocation2 + $0xc0] sm:$0xff]  }
  0x89   :  { %1307 = vmatprep.subr.bf16.mxu0 %v1595_v0 }
 0x13e   :  { %v184_v27 = vpop.f32.mrb[0].mxu0 }
 0x13f   :  { %v185_v28 = vadd.f32 %v1075_v26, %v184_v27  ;;  %v1245_v29 = vpop.f32.mrb[1].mxu0 }
 0x140   :  { %v187_v30 = vpop.f32.mrb[2].mxu0 }
 0x141   :  { %v1084_v31 = vmul.f32 -1.442695, %v185_v28  ;;  %v188_v32 = vadd.f32 %v1075_v26, %v187_v30  ;;  %v1246_v33 = vpop.f32.mrb[3].mxu0  ;;  %v1436_v26 = vld [vmem:[#allocation2 + $0xb8] sm:$0xff]   ;;  %v1114_v30 = vld [vmem:[#allocation7 + $0x1] ss:$0 sm:$0xff] }
 0x143   :  { %1461 = vpow2.f32 %v1084_v31  ;;  %v1085_v34 = vmul.f32 -1.442695, %v188_v32 }
 0x145   :  { %1463 = vpow2.f32 %v1085_v34 }
 0x14d   :  { %v1462_v35 = vpop.eup %1461 }
 0x14e   :  { %v197_v36 = vadd.f32 1.0, %v1462_v35 }
 0x14f   :  { %v1464_v37 = vpop.eup %1463 }
 0x150   :  { %1465 = vrcp.f32 %v197_v36  ;;  %v198_v38 = vadd.f32 1.0, %v1464_v37  ;;  %v1437_v37 = vld [vmem:[#allocation6 + $0x80] sm:$0xff]  }
 0x152   :  { %1467 = vrcp.f32 %v198_v38  ;;  %v1438_v38 = vld [vmem:[#allocation6 + $0x88] sm:$0xff]  }
 0x15a   :  { %v1466_v39 = vpop.eup %1465 }
 0x15b   :  { %v203_v41 = vmul.f32 %v1466_v39, %v185_v28  ;;  %v1439_v39 = vld [vmem:[#allocation6 + $0x90] sm:$0xff]  }
 0x15c   :  { %v1468_v40 = vpop.eup %1467 }
 0x15d   :  { %v204_v42 = vmul.f32 %v1468_v40, %v188_v32  ;;  %v1440_v40 = vld [vmem:[#allocation6 + $0x98] sm:$0xff]  }
 0x15f   :  { %v205_v43 = vpack.c.bf16 %v204_v42, %v203_v41  ;;  %v1441_v41 = vld [vmem:[#allocation6 + $0xa0] sm:$0xff]   ;;  %v1442_v42 = vld [vmem:[#allocation6 + $0xa8] sm:$0xff]  }
 0x161   :  { %1264 = vmatmul.mubr.bf16.vlgmr.msra.gmra.mrb[0].mxu1 %v205_v43  ;;  %v1443_v43 = vld [vmem:[#allocation6 + $0xb0] sm:$0xff]  }
 0x162   :  { %1303 = vmatprep.mubr.msk.bf16.mxu1 %vm1596_vm0, %v1595_v0  ;;  %1288 = vmatpush3.bf16.msra.mxu1 %v1421_v56 }
 0x163   :  { %1289 = vmatprep.subr.bf16.mxu1 %v1595_v0 }
 0x166   :  { %1290 = vmatpush3.bf16.msra.mxu1 %v1422_v57 }
 0x167   :  { %1291 = vmatprep.subr.bf16.mxu1 %v1595_v0 }
 0x16a   :  { %1292 = vmatpush3.bf16.msra.mxu1 %v1423_v58 }
 0x16b   :  { %1293 = vmatprep.subr.bf16.mxu1 %v1595_v0 }
 0x16e   :  { %1294 = vmatpush3.bf16.msra.mxu1 %v1424_v59 }
 0x16f   :  { %1295 = vmatprep.subr.bf16.mxu1 %v1595_v0 }
 0x172   :  { %1296 = vmatpush3.bf16.msra.mxu1 %v1425_v60 }
 0x173   :  { %1297 = vmatprep.subr.bf16.mxu1 %v1595_v0 }
 0x176   :  { %1298 = vmatpush3.bf16.msra.mxu1 %v1426_v61 }
 0x177   :  { %1299 = vmatprep.subr.bf16.mxu1 %v1595_v0 }
 0x17a   :  { %1300 = vmatpush3.bf16.msra.mxu1 %v1427_v62 }
 0x17b   :  { %1301 = vmatprep.subr.bf16.mxu1 %v1595_v0 }
 0x17e   :  { %1302 = vmatpush3.bf16.msra.mxu1 %v1428_v63 }
 0x17f   :  { %1327 = vmatprep.subr.bf16.mxu1 %v1595_v0 }
 0x234   :  { %v304_v46 = vpop.f32.mrb[0].mxu1 }
 0x235   :  { %v311_v47 = vadd.f32 %v304_v46, %v1703_v9  ;;  %v1265_v48 = vpop.f32.mrb[1].mxu1  ;;  %v1446_v46 = vld [vmem:[#allocation2 + $0xc8] sm:$0xff]  }
 0x236   :  { %v307_v50 = vpop.f32.mrb[2].mxu1  ;;  %v1448_v48 = vld [vmem:[#allocation2 + $0xd8] sm:$0xff]  }
 0x237   :  { %v312_v51 = vadd.f32 %v307_v50, %v1708_v10  ;;  %v1266_v52 = vpop.f32.mrb[3].mxu1  ;;  %v1736_v53 = vadd.f32 %v1094_v49, %v311_v47  ;;  %v1447_v47 = vld [vmem:[#allocation2 + $0xd0] sm:$0xff]   ;;  %v1450_v50 = vld [vmem:[#allocation2 + $0xe8] sm:$0xff]  }
 0x239   :  { %v1738_v54 = vadd.f32 %v1094_v49, %v312_v51  ;;  %v1449_v49 = vld [vmem:[#allocation2 + $0xe0] sm:$0xff]  }
 0x23a   :  { %v1115_v51 = vld [vmem:[#allocation4 + $0x2] ss:$0 sm:$0xff] }
 0x23b   :  { %v322_v55 = vpack.c.bf16 %v1738_v54, %v1736_v53 }
 0x23d   :  { %1284 = vmatmul.mubr.bf16.vlgmr.msra.gmra.mrb[4].mxu0 %v322_v55 }
 0x23e   :  { %1323 = vmatprep.mubr.msk.bf16.mxu0 %vm1596_vm0, %v1595_v0  ;;  %1308 = vmatpush3.bf16.msra.mxu0 %v1429_v1 }
 0x23f   :  { %1309 = vmatprep.subr.bf16.mxu0 %v1595_v0 }
 0x242   :  { %1310 = vmatpush3.bf16.msra.mxu0 %v1430_v2 }
 0x243   :  { %1311 = vmatprep.subr.bf16.mxu0 %v1595_v0 }
 0x246   :  { %1312 = vmatpush3.bf16.msra.mxu0 %v1431_v3 }
 0x247   :  { %1313 = vmatprep.subr.bf16.mxu0 %v1595_v0 }
 0x24a   :  { %1314 = vmatpush3.bf16.msra.mxu0 %v1432_v4 }
 0x24b   :  { %1315 = vmatprep.subr.bf16.mxu0 %v1595_v0 }
 0x24e   :  { %1316 = vmatpush3.bf16.msra.mxu0 %v1433_v5 }
 0x24f   :  { %1317 = vmatprep.subr.bf16.mxu0 %v1595_v0 }
 0x252   :  { %1318 = vmatpush3.bf16.msra.mxu0 %v1434_v6  ;;  %v1451_v6 = vld [vmem:[#allocation2 + $0xf0] sm:$0xff]  }
 0x253   :  { %1319 = vmatprep.subr.bf16.mxu0 %v1595_v0 }
 0x256   :  { %1320 = vmatpush3.bf16.msra.mxu0 %v1435_v25  ;;  %v1460_v25 = vld [vmem:[#allocation6 + $0xf8] sm:$0xff]  }
 0x257   :  { %1321 = vmatprep.subr.bf16.mxu0 %v1595_v0 }
 0x25a   :  { %1322 = vmatpush3.bf16.msra.mxu0 %v1436_v26  ;;  %v1135_v26 = vld [vmem:[#allocation4 + $0x3] ss:$0 sm:$0xff] }
 0x25b   :  { %1347 = vmatprep.subr.bf16.mxu0 %v1595_v0 }
 0x310   :  { %v430_v8 = vpop.f32.mrb[4].mxu0 }
 0x311   :  { %v431_v9 = vadd.f32 %v1095_v7, %v430_v8  ;;  %v1285_v10 = vpop.f32.mrb[5].mxu0 }
 0x312   :  { %v433_v11 = vpop.f32.mrb[6].mxu0 }
 0x313   :  { %v1104_v12 = vmul.f32 -1.442695, %v431_v9  ;;  %v434_v13 = vadd.f32 %v1095_v7, %v433_v11  ;;  %v1286_v14 = vpop.f32.mrb[7].mxu0  ;;  %v1452_v7 = vld [vmem:[#allocation2 + $0xf8] sm:$0xff]   ;;  %v1134_v11 = vld [vmem:[#allocation7 + $0x2] ss:$0 sm:$0xff] }
 0x315   :  { %1469 = vpow2.f32 %v1104_v12  ;;  %v1105_v15 = vmul.f32 -1.442695, %v434_v13 }
 0x317   :  { %1471 = vpow2.f32 %v1105_v15 }
 0x31f   :  { %v1470_v16 = vpop.eup %1469 }
 0x320   :  { %v443_v17 = vadd.f32 1.0, %v1470_v16 }
 0x321   :  { %v1472_v18 = vpop.eup %1471 }
 0x322   :  { %1473 = vrcp.f32 %v443_v17  ;;  %v444_v19 = vadd.f32 1.0, %v1472_v18  ;;  %v1453_v18 = vld [vmem:[#allocation6 + $0xc0] sm:$0xff]  }
 0x324   :  { %1475 = vrcp.f32 %v444_v19  ;;  %v1454_v19 = vld [vmem:[#allocation6 + $0xc8] sm:$0xff]  }
 0x32c   :  { %v1474_v20 = vpop.eup %1473 }
 0x32d   :  { %v449_v22 = vmul.f32 %v1474_v20, %v431_v9  ;;  %v1455_v20 = vld [vmem:[#allocation6 + $0xd0] sm:$0xff]  }
 0x32e   :  { %v1476_v21 = vpop.eup %1475 }
 0x32f   :  { %v450_v23 = vmul.f32 %v1476_v21, %v434_v13  ;;  %v1456_v21 = vld [vmem:[#allocation6 + $0xd8] sm:$0xff]  }
 0x331   :  { %v451_v24 = vpack.c.bf16 %v450_v23, %v449_v22  ;;  %v1457_v22 = vld [vmem:[#allocation6 + $0xe0] sm:$0xff]   ;;  %v1458_v23 = vld [vmem:[#allocation6 + $0xe8] sm:$0xff]  }
 0x333   :  { %1304 = vmatmul.mubr.bf16.vlgmr.msra.gmra.mrb[4].mxu1 %v451_v24  ;;  %v1459_v24 = vld [vmem:[#allocation6 + $0xf0] sm:$0xff]  }
 0x334   :  { %1343 = vmatprep.mubr.msk.bf16.mxu1 %vm1596_vm0, %v1595_v0  ;;  %1328 = vmatpush3.bf16.msra.mxu1 %v1437_v37 }
 0x335   :  { %1329 = vmatprep.subr.bf16.mxu1 %v1595_v0 }
 0x338   :  { %1330 = vmatpush3.bf16.msra.mxu1 %v1438_v38 }
 0x339   :  { %1331 = vmatprep.subr.bf16.mxu1 %v1595_v0 }
 0x33c   :  { %1332 = vmatpush3.bf16.msra.mxu1 %v1439_v39 }
 0x33d   :  { %1333 = vmatprep.subr.bf16.mxu1 %v1595_v0 }
 0x340   :  { %1334 = vmatpush3.bf16.msra.mxu1 %v1440_v40 }
 0x341   :  { %1335 = vmatprep.subr.bf16.mxu1 %v1595_v0 }
 0x344   :  { %1336 = vmatpush3.bf16.msra.mxu1 %v1441_v41 }
 0x345   :  { %1337 = vmatprep.subr.bf16.mxu1 %v1595_v0 }
 0x348   :  { %1338 = vmatpush3.bf16.msra.mxu1 %v1442_v42 }
 0x349   :  { %1339 = vmatprep.subr.bf16.mxu1 %v1595_v0 }
 0x34c   :  { %1340 = vmatpush3.bf16.msra.mxu1 %v1443_v43 }
 0x34d   :  { %1341 = vmatprep.subr.bf16.mxu1 %v1595_v0 }
 0x350   :  { %1342 = vmatpush3.bf16.msra.mxu1 %v1444_v44  ;;  %v1154_v44 = vld [vmem:[#allocation7 + $0x3] ss:$0 sm:$0xff] }
 0x351   :  { %1367 = vmatprep.subr.bf16.mxu1 %v1595_v0 }
 0x406   :  { %v551_v27 = vpop.f32.mrb[4].mxu1 }
 0x407   :  { %v558_v28 = vadd.f32 %v551_v27, %v1736_v53  ;;  %v1305_v29 = vpop.f32.mrb[5].mxu1 }
 0x408   :  { %v554_v31 = vpop.f32.mrb[6].mxu1 }
 0x409   :  { %v559_v32 = vadd.f32 %v554_v31, %v1738_v54  ;;  %v1306_v33 = vpop.f32.mrb[7].mxu1  ;;  %v1764_v34 = vadd.f32 %v1114_v30, %v558_v28 }
 0x40b   :  { %v1766_v35 = vadd.f32 %v1114_v30, %v559_v32 }
 0x40d   :  { %v570_v36 = vpack.c.bf16 %v1766_v35, %v1764_v34 }
 0x40f   :  { %1324 = vmatmul.mubr.bf16.vlgmr.msra.gmra.mrb[8].mxu0 %v570_v36 }
 0x410   :  { %1363 = vmatprep.mubr.msk.bf16.mxu0 %vm1596_vm0, %v1595_v0  ;;  %1348 = vmatpush3.bf16.msra.mxu0 %v1445_v45 }
 0x411   :  { %1349 = vmatprep.subr.bf16.mxu0 %v1595_v0 }
 0x414   :  { %1350 = vmatpush3.bf16.msra.mxu0 %v1446_v46 }
 0x415   :  { %1351 = vmatprep.subr.bf16.mxu0 %v1595_v0 }
 0x418   :  { %1352 = vmatpush3.bf16.msra.mxu0 %v1447_v47 }
 0x419   :  { %1353 = vmatprep.subr.bf16.mxu0 %v1595_v0 }
 0x41c   :  { %1354 = vmatpush3.bf16.msra.mxu0 %v1448_v48 }
 0x41d   :  { %1355 = vmatprep.subr.bf16.mxu0 %v1595_v0 }
 0x420   :  { %1356 = vmatpush3.bf16.msra.mxu0 %v1449_v49 }
 0x421   :  { %1357 = vmatprep.subr.bf16.mxu0 %v1595_v0 }
 0x424   :  { %1358 = vmatpush3.bf16.msra.mxu0 %v1450_v50 }
 0x425   :  { %1359 = vmatprep.subr.bf16.mxu0 %v1595_v0 }
 0x428   :  { %1360 = vmatpush3.bf16.msra.mxu0 %v1451_v6 }
 0x429   :  { %1361 = vmatprep.subr.bf16.mxu0 %v1595_v0 }
 0x42c   :  { %1362 = vmatpush3.bf16.msra.mxu0 %v1452_v7 }
 0x4e2   :  { %v678_v52 = vpop.f32.mrb[8].mxu0 }
 0x4e3   :  { %v679_v53 = vadd.f32 %v1115_v51, %v678_v52  ;;  %v1325_v54 = vpop.f32.mrb[9].mxu0 }
 0x4e4   :  { %v681_v55 = vpop.f32.mrb[10].mxu0 }
 0x4e5   :  { %v1124_v56 = vmul.f32 -1.442695, %v679_v53  ;;  %v682_v57 = vadd.f32 %v1115_v51, %v681_v55  ;;  %v1326_v58 = vpop.f32.mrb[11].mxu0 }
 0x4e7   :  { %1477 = vpow2.f32 %v1124_v56  ;;  %v1125_v59 = vmul.f32 -1.442695, %v682_v57 }
 0x4e9   :  { %1479 = vpow2.f32 %v1125_v59 }
 0x4f1   :  { %v1478_v60 = vpop.eup %1477 }
 0x4f2   :  { %v691_v61 = vadd.f32 1.0, %v1478_v60 }
 0x4f3   :  { %v1480_v62 = vpop.eup %1479 }
 0x4f4   :  { %1481 = vrcp.f32 %v691_v61  ;;  %v692_v63 = vadd.f32 1.0, %v1480_v62 }
 0x4f6   :  { %1483 = vrcp.f32 %v692_v63 }
 0x4fe   :  { %v1482_v1 = vpop.eup %1481 }
 0x4ff   :  { %v697_v3 = vmul.f32 %v1482_v1, %v679_v53 }
 0x500   :  { %v1484_v2 = vpop.eup %1483 }
 0x501   :  { %v698_v4 = vmul.f32 %v1484_v2, %v682_v57 }
 0x503   :  { %v699_v5 = vpack.c.bf16 %v698_v4, %v697_v3 }
 0x505   :  { %1344 = vmatmul.mubr.bf16.vlgmr.msra.gmra.mrb[8].mxu1 %v699_v5 }
 0x506   :  { %1383 = vmatprep.mubr.msk.bf16.mxu1 %vm1596_vm0, %v1595_v0  ;;  %1368 = vmatpush3.bf16.msra.mxu1 %v1453_v18 }
 0x507   :  { %1369 = vmatprep.subr.bf16.mxu1 %v1595_v0 }
 0x50a   :  { %1370 = vmatpush3.bf16.msra.mxu1 %v1454_v19 }
 0x50b   :  { %1371 = vmatprep.subr.bf16.mxu1 %v1595_v0 }
 0x50e   :  { %1372 = vmatpush3.bf16.msra.mxu1 %v1455_v20 }
 0x50f   :  { %1373 = vmatprep.subr.bf16.mxu1 %v1595_v0 }
 0x512   :  { %1374 = vmatpush3.bf16.msra.mxu1 %v1456_v21 }
 0x513   :  { %1375 = vmatprep.subr.bf16.mxu1 %v1595_v0 }
 0x516   :  { %1376 = vmatpush3.bf16.msra.mxu1 %v1457_v22 }
 0x517   :  { %1377 = vmatprep.subr.bf16.mxu1 %v1595_v0 }
 0x51a   :  { %1378 = vmatpush3.bf16.msra.mxu1 %v1458_v23 }
 0x51b   :  { %1379 = vmatprep.subr.bf16.mxu1 %v1595_v0 }
 0x51e   :  { %1380 = vmatpush3.bf16.msra.mxu1 %v1459_v24 }
 0x51f   :  { %1381 = vmatprep.subr.bf16.mxu1 %v1595_v0 }
 0x522   :  { %1382 = vmatpush3.bf16.msra.mxu1 %v1460_v25 }
 0x5d8   :  { %v799_v8 = vpop.f32.mrb[8].mxu1 }
 0x5d9   :  { %v806_v9 = vadd.f32 %v799_v8, %v1764_v34  ;;  %v1345_v10 = vpop.f32.mrb[9].mxu1 }
 0x5da   :  { %v802_v12 = vpop.f32.mrb[10].mxu1 }
 0x5db   :  { %v807_v13 = vadd.f32 %v802_v12, %v1766_v35  ;;  %v1346_v14 = vpop.f32.mrb[11].mxu1  ;;  %v816_v15 = vadd.f32 %v1134_v11, %v806_v9 }
 0x5dd   :  { %v817_v16 = vadd.f32 %v1134_v11, %v807_v13 }
 0x5df   :  { %v818_v17 = vpack.c.bf16 %v817_v16, %v816_v15 }
 0x5e1   :  { %1364 = vmatmul.mubr.bf16.vlgmr.msra.gmra.mrb[12].mxu0 %v818_v17 }
 0x6b4   :  { %v926_v27 = vpop.f32.mrb[12].mxu0 }
 0x6b5   :  { %v927_v28 = vadd.f32 %v1135_v26, %v926_v27  ;;  %v1365_v29 = vpop.f32.mrb[13].mxu0 }
 0x6b6   :  { %v929_v30 = vpop.f32.mrb[14].mxu0 }
 0x6b7   :  { %v1144_v31 = vmul.f32 -1.442695, %v927_v28  ;;  %v930_v32 = vadd.f32 %v1135_v26, %v929_v30  ;;  %v1366_v33 = vpop.f32.mrb[15].mxu0 }
 0x6b9   :  { %1485 = vpow2.f32 %v1144_v31  ;;  %v1145_v34 = vmul.f32 -1.442695, %v930_v32 }
 0x6bb   :  { %1487 = vpow2.f32 %v1145_v34 }
 0x6c3   :  { %v1486_v35 = vpop.eup %1485 }
 0x6c4   :  { %v939_v36 = vadd.f32 1.0, %v1486_v35 }
 0x6c5   :  { %v1488_v37 = vpop.eup %1487 }
 0x6c6   :  { %1489 = vrcp.f32 %v939_v36  ;;  %v940_v38 = vadd.f32 1.0, %v1488_v37 }
 0x6c8   :  { %1491 = vrcp.f32 %v940_v38 }
 0x6d0   :  { %v1490_v0 = vpop.eup %1489 }
 0x6d1   :  { %v945_v40 = vmul.f32 %v1490_v0, %v927_v28 }
 0x6d2   :  { %v1492_v39 = vpop.eup %1491 }
 0x6d3   :  { %v946_v41 = vmul.f32 %v1492_v39, %v930_v32 }
 0x6d5   :  { %v947_v42 = vpack.c.bf16 %v946_v41, %v945_v40 }
 0x6d7   :  { %1384 = vmatmul.mubr.bf16.vlgmr.msra.gmra.mrb[12].mxu1 %v947_v42 }
 0x7aa   :  { %v1047_v43 = vpop.f32.mrb[12].mxu1 }
 0x7ab   :  { %v1054_v45 = vadd.f32 %v1047_v43, %v816_v15  ;;  %v1385_v46 = vpop.f32.mrb[13].mxu1 }
 0x7ac   :  { %v1050_v47 = vpop.f32.mrb[14].mxu1 }
 0x7ad   :  { %v1064_v48 = vadd.f32 %v1154_v44, %v1054_v45  ;;  %v1055_v49 = vadd.f32 %v1050_v47, %v817_v16  ;;  %v1386_v50 = vpop.f32.mrb[15].mxu1 }
 0x7af   :  { %1066 = vst [vmem:[%s1809_s5] sm:$0xff] %v1064_v48  ;;  %v1065_v51 = vadd.f32 %v1154_v44, %v1055_v49 }
 0x7b1   :  { %1067 = vst [vmem:[%s1809_s5 + $0x8] sm:$0xff] %v1065_v51 }
 0x7b2   :  { %1072 = vsyncpa [#allocation3], 1 }
 0x7b3   :  { %1073 = vsyncpa [#allocation5], 1 }
 0x7b4   :  { %1074 = vsyncpa [#allocation8], 1 }

// kernel: _lambda_.5
= control target key start
LH: loop header
LB: loop body
LE: loop exit
PB: predicated region body
PF: predicated region fallthrough
CT: control target
= control target key end

     0   :  { %s5076_s0 = inlined_call_operand.vmem [shape: f32[2,8,256], index: 0, kind: input, shape index: {}]   ;;  %s5077_s1 = inlined_call_operand.vmem [shape: f32[2,1,256], index: 1, kind: input, shape index: {}]   ;;  %s5078_s2 = inlined_call_operand.hbm [shape: bf16[3,256,256], index: 2, kind: input, shape index: {}]   ;;  %s5079_s3 = inlined_call_operand.hbm [shape: f32[3,1,256], index: 3, kind: input, shape index: {}]   ;;  %s5080_s4 = inlined_call_operand.hbm [shape: bf16[3,256,256], index: 4, kind: input, shape index: {}]   ;;  %s5081_s5 = inlined_call_operand.hbm [shape: f32[3,1,256], index: 5, kind: input, shape index: {}]   ;;  %s5082_s6 = inlined_call_operand.hbm [shape: bf16[4,256,1024], index: 6, kind: input, shape index: {}]   ;;  %s5083_s7 = inlined_call_operand.hbm [shape: f32[4,1,1024], index: 7, kind: input, shape index: {}]   ;;  %s5084_s8 = inlined_call_operand.hbm [shape: bf16[2,4,8,1024], index: 8, kind: output, shape index: {}]  }
   0x1   :  { %5111 = sst [smem:[#allocation29_spill]] %s5076_s0 }
   0x2   :  { %5112 = sst [smem:[#allocation30_spill]] %s5077_s1 }
   0x3   :  { %5113 = sst [smem:[#allocation31_spill]] %s5078_s2 }
   0x4   :  { %5114 = sst [smem:[#allocation32_spill]] %s5079_s3 }
   0x5   :  { %5115 = sst [smem:[#allocation33_spill]] %s5082_s6 }
   0x6   :  { %5116 = sst [smem:[#allocation34_spill]] %s5084_s8 }
   0x7   :  { %13 = vsyncpa [#allocation4], 0 }
   0x8   :  { %14 = vsyncpa [#allocation7], 0 }
   0x9   :  { %15 = vsyncpa [#allocation10], 0 }
   0xa   :  { %16 = vsyncpa [#allocation5], 0 }
   0xb   :  { %18 = vsyncpa [#allocation5 + $0x1], 0  ;;  %s4467_s27 = smov 0   ;;  %s4469_s28 = smov 0  }
   0xc   :  { %s4471_s29 = smov 0   ;;  %s4473_s30 = smov 0  }
   0xd   :  { %s4475_s9 = smov 0   ;;  %s4477_s10 = smov 0  }
   0xe   :  { %s4479_s11 = smov 0   ;;  %s4481_s12 = smov 0  }
   0xf   :  { %s4483_s13 = smov 0   ;;  %s4485_s14 = smov 0  }
  0x10   :  { %s4487_s15 = smov 0  }
  0x11 LB: > { %5117 = sst [smem:[#allocation19_spill]] %s4368_s27  ;;  %s4521_s16 = sadd.s32 4294967295, %s4408_s15   ;;  %s4408_s15 = sphi %s4487_s15, %s24_s15   ;;  %s4404_s14 = sphi %s4485_s14, %s5174_s14   ;;  %s4400_s13 = sphi %s4483_s13, %s5181_s13   ;;  %s4396_s12 = sphi %s4481_s12, %s5172_s12   ;;  %s4392_s11 = sphi %s4479_s11, %s5180_s11   ;;  %s4388_s10 = sphi %s4477_s10, %s5179_s10   ;;  %s4384_s9 = sphi %s4475_s9, %s5178_s9   ;;  %s4380_s30 = sphi %s4473_s30, %s5177_s30   ;;  %s4376_s29 = sphi %s4471_s29, %s5176_s29   ;;  %s4372_s28 = sphi %s4469_s28, %s5175_s28   ;;  %s4368_s27 = sphi %s4467_s27, %s5170_s27  }
  0x12   : > { %5118 = sst [smem:[#allocation20_spill]] %s4372_s28  ;;  %s3269_s17 = sadd.s32 4294967294, %s4408_s15  }
  0x13   : > { %5119 = sst [smem:[#allocation21_spill]] %s4392_s11  ;;  %p201_p0 = scmp.ne.s32.totalorder %s4384_s9, %s4380_s30 }
  0x14   : > { %5120 = sst [smem:[#allocation22_spill]] %s4396_s12  ;;  %p5090_p1 = scmp.eq.s32.totalorder %s4521_s16, 0 }
  0x15   : > { %5121 = sst [smem:[#allocation23_spill]] %s4404_s14  ;;  %p254_p2 = scmp.ne.s32.totalorder %s4376_s29, %s4372_s28 }
  0x16   : > { %p4531_p3 = por %p5090_p1, %p201_p0  ;;  %p255_p4 = scmp.eq.s32.totalorder %s4521_s16, 7 }
  0x17   : > { %p260_p5 = scmp.ne.s32.totalorder %s4372_s28, %s4368_s27  ;;  %p261_p6 = scmp.eq.s32.totalorder %s3269_s17, 7 }
  0x18   : > { %s5122_s19 = scalar_select %p4531_p3, 1, 0 }
  0x19   : > { %p4538_p7 = por %p255_p4, %p254_p2  ;;  %p3270_p8 = scmp.ge.s32.totalorder %s4408_s15, 1 }
  0x1a   : > { %p4543_p9 = por %p261_p6, %p260_p5  ;;  %p268_p10 = scmp.lt.s32.totalorder %s4408_s15, 9 }
  0x1b   : > { %s5123_s20 = scalar_select %p4538_p7, 1, 0 }
  0x1c   : > { %s5125_s21 = scalar_select %p4543_p9, 1, 0 }
  0x1d   : > { %5124 = sst [smem:[#allocation24_spill]] %s5123_s20  ;;  %p4548_p11 = pnand %p3270_p8, %p268_p10 }
  0x1e   : > { %5126 = sst [smem:[#allocation25_spill]] %s5125_s21  ;;  %s4410_s23 = smov [#allocation3]  }
  0x1f   : > { %s5127_s22 = scalar_select %p4548_p11, 1, 0 }
  0x20   : > { %s280_s24 = sshll.u32 %s4410_s23, 4  ;;  %p3659_p12 = pneg %p4548_p11  ;;  %s281_s24 = int_to_ptr.vmem [resolvable:$true] %s280_s24 }
  0x21   : > { %s4411_s26 = smov [#allocation6]   ;;  %s5129_s2 = sld [smem:[#allocation31_spill]] }
  0x22   : > { %p4556_p13 = pnand %p3659_p12, %p5090_p1  ;;  %s293_s30 = sshll.u32 %s4411_s26, 4  ;;  %s4560_s30 = int_to_ptr.vmem [resolvable:$true] %s293_s30 }
  0x24   : > { %s5128_s25 = scalar_select %p4556_p13, 1, 0 }
  0x25   : > { %p4570_p2 = pneg %p4556_p13 }
  0x27   : > { %s4102_s21 = scalar_lea.hbm %s5129_s2, 12288 }
  0x28   : > { %p4103_p0 = scmp.ne.s32.totalorder %s5129_s2, %s4102_s21  ;;  %p4109_p6 = scmp.lt.u32.totalorder %s4102_s21, %s5129_s2 }
  0x2a   : > { %p4105_p4 = pnand %p4570_p2, %p4103_p0 }
  0x2c   : > { %p4106_p5 = pneg %p4105_p4 }
  0x2e   : > { %p4111_p8 = pnand %p4109_p6, %p4106_p5 }
  0x30   : > { %4114 = shalt.err (!%p4111_p8)
}
  0x31   : > { %s4115_s18 = scalar_lea.vmem %s281_s24, 12288  ;;  %p4123_p9 = scmp.lt.s32.totalorder %s281_s24, %s281_s24 }
  0x32   : > { %p4116_p10 = scmp.ne.s32.totalorder %s281_s24, %s4115_s18  ;;  %p4124_p7 = scmp.lt.s32.totalorder %s4115_s18, %s4115_s18 }
  0x34   : > { %p4118_p12 = pnand %p4116_p10, %p4570_p2  ;;  %p4125_p3 = por %p4124_p7, %p4123_p9 }
  0x36   : > { %p4119_p1 = pneg %p4118_p12 }
  0x38   : > { %p4126_p11 = pnand %p4125_p3, %p4119_p1 }
  0x3a   : > { %4129 = shalt.err (!%p4126_p11)
}
  0x3b   : > { %s5096_s8 = smov 128   ;;  %s5097_s27 = smov 8  }
  0x3c   : > { %3662 = dma.hbm_to_vmem [thread:$0]  (!%p4556_p13), %s5129_s2, 12288, %s281_s24, [#allocation4], %s5096_s8, %s5096_s8, %s5097_s27  }
  0x3d   : > { %s5131_s3 = sld [smem:[#allocation32_spill]] }
  0x43   : > { %s4130_s11 = scalar_lea.hbm %s5131_s3, 96 }
  0x44   : > { %p4131_p1 = scmp.ne.s32.totalorder %s5131_s3, %s4130_s11  ;;  %p4137_p9 = scmp.lt.u32.totalorder %s4130_s11, %s5131_s3 }
  0x46   : > { %p4133_p3 = pnand %p4131_p1, %p4570_p2 }
  0x48   : > { %p4134_p7 = pneg %p4133_p3 }
  0x4a   : > { %p4139_p11 = pnand %p4137_p9, %p4134_p7 }
  0x4c   : > { %4142 = shalt.err (!%p4139_p11)
}
  0x4d   : > { %s4143_s24 = scalar_lea.vmem %s4560_s30, 96  ;;  %p4151_p6 = scmp.lt.s32.totalorder %s4560_s30, %s4560_s30 }
  0x4e   : > { %p4144_p0 = scmp.ne.s32.totalorder %s4560_s30, %s4143_s24  ;;  %p4152_p8 = scmp.lt.s32.totalorder %s4143_s24, %s4143_s24 }
  0x50   : > { %p4146_p4 = pnand %p4144_p0, %p4570_p2  ;;  %p4153_p10 = por %p4152_p8, %p4151_p6 }
  0x52   : > { %p4147_p5 = pneg %p4146_p4 }
  0x54   : > { %p4154_p12 = pnand %p4153_p10, %p4147_p5 }
  0x56   : > { %4157 = shalt.err (!%p4154_p12)
}
  0x57   : > { %s5098_s1 = smov 32   ;;  %s5095_s0 = smov 2  }
  0x58   : > { %3665 = dma.hbm_to_vmem [thread:$0]  (!%p4556_p13), %s5131_s3, 96, %s4560_s30, [#allocation7], %s5098_s1, %s5098_s1, %s5095_s0  }
  0x59   : > { %s36_s20 = sadd.s32 1, %s4400_s13  ;;  %s43_s21 = sadd.s32 1, %s4404_s14 }
  0x5a   : > { %p37_p1 = scmp.ge.s32.totalorder %s36_s20, 4  ;;  %s188_s17 = sadd.s32 1, %s4388_s10 }
  0x5b   : > { %p195_p3 = scmp.ne.s32.totalorder %s4388_s10, %s4384_s9  ;;  %p196_p7 = scmp.eq.s32.totalorder %s4408_s15, 0 }
  0x5c   : > { %s5183_s20 = smov (%p37_p1, %s36_s20), 0  ;;  %s5185_s21 = smov (!%p37_p1, %s43_s21), %s4404_s14 }
  0x5d   : > { %5132 = sst [smem:[#allocation26_spill]] %s5183_s20  ;;  %s185_s26 = ssub.s32 %s4400_s13, %s5183_s20 }
  0x5e   : > { %p4626_p9 = por %p196_p7, %p195_p3  ;;  %p45_p11 = scmp.ge.s32.totalorder %s5185_s21, 2 }
  0x5f   : > { %p186_p0 = scmp.eq.s32.totalorder %s185_s26, 0  ;;  %p3687_p4 = scmp.lt.s32.totalorder %s4408_s15, 8 }
  0x60   : > { %s352_s18 = sand.u32 1, %s4408_s15   ;;  %s5187_s21 = smov (%p45_p11, %s5185_s21), 0 }
  0x61   : > { %5134 = sst [smem:[#allocation27_spill]] %s5187_s21  ;;  %s237_s11 = ssub.s32 %s4404_s14, %s5187_s21 }
  0x62   : > { %s4635_s24 = scalar_select %p186_p0, %s4388_s10, %s188_s17  }
  0x63   : > { %s239_s12 = sor.u32 %s237_s11, %s185_s26  ;;  %s5106_s0 = sand.u32 1, %s4388_s10  }
  0x64   : > { %5135 = sst [smem:[#allocation28_spill]] %s4635_s24  ;;  %p242_p5 = scmp.eq.s32.totalorder %s239_s12, 0 }
  0x65   : > { %s3276_s8 = sshll.u32 %s5106_s0, 10  ;;  %s3630_s27 = sshll.u32 %s4400_s13, 14 }
  0x66   : > { %s5136_s1 = sadd.s32 1, %s4376_s29  ;;  %s5137_s6 = sld [smem:[#allocation33_spill]] }
  0x67   : > { %s4646_s2 = scalar_select %p242_p5, %s4376_s29, %s5136_s1  }
  0x68   : > { %s356_s17 = scalar_lea.vmem [#allocation11], %s3276_s8  ;;  %p4659_p6 = pnand %p3687_p4, %p4626_p9 }
  0x69   : > { %s363_s21 = sshll.u32 %s356_s17, 4  ;;  %s4416_s1 = smov [#allocation8]   ;;  %s4653_s21 = int_to_ptr.vmem [resolvable:$true] %s363_s21 }
  0x6a   : > { %s5138_s26 = scalar_select %p4659_p6, 1, 0 }
  0x6b   : > { %s4663_s3 = sshll.u32 %s4416_s1, 4  ;;  %p5107_p10 = pneg %p4659_p6  ;;  %s307_s3 = int_to_ptr.vmem [resolvable:$true] %s4663_s3 }
  0x6c   : > { %s4651_s28 = scalar_lea.hbm %s5137_s6, %s3630_s27  ;;  %s4665_s27 = scalar_lea.sflag [#allocation4], %s352_s18 }
  0x6d   : > { %s4158_s20 = scalar_lea.hbm %s4651_s28, 16384  ;;  %s4163_s11 = scalar_lea.hbm %s5137_s6, 65536 }
  0x6e   : > { %p4159_p8 = scmp.ne.s32.totalorder %s4651_s28, %s4158_s20  ;;  %p4164_p3 = scmp.lt.u32.totalorder %s4651_s28, %s5137_s6 }
  0x6f   : > { %p4165_p7 = scmp.lt.u32.totalorder %s4163_s11, %s4158_s20  ;;  %p4167_p11 = scmp.lt.u32.totalorder %s4158_s20, %s4651_s28 }
  0x70   : > { %p4161_p12 = pnand %p5107_p10, %p4159_p8 }
  0x71   : > { %p4166_p9 = por %p4165_p7, %p4164_p3 }
  0x72   : > { %p4162_p1 = pneg %p4161_p12 }
  0x73   : > { %p4168_p0 = por %p4167_p11, %p4166_p9 }
  0x75   : > { %p4169_p4 = pnand %p4168_p0, %p4162_p1 }
  0x77   : > { %4172 = shalt.err (!%p4169_p4)
}
  0x78   : > { %s4173_s18 = scalar_lea.vmem %s4653_s21, 16384  ;;  %s4417_s1 = smov [#allocation11]  }
  0x79   : > { %p4174_p5 = scmp.ne.s32.totalorder %s4653_s21, %s4173_s18  ;;  %s4178_s8 = sshll.u32 %s4417_s1, 4  ;;  %s4179_s8 = int_to_ptr.vmem [resolvable:$false] %s4178_s8 }
  0x7a   : > { %s4180_s30 = scalar_lea.vmem %s4179_s8, 32768  ;;  %p4181_p13 = scmp.lt.s32.totalorder %s4653_s21, %s4179_s8 }
  0x7b   : > { %p4176_p8 = pnand %p4174_p5, %p5107_p10  ;;  %p4182_p3 = scmp.lt.s32.totalorder %s4180_s30, %s4173_s18 }
  0x7d   : > { %p4177_p12 = pneg %p4176_p8  ;;  %p4183_p7 = por %p4182_p3, %p4181_p13 }
  0x7f   : > { %p4184_p9 = pnand %p4183_p7, %p4177_p12 }
  0x81   : > { %4187 = shalt.err (!%p4184_p9)
}
  0x82   : > { %s4418_s20 = smov 512   ;;  %s5139_s11 = smov 32  }
  0x83   : > { %3675 = dma.hbm_to_vmem [thread:$0]  (!%p4659_p6), %s4651_s28, 16384, %s4653_s21, %s4665_s27, %s4418_s20, %s4418_s20, %s5139_s11  }
  0x84   : > { %s4188_s1 = scalar_lea.hbm %s5080_s4, 12288 }
  0x85   : > { %p4189_p13 = scmp.ne.s32.totalorder %s5080_s4, %s4188_s1  ;;  %p4195_p0 = scmp.lt.u32.totalorder %s4188_s1, %s5080_s4 }
  0x87   : > { %p4191_p1 = pnand %p4189_p13, %p4570_p2 }
  0x89   : > { %p4192_p11 = pneg %p4191_p1 }
  0x8b   : > { %p4197_p4 = pnand %p4195_p0, %p4192_p11 }
  0x8d   : > { %4200 = shalt.err (!%p4197_p4)
}
  0x8e   : > { %s4201_s6 = scalar_lea.vmem %s307_s3, 12288  ;;  %p4209_p3 = scmp.lt.s32.totalorder %s307_s3, %s307_s3 }
  0x8f   : > { %p4202_p5 = scmp.ne.s32.totalorder %s307_s3, %s4201_s6  ;;  %p4210_p7 = scmp.lt.s32.totalorder %s4201_s6, %s4201_s6 }
  0x91   : > { %p4204_p8 = pnand %p4202_p5, %p4570_p2  ;;  %p4211_p9 = por %p4210_p7, %p4209_p3 }
  0x93   : > { %p4205_p12 = pneg %p4204_p8 }
  0x95   : > { %p4212_p10 = pnand %p4211_p9, %p4205_p12 }
  0x97   : > { %4215 = shalt.err (!%p4212_p10)
}
  0x98   : > { %p5140_p13 = scmp.ne.s32.totalorder %s5128_s25, 0  ;;  %s5141_s28 = smov 8  }
  0x99   : > { %s5142_s21 = smov 128   ;;  %s4419_s12 = smov [#allocation9]  }
  0x9a   : > { %3668 = dma.hbm_to_vmem [thread:$0]  (!%p5140_p13), %s5080_s4, 12288, %s307_s3, [#allocation7], %s5142_s21, %s5142_s21, %s5141_s28  }
  0x9b   : > { %s319_s17 = sshll.u32 %s4419_s12, 4  ;;  %s5143_s1 = sand.u32 1, %s4388_s10   ;;  %s320_s17 = int_to_ptr.vmem [resolvable:$true] %s319_s17 }
  0x9c   : > { %s3279_s8 = sshll.u32 %s5143_s1, 3  ;;  %s4216_s30 = scalar_lea.hbm %s5081_s5, 96 }
  0x9d   : > { %p4217_p10 = scmp.ne.s32.totalorder %s5081_s5, %s4216_s30  ;;  %p4223_p0 = scmp.lt.u32.totalorder %s4216_s30, %s5081_s5 }
  0x9f   : > { %p4219_p1 = pnand %p4217_p10, %p4570_p2 }
  0xa1   : > { %p4220_p11 = pneg %p4219_p1 }
  0xa3   : > { %p4225_p4 = pnand %p4223_p0, %p4220_p11 }
  0xa5   : > { %4228 = shalt.err (!%p4225_p4)
}
  0xa6   : > { %s4229_s3 = scalar_lea.vmem %s320_s17, 96  ;;  %p4237_p3 = scmp.lt.s32.totalorder %s320_s17, %s320_s17 }
  0xa7   : > { %p4230_p5 = scmp.ne.s32.totalorder %s320_s17, %s4229_s3  ;;  %p4238_p7 = scmp.lt.s32.totalorder %s4229_s3, %s4229_s3 }
  0xa9   : > { %p4232_p8 = pnand %p4230_p5, %p4570_p2  ;;  %p4239_p9 = por %p4238_p7, %p4237_p3 }
  0xab   : > { %p4233_p12 = pneg %p4232_p8 }
  0xad   : > { %p4240_p6 = pnand %p4239_p9, %p4233_p12 }
  0xaf   : > { %4243 = shalt.err (!%p4240_p6)
}
  0xb0   : > { %s5144_s14 = smov 2   ;;  %s3631_s21 = sshll.u32 %s4400_s13, 7 }
  0xb1   : > { %3671 = dma.hbm_to_vmem [thread:$0]  (!%p5140_p13), %s5081_s5, 96, %s320_s17, [#allocation10], %s5139_s11, %s5139_s11, %s5144_s14  }
  0xb2   : > { %s377_s23 = scalar_lea.vmem [#allocation12], %s3279_s8  ;;  %s383_s18 = scalar_lea.hbm %s5083_s7, %s3631_s21 }
  0xb3   : > { %s385_s12 = sshll.u32 %s377_s23, 4  ;;  %s4244_s30 = scalar_lea.hbm %s383_s18, 128  ;;  %s386_s12 = int_to_ptr.vmem [resolvable:$true] %s385_s12 }
  0xb4   : > { %p4245_p2 = scmp.ne.s32.totalorder %s383_s18, %s4244_s30  ;;  %p5145_p6 = scmp.ne.s32.totalorder %s5138_s26, 0 }
  0xb5   : > { %s4249_s20 = scalar_lea.hbm %s5083_s7, 512  ;;  %p4250_p13 = scmp.lt.u32.totalorder %s383_s18, %s5083_s7 }
  0xb6   : > { %p5146_p10 = pneg %p5145_p6  ;;  %p4251_p0 = scmp.lt.u32.totalorder %s4249_s20, %s4244_s30 }
  0xb7   : > { %p4253_p5 = scmp.lt.u32.totalorder %s4244_s30, %s383_s18 }
  0xb8   : > { %p4247_p1 = pnand %p4245_p2, %p5146_p10  ;;  %p4252_p4 = por %p4251_p0, %p4250_p13 }
  0xba   : > { %p4248_p11 = pneg %p4247_p1  ;;  %p4254_p8 = por %p4253_p5, %p4252_p4 }
  0xbc   : > { %p4255_p12 = pnand %p4254_p8, %p4248_p11 }
  0xbe   : > { %4258 = shalt.err (!%p4255_p12)
}
  0xbf   : > { %s4259_s17 = scalar_lea.vmem %s386_s12, 128  ;;  %p5147_p7 = pmov %p5146_p10 }
  0xc0   : > { %p4260_p3 = scmp.ne.s32.totalorder %s386_s12, %s4259_s17  ;;  %s4420_s8 = smov [#allocation12]  }
  0xc1   : > { %s4264_s14 = sshll.u32 %s4420_s8, 4  ;;  %s4265_s14 = int_to_ptr.vmem [resolvable:$false] %s4264_s14 }
  0xc2   : > { %p4262_p9 = pnand %p4260_p3, %p5147_p7  ;;  %s4266_s24 = scalar_lea.vmem %s4265_s14, 256 }
  0xc3   : > { %p4267_p10 = scmp.lt.s32.totalorder %s386_s12, %s4265_s14  ;;  %p4268_p1 = scmp.lt.s32.totalorder %s4266_s24, %s4259_s17 }
  0xc4   : > { %p4263_p2 = pneg %p4262_p9 }
  0xc5   : > { %p4269_p0 = por %p4268_p1, %p4267_p10 }
  0xc7   : > { %p4270_p13 = pnand %p4269_p0, %p4263_p2 }
  0xc9   : > { %4273 = shalt.err (!%p4270_p13)
}
  0xca   : > { %3678 = dma.hbm_to_vmem [thread:$0]  (!%p5145_p6), %s383_s18, 128, %s386_s12, %s4665_s27  }
  0xcb   : > { %p5148_p11 = scmp.ne.s32.totalorder %s5127_s22, 0 }
  0xcc   : > { %p5149_p4 = scmp.eq.s32.totalorder (!%p5148_p11), %s4521_s16, 0 }
  0xcd   : > { %394 = sbr.rel (%p5148_p11) target bundleno = 2060 (0x80c), region = 52 }
  0xd4   : > { %4347 = dma.done.wait (%p5149_p4), [#allocation4], 12288   ;;  %p5150_p5 = pmov %p5149_p4 }
  0xd5   : > { %p5151_p8 = pmov %p5149_p4 }
  0xd6   : > { %4349 = vsyncadd (%p5150_p5), [#allocation4], 4294955008 }
  0xd7   : > { %4351 = dma.done.wait (%p5151_p8), [#allocation7], 12384   ;;  %p5152_p12 = pmov %p5149_p4 }
  0xd8   : > { %p5153_p3 = pmov %p5149_p4 }
  0xd9   : > { %4353 = vsyncadd (%p5152_p12), [#allocation7], 4294954912 }
  0xda   : > { %4355 = dma.done.wait (%p5153_p3), [#allocation10], 96   ;;  %p5154_p6 = pmov %p5153_p3 }
  0xdb   : > { %s412_s22 = sand.u32 1, %s4521_s16   ;;  %s414_s26 = sand.u32 1, %s4384_s9  }
  0xdc   : > { %4357 = vsyncadd (%p5154_p6), [#allocation10], 4294967200  ;;  %s3287_s27 = sshll.u32 %s414_s26, 10  ;;  %s413_s28 = scalar_lea.sflag [#allocation4], %s412_s22 }
  0xdd   : > { %s4774_s21 = scalar_lea.vmem [#allocation11], %s3287_s27  ;;  %p5155_p7 = scmp.ne.s32.totalorder %s5122_s19, 0 }
  0xdf   : > { %4359 = dma.done.wait (%p5155_p7), %s413_s28, 16512  }
  0xe0   : > { %4361 = vsyncadd (%p5155_p7), %s413_s28, 4294950784  ;;  %s5156_s23 = sld [smem:[#allocation20_spill]]  ;;  %s5157_s12 = sld [smem:[#allocation22_spill]] }
  0xe1   : > { %s4780_s1 = sshll.u32 %s414_s26, 3  ;;  %s5158_s20 = sld [smem:[#allocation29_spill]] }
  0xe2   : > { %s5159_s17 = sld [smem:[#allocation30_spill]]  ;;  %s425_s14 = scalar_lea.vmem [#allocation12], %s4780_s1 }
  0xe3   : > { %s5160_s22 = sld [smem:[#allocation21_spill]] }
  0xe6   : > { %s473_s6 = sand.u32 1, %s5156_s23   ;;  %p476_p9 = scmp.lt.s32.totalorder %s5157_s12, 1 }
  0xe7   : > { %s3289_s16 = sshll.u32 %s473_s6, 5 }
  0xe8   : > { %s5189_s12 = smov (!%p476_p9, %s5157_s12), 1  ;;  %s4798_s24 = scalar_lea.vmem [#allocation13], %s3289_s16 }
  0xe9   : > { %s3632_s18 = sshll.u32 %s5189_s12, 4  ;;  %s3292_s30 = sshll.u32 %s5189_s12, 1 }
  0xea   : > { %s4790_s3 = scalar_lea.vmem %s5158_s20, %s3632_s18  ;;  %s4795_s8 = scalar_lea.vmem %s5159_s17, %s3292_s30 }
  0xeb   : > { %p3293_p2 = scmp.ne.s32.totalorder %s5160_s22, 0 }
  0xec   : > { %v3790_v0 = vld [vmem:[#allocation3 + $0x4] ss:$8 sps:$4 sm:$0xff] (!%p3293_p2)   ;;  %v3792_v1 = vld [vmem:[#allocation3] ss:$8 sps:$4 sm:$0xff] (!%p3293_p2)   ;;  %v3793_v2 = vld [vmem:[#allocation3 + $0x14] ss:$8 sps:$4 sm:$0xff] (!%p3293_p2)   ;;  %v497_v7 = vlaneseq (!%p3293_p2) }
  0xed   : > { %492 = sbr.rel (%p3293_p2) target bundleno = 1697 (0x6a1), region = 80  ;;  %715 = vmatprep.subr.bf16.mxu0 (!%p3293_p2), %v3790_v0  ;;  %v3795_v3 = vld [vmem:[#allocation3 + $0x10] ss:$8 sps:$4 sm:$0xff] (!%p3293_p2)   ;;  %v3796_v4 = vld [vmem:[#allocation3 + $0x24] ss:$8 sps:$4 sm:$0xff] (!%p3293_p2)  }
  0xee   : > { %716 = vmatpush1.bf16.msra.mxu0 (!%p3293_p2), %v3792_v1  ;;  %v3798_v5 = vld [vmem:[#allocation3 + $0x20] ss:$8 sps:$4 sm:$0xff] (!%p3293_p2)   ;;  %v3799_v6 = vld [vmem:[#allocation3 + $0x34] ss:$8 sps:$4 sm:$0xff] (!%p3293_p2)   ;;  %v3801_v8 = vld [vmem:[#allocation3 + $0x30] ss:$8 sps:$4 sm:$0xff] (!%p3293_p2)  }
  0xef   : > { %717 = vmatprep.subr.bf16.mxu0 (!%p3293_p2), %v3793_v2  ;;  %v3802_v9 = vld [vmem:[#allocation3 + $0x44] ss:$8 sps:$4 sm:$0xff] (!%p3293_p2)   ;;  %v4801_v10 = vshrl.u32 (!%p3293_p2), %v497_v7, 7  ;;  %v3804_v11 = vld [vmem:[#allocation3 + $0x40] ss:$8 sps:$4 sm:$0xff] (!%p3293_p2)   ;;  %v494_v16 = vld [vmem:[%s4790_s3 + $0x8] sm:$0xff] (!%p3293_p2) }
  0xf0   : > { %v3805_v12 = vld [vmem:[#allocation3 + $0x54] ss:$8 sps:$4 sm:$0xff] (!%p3293_p2)   ;;  %v3807_v14 = vld [vmem:[#allocation3 + $0x50] ss:$8 sps:$4 sm:$0xff] (!%p3293_p2)   ;;  %v3808_v15 = vld [vmem:[#allocation3 + $0x64] ss:$8 sps:$4 sm:$0xff] (!%p3293_p2)  }
  0xf1   : > { %v4804_v13 = vsub.s32 (!%p3293_p2), 1, %v4801_v10  ;;  %v4808_v17 = vld [vmem:[%s4795_s8] sm:$0x3] (!%p3293_p2)  ;;  %v3810_v18 = vld [vmem:[#allocation3 + $0x60] ss:$8 sps:$4 sm:$0xff] (!%p3293_p2)   ;;  %v4817_v52 = vsub.s32 (!%p3293_p2), 0, %v4801_v10 }
  0xf2   : > { %718 = vmatpush1.bf16.msra.mxu0 (!%p3293_p2), %v3795_v3  ;;  %v3838_v20 = vld [vmem:[#allocation8 + $0x4] ss:$8 sps:$4 sm:$0xff] (!%p3293_p2)   ;;  %v3840_v21 = vld [vmem:[#allocation8] ss:$8 sps:$4 sm:$0xff] (!%p3293_p2)   ;;  %v3841_v24 = vld [vmem:[#allocation8 + $0x14] ss:$8 sps:$4 sm:$0xff] (!%p3293_p2)  }
  0xf3   : > { %719 = vmatprep.subr.bf16.mxu0 (!%p3293_p2), %v3796_v4  ;;  %v504_v19 = vrot.slane (!%p3293_p2), %v4808_v17, %v4804_v13  ;;  %v3811_v22 = vld [vmem:[#allocation3 + $0x74] ss:$8 sps:$4 sm:$0xff] (!%p3293_p2)   ;;  %964 = vmatprep.subr.bf16.mxu1 (!%p3293_p2), %v3838_v20  ;;  %v3813_v27 = vld [vmem:[#allocation3 + $0x70] ss:$8 sps:$4 sm:$0xff] (!%p3293_p2)   ;;  %v3814_v29 = vld [vmem:[#allocation3 + $0x84] ss:$8 sps:$4 sm:$0xff] (!%p3293_p2)   ;;  %v500_v56 = vrot.slane (!%p3293_p2), %v4808_v17, %v4817_v52 }
  0xf4   : > { %965 = vmatpush1.bf16.msra.mxu1 %v3840_v21  ;;  %v3843_v26 = vld [vmem:[#allocation8 + $0x10] ss:$8 sps:$4 sm:$0xff]   ;;  %v3844_v28 = vld [vmem:[#allocation8 + $0x24] ss:$8 sps:$4 sm:$0xff]   ;;  %v3846_v30 = vld [vmem:[#allocation8 + $0x20] ss:$8 sps:$4 sm:$0xff]  }
  0xf5   : > { %v4812_v23 = vadd.f32 %v504_v19, %v494_v16  ;;  %966 = vmatprep.subr.bf16.mxu1 %v3841_v24  ;;  %v3816_v31 = vld [vmem:[#allocation3 + $0x80] ss:$8 sps:$4 sm:$0xff]   ;;  %v3817_v33 = vld [vmem:[#allocation3 + $0x94] ss:$8 sps:$4 sm:$0xff]   ;;  %v3819_v35 = vld [vmem:[#allocation3 + $0x90] ss:$8 sps:$4 sm:$0xff]  }
  0xf6   : > { %720 = vmatpush1.bf16.msra.mxu0 %v3798_v5  ;;  %v3847_v32 = vld [vmem:[#allocation8 + $0x34] ss:$8 sps:$4 sm:$0xff]   ;;  %v3849_v34 = vld [vmem:[#allocation8 + $0x30] ss:$8 sps:$4 sm:$0xff]   ;;  %v3850_v36 = vld [vmem:[#allocation8 + $0x44] ss:$8 sps:$4 sm:$0xff]  }
  0xf7   : > { %721 = vmatprep.subr.bf16.mxu0 %v3799_v6  ;;  %v510_v25 = vpack.c.bf16 %v4812_v23, %v4812_v23  ;;  %v3820_v37 = vld [vmem:[#allocation3 + $0xa4] ss:$8 sps:$4 sm:$0xff]   ;;  %v3822_v39 = vld [vmem:[#allocation3 + $0xa0] ss:$8 sps:$4 sm:$0xff]   ;;  %v3823_v41 = vld [vmem:[#allocation3 + $0xb4] ss:$8 sps:$4 sm:$0xff]  }
  0xf8   : > { %967 = vmatpush1.bf16.msra.mxu1 %v3843_v26  ;;  %v3852_v38 = vld [vmem:[#allocation8 + $0x40] ss:$8 sps:$4 sm:$0xff]   ;;  %v3853_v40 = vld [vmem:[#allocation8 + $0x54] ss:$8 sps:$4 sm:$0xff]   ;;  %v3855_v42 = vld [vmem:[#allocation8 + $0x50] ss:$8 sps:$4 sm:$0xff]  }
  0xf9   : > { %747 = vmatprep.mubr.bf16.mxu0 %v510_v25  ;;  %968 = vmatprep.subr.bf16.mxu1 %v3844_v28  ;;  %v3825_v43 = vld [vmem:[#allocation3 + $0xb0] ss:$8 sps:$4 sm:$0xff]   ;;  %v3826_v45 = vld [vmem:[#allocation3 + $0xc4] ss:$8 sps:$4 sm:$0xff]   ;;  %v3828_v47 = vld [vmem:[#allocation3 + $0xc0] ss:$8 sps:$4 sm:$0xff]  }
  0xfa   : > { %722 = vmatpush1.bf16.msra.mxu0 %v3801_v8  ;;  %v3856_v44 = vld [vmem:[#allocation8 + $0x64] ss:$8 sps:$4 sm:$0xff]   ;;  %v3858_v46 = vld [vmem:[#allocation8 + $0x60] ss:$8 sps:$4 sm:$0xff]   ;;  %v3859_v48 = vld [vmem:[#allocation8 + $0x74] ss:$8 sps:$4 sm:$0xff]  }
  0xfb   : > { %723 = vmatprep.subr.bf16.mxu0 %v3802_v9  ;;  %v3829_v49 = vld [vmem:[#allocation3 + $0xd4] ss:$8 sps:$4 sm:$0xff]   ;;  %v3831_v50 = vld [vmem:[#allocation3 + $0xd0] ss:$8 sps:$4 sm:$0xff]   ;;  %v3832_v51 = vld [vmem:[#allocation3 + $0xe4] ss:$8 sps:$4 sm:$0xff]  }
  0xfc   : > { %969 = vmatpush1.bf16.msra.mxu1 %v3846_v30  ;;  %v3834_v53 = vld [vmem:[#allocation3 + $0xe0] ss:$8 sps:$4 sm:$0xff]   ;;  %v493_v54 = vld [vmem:[%s4790_s3] sm:$0xff] }
  0xfd   : > { %970 = vmatprep.subr.bf16.mxu1 %v3847_v32  ;;  %v3835_v55 = vld [vmem:[#allocation3 + $0xf4] ss:$8 sps:$4 sm:$0xff]   ;;  %v3837_v57 = vld [vmem:[#allocation3 + $0xf0] ss:$8 sps:$4 sm:$0xff]   ;;  %v4822_v58 = vadd.f32 %v500_v56, %v493_v54  ;;  %v3892_v19 = vld [vmem:[#allocation3 + $0x120] ss:$8 sps:$4 sm:$0xff]  }
  0xfe   : > { %724 = vmatpush1.bf16.msra.mxu0 %v3804_v11  ;;  %v3861_v60 = vld [vmem:[#allocation8 + $0x70] ss:$8 sps:$4 sm:$0xff]   ;;  %v3862_v61 = vld [vmem:[#allocation8 + $0x84] ss:$8 sps:$4 sm:$0xff]   ;;  %v3864_v62 = vld [vmem:[#allocation8 + $0x80] ss:$8 sps:$4 sm:$0xff]  }
  0xff   : > { %725 = vmatprep.subr.bf16.mxu0 %v3805_v12  ;;  %v509_v59 = vpack.c.bf16 %v4822_v58, %v4822_v58  ;;  %v3865_v63 = vld [vmem:[#allocation8 + $0x94] ss:$8 sps:$4 sm:$0xff]   ;;  %v3867_v0 = vld [vmem:[#allocation8 + $0x90] ss:$8 sps:$4 sm:$0xff]   ;;  %v3868_v1 = vld [vmem:[#allocation8 + $0xa4] ss:$8 sps:$4 sm:$0xff]  }
 0x100   : > { %971 = vmatpush1.bf16.msra.mxu1 %v3849_v34  ;;  %v3870_v2 = vld [vmem:[#allocation8 + $0xa0] ss:$8 sps:$4 sm:$0xff]   ;;  %v3871_v3 = vld [vmem:[#allocation8 + $0xb4] ss:$8 sps:$4 sm:$0xff]   ;;  %v3873_v4 = vld [vmem:[#allocation8 + $0xb0] ss:$8 sps:$4 sm:$0xff]  }
 0x101   : > { %972 = vmatprep.subr.bf16.mxu1 %v3850_v36  ;;  %v3874_v5 = vld [vmem:[#allocation8 + $0xc4] ss:$8 sps:$4 sm:$0xff]   ;;  %v3876_v6 = vld [vmem:[#allocation8 + $0xc0] ss:$8 sps:$4 sm:$0xff]   ;;  %v3877_v7 = vld [vmem:[#allocation8 + $0xd4] ss:$8 sps:$4 sm:$0xff]  }
 0x102   : > { %726 = vmatpush1.bf16.msra.mxu0 %v3807_v14  ;;  %v3879_v8 = vld [vmem:[#allocation8 + $0xd0] ss:$8 sps:$4 sm:$0xff]   ;;  %v3880_v9 = vld [vmem:[#allocation8 + $0xe4] ss:$8 sps:$4 sm:$0xff]   ;;  %v3882_v10 = vld [vmem:[#allocation8 + $0xe0] ss:$8 sps:$4 sm:$0xff]  }
 0x103   : > { %727 = vmatprep.subr.bf16.mxu0 %v3808_v15  ;;  %v3883_v11 = vld [vmem:[#allocation8 + $0xf4] ss:$8 sps:$4 sm:$0xff]   ;;  %v3885_v12 = vld [vmem:[#allocation8 + $0xf0] ss:$8 sps:$4 sm:$0xff]  }
 0x104   : > { %973 = vmatpush1.bf16.msra.mxu1 %v3852_v38  ;;  %v3886_v14 = vld [vmem:[#allocation3 + $0x100] ss:$8 sps:$4 sm:$0xff]   ;;  %v3888_v15 = vld [vmem:[#allocation3 + $0x104] ss:$8 sps:$4 sm:$0xff]   ;;  %v3891_v16 = vld [vmem:[#allocation3 + $0x114] ss:$8 sps:$4 sm:$0xff]  }
 0x105   : > { %974 = vmatprep.subr.bf16.mxu1 %v3853_v40  ;;  %v3889_v17 = vld [vmem:[#allocation3 + $0x110] ss:$8 sps:$4 sm:$0xff]   ;;  %v3897_v20 = vld [vmem:[#allocation3 + $0x134] ss:$8 sps:$4 sm:$0xff]   ;;  %v3898_v24 = vld [vmem:[#allocation3 + $0x140] ss:$8 sps:$4 sm:$0xff]  }
 0x106   : > { %728 = vmatpush1.bf16.msra.mxu0 %v3810_v18  ;;  %v3894_v18 = vld [vmem:[#allocation3 + $0x124] ss:$8 sps:$4 sm:$0xff]   ;;  %v3895_v21 = vld [vmem:[#allocation3 + $0x130] ss:$8 sps:$4 sm:$0xff]   ;;  %v3903_v25 = vld [vmem:[#allocation3 + $0x154] ss:$8 sps:$4 sm:$0xff]  }
 0x107   : > { %729 = vmatprep.subr.bf16.mxu0 %v3811_v22  ;;  %v3900_v22 = vld [vmem:[#allocation3 + $0x144] ss:$8 sps:$4 sm:$0xff]   ;;  %v3901_v26 = vld [vmem:[#allocation3 + $0x150] ss:$8 sps:$4 sm:$0xff]   ;;  %v3904_v28 = vld [vmem:[#allocation3 + $0x160] ss:$8 sps:$4 sm:$0xff]  }
 0x108   : > { %975 = vmatpush1.bf16.msra.mxu1 %v3855_v42  ;;  %v3907_v30 = vld [vmem:[#allocation3 + $0x170] ss:$8 sps:$4 sm:$0xff]   ;;  %v3910_v32 = vld [vmem:[#allocation3 + $0x180] ss:$8 sps:$4 sm:$0xff]  }
 0x109   : > { %976 = vmatprep.subr.bf16.mxu1 %v3856_v44  ;;  %v3913_v34 = vld [vmem:[#allocation3 + $0x190] ss:$8 sps:$4 sm:$0xff]   ;;  %v3916_v36 = vld [vmem:[#allocation3 + $0x1a0] ss:$8 sps:$4 sm:$0xff]  }
 0x10a   : > { %730 = vmatpush1.bf16.msra.mxu0 %v3813_v27  ;;  %v3906_v27 = vld [vmem:[#allocation3 + $0x164] ss:$8 sps:$4 sm:$0xff]   ;;  %v3919_v38 = vld [vmem:[#allocation3 + $0x1b0] ss:$8 sps:$4 sm:$0xff]   ;;  %v3922_v40 = vld [vmem:[#allocation3 + $0x1c0] ss:$8 sps:$4 sm:$0xff]  }
 0x10b   : > { %731 = vmatprep.subr.bf16.mxu0 %v3814_v29  ;;  %v3909_v29 = vld [vmem:[#allocation3 + $0x174] ss:$8 sps:$4 sm:$0xff]   ;;  %v3925_v42 = vld [vmem:[#allocation3 + $0x1d0] ss:$8 sps:$4 sm:$0xff]  }
 0x10c   : > { %977 = vmatpush1.bf16.msra.mxu1 %v3858_v46 }
 0x10d   : > { %978 = vmatprep.subr.bf16.mxu1 %v3859_v48 }
 0x10e   : > { %732 = vmatpush1.bf16.msra.mxu0 %v3816_v31  ;;  %v3912_v31 = vld [vmem:[#allocation3 + $0x184] ss:$8 sps:$4 sm:$0xff]  }
 0x10f   : > { %733 = vmatprep.subr.bf16.mxu0 %v3817_v33  ;;  %v3915_v33 = vld [vmem:[#allocation3 + $0x194] ss:$8 sps:$4 sm:$0xff]  }
 0x110   : > { %979 = vmatpush1.bf16.msra.mxu1 %v3861_v60 }
 0x111   : > { %980 = vmatprep.subr.bf16.mxu1 %v3862_v61 }
 0x112   : > { %734 = vmatpush1.bf16.msra.mxu0 %v3819_v35  ;;  %v3918_v35 = vld [vmem:[#allocation3 + $0x1a4] ss:$8 sps:$4 sm:$0xff]  }
 0x113   : > { %735 = vmatprep.subr.bf16.mxu0 %v3820_v37  ;;  %v3921_v37 = vld [vmem:[#allocation3 + $0x1b4] ss:$8 sps:$4 sm:$0xff]  }
 0x114   : > { %981 = vmatpush1.bf16.msra.mxu1 %v3864_v62 }
 0x115   : > { %982 = vmatprep.subr.bf16.mxu1 %v3865_v63 }
 0x116   : > { %736 = vmatpush1.bf16.msra.mxu0 %v3822_v39  ;;  %v3924_v39 = vld [vmem:[#allocation3 + $0x1c4] ss:$8 sps:$4 sm:$0xff]  }
 0x117   : > { %737 = vmatprep.subr.bf16.mxu0 %v3823_v41  ;;  %v3927_v41 = vld [vmem:[#allocation3 + $0x1d4] ss:$8 sps:$4 sm:$0xff]  }
 0x118   : > { %983 = vmatpush1.bf16.msra.mxu1 %v3867_v0 }
 0x119   : > { %984 = vmatprep.subr.bf16.mxu1 %v3868_v1 }
 0x11a   : > { %738 = vmatpush1.bf16.msra.mxu0 %v3825_v43  ;;  %v543_v43 = vld [vmem:[#allocation6] sm:$0x3] }
 0x11b   : > { %739 = vmatprep.subr.bf16.mxu0 %v3826_v45  ;;  %v548_v44 = vrot.slane %v543_v43, %v4817_v52  ;;  %v552_v45 = vrot.slane %v543_v43, %v4804_v13  ;;  %v3972_v43 = vld [vmem:[#allocation8 + $0x1c4] ss:$8 sps:$4 sm:$0xff]  }
 0x11c   : > { %985 = vmatpush1.bf16.msra.mxu1 %v3870_v2  ;;  %v3930_v2 = vld [vmem:[#allocation3 + $0x1e4] ss:$8 sps:$4 sm:$0xff]  }
 0x11d   : > { %986 = vmatprep.subr.bf16.mxu1 %v3871_v3  ;;  %v3928_v3 = vld [vmem:[#allocation3 + $0x1e0] ss:$8 sps:$4 sm:$0xff]  }
 0x11e   : > { %740 = vmatpush1.bf16.msra.mxu0 %v3828_v47 }
 0x11f   : > { %741 = vmatprep.subr.bf16.mxu0 %v3829_v49 }
 0x120   : > { %987 = vmatpush1.bf16.msra.mxu1 %v3873_v4  ;;  %v3933_v4 = vld [vmem:[#allocation3 + $0x1f4] ss:$8 sps:$4 sm:$0xff]  }
 0x121   : > { %988 = vmatprep.subr.bf16.mxu1 %v3874_v5  ;;  %v3931_v5 = vld [vmem:[#allocation3 + $0x1f0] ss:$8 sps:$4 sm:$0xff]  }
 0x122   : > { %742 = vmatpush1.bf16.msra.mxu0 %v3831_v50 }
 0x123   : > { %743 = vmatprep.subr.bf16.mxu0 %v3832_v51 }
 0x124   : > { %989 = vmatpush1.bf16.msra.mxu1 %v3876_v6  ;;  %v3934_v6 = vld [vmem:[#allocation8 + $0x100] ss:$8 sps:$4 sm:$0xff]  }
 0x125   : > { %990 = vmatprep.subr.bf16.mxu1 %v3877_v7  ;;  %v3936_v7 = vld [vmem:[#allocation8 + $0x104] ss:$8 sps:$4 sm:$0xff]  }
 0x126   : > { %744 = vmatpush1.bf16.msra.mxu0 %v3834_v53 }
 0x127   : > { %745 = vmatprep.subr.bf16.mxu0 %v3835_v55 }
 0x128   : > { %991 = vmatpush1.bf16.msra.mxu1 %v3879_v8  ;;  %v3939_v8 = vld [vmem:[#allocation8 + $0x114] ss:$8 sps:$4 sm:$0xff]  }
 0x129   : > { %992 = vmatprep.subr.bf16.mxu1 %v3880_v9  ;;  %v3937_v9 = vld [vmem:[#allocation8 + $0x110] ss:$8 sps:$4 sm:$0xff]  }
 0x12a   : > { %746 = vmatpush1.bf16.msra.mxu0 %v3837_v57 }
 0x12b   : > { %1229 = vmatprep.subr.bf16.mxu0 %v3888_v15  ;;  %v3948_v15 = vld [vmem:[#allocation8 + $0x144] ss:$8 sps:$4 sm:$0xff]  }
 0x12c   : > { %993 = vmatpush1.bf16.msra.mxu1 %v3882_v10  ;;  %v3942_v10 = vld [vmem:[#allocation8 + $0x124] ss:$8 sps:$4 sm:$0xff]  }
 0x12d   : > { %748 = vmatmul.mubr.bf16.vlgmr.msra.gmra.mrb[0].mxu0 %v509_v59  ;;  %994 = vmatprep.subr.bf16.mxu1 %v3883_v11  ;;  %v3940_v11 = vld [vmem:[#allocation8 + $0x120] ss:$8 sps:$4 sm:$0xff]  }
 0x12e   : > { %1230 = vmatpush1.bf16.msra.mxu0 %v3886_v14  ;;  %v3943_v14 = vld [vmem:[#allocation8 + $0x130] ss:$8 sps:$4 sm:$0xff]  }
 0x12f   : > { %1231 = vmatprep.subr.bf16.mxu0 %v3891_v16  ;;  %v3946_v16 = vld [vmem:[#allocation8 + $0x140] ss:$8 sps:$4 sm:$0xff]  }
 0x130   : > { %995 = vmatpush1.bf16.msra.mxu1 %v3885_v12  ;;  %v3945_v12 = vld [vmem:[#allocation8 + $0x134] ss:$8 sps:$4 sm:$0xff]  }
 0x131   : > { %1479 = vmatprep.subr.bf16.mxu1 %v3936_v7  ;;  %v4011_v7 = vld [vmem:[#allocation3 + $0x294] ss:$8 sps:$4 sm:$0xff]  }
 0x132   : > { %1232 = vmatpush1.bf16.msra.mxu0 %v3889_v17  ;;  %v3951_v17 = vld [vmem:[#allocation8 + $0x154] ss:$8 sps:$4 sm:$0xff]  }
 0x133   : > { %1233 = vmatprep.subr.bf16.mxu0 %v3894_v18  ;;  %v3949_v18 = vld [vmem:[#allocation8 + $0x150] ss:$8 sps:$4 sm:$0xff]  }
 0x136   : > { %1234 = vmatpush1.bf16.msra.mxu0 %v3892_v19  ;;  %v3954_v19 = vld [vmem:[#allocation8 + $0x164] ss:$8 sps:$4 sm:$0xff]  }
 0x137   : > { %1235 = vmatprep.subr.bf16.mxu0 %v3897_v20  ;;  %v3952_v20 = vld [vmem:[#allocation8 + $0x160] ss:$8 sps:$4 sm:$0xff]  }
 0x13a   : > { %1236 = vmatpush1.bf16.msra.mxu0 %v3895_v21  ;;  %v3957_v21 = vld [vmem:[#allocation8 + $0x174] ss:$8 sps:$4 sm:$0xff]  }
 0x13b   : > { %1237 = vmatprep.subr.bf16.mxu0 %v3900_v22  ;;  %v3955_v22 = vld [vmem:[#allocation8 + $0x170] ss:$8 sps:$4 sm:$0xff]  }
 0x13e   : > { %1238 = vmatpush1.bf16.msra.mxu0 %v3898_v24  ;;  %v1007_v24 = vld [vmem:[#allocation9] sm:$0x3] }
 0x13f   : > { %1239 = vmatprep.subr.bf16.mxu0 %v3903_v25  ;;  %v1012_v25 = vrot.slane %v1007_v24, %v4817_v52 }
 0x142   : > { %1240 = vmatpush1.bf16.msra.mxu0 %v3901_v26 }
 0x143   : > { %1241 = vmatprep.subr.bf16.mxu0 %v3906_v27  ;;  %v1016_v27 = vrot.slane %v1007_v24, %v4804_v13 }
 0x146   : > { %1242 = vmatpush1.bf16.msra.mxu0 %v3904_v28 }
 0x147   : > { %1243 = vmatprep.subr.bf16.mxu0 %v3909_v29 }
 0x14a   : > { %1244 = vmatpush1.bf16.msra.mxu0 %v3907_v30 }
 0x14b   : > { %1245 = vmatprep.subr.bf16.mxu0 %v3912_v31 }
 0x14e   : > { %1246 = vmatpush1.bf16.msra.mxu0 %v3910_v32 }
 0x14f   : > { %1247 = vmatprep.subr.bf16.mxu0 %v3915_v33 }
 0x152   : > { %1248 = vmatpush1.bf16.msra.mxu0 %v3913_v34 }
 0x153   : > { %1249 = vmatprep.subr.bf16.mxu0 %v3918_v35 }
 0x156   : > { %1250 = vmatpush1.bf16.msra.mxu0 %v3916_v36 }
 0x157   : > { %1251 = vmatprep.subr.bf16.mxu0 %v3921_v37  ;;  %v3960_v37 = vld [vmem:[#allocation8 + $0x184] ss:$8 sps:$4 sm:$0xff]  }
 0x15a   : > { %1252 = vmatpush1.bf16.msra.mxu0 %v3919_v38  ;;  %v3958_v38 = vld [vmem:[#allocation8 + $0x180] ss:$8 sps:$4 sm:$0xff]  }
 0x15b   : > { %1253 = vmatprep.subr.bf16.mxu0 %v3924_v39  ;;  %v3966_v39 = vld [vmem:[#allocation8 + $0x1a4] ss:$8 sps:$4 sm:$0xff]  }
 0x15e   : > { %1254 = vmatpush1.bf16.msra.mxu0 %v3922_v40  ;;  %v3964_v40 = vld [vmem:[#allocation8 + $0x1a0] ss:$8 sps:$4 sm:$0xff]  }
 0x15f   : > { %1255 = vmatprep.subr.bf16.mxu0 %v3927_v41  ;;  %v3969_v41 = vld [vmem:[#allocation8 + $0x1b4] ss:$8 sps:$4 sm:$0xff]  }
 0x162   : > { %1256 = vmatpush1.bf16.msra.mxu0 %v3925_v42  ;;  %v3967_v42 = vld [vmem:[#allocation8 + $0x1b0] ss:$8 sps:$4 sm:$0xff]  }
 0x163   : > { %1257 = vmatprep.subr.bf16.mxu0 %v3930_v2  ;;  %v4000_v2 = vld [vmem:[#allocation3 + $0x260] ss:$8 sps:$4 sm:$0xff]  }
 0x166   : > { %1258 = vmatpush1.bf16.msra.mxu0 %v3928_v3  ;;  %v4005_v3 = vld [vmem:[#allocation3 + $0x274] ss:$8 sps:$4 sm:$0xff]  }
 0x167   : > { %1259 = vmatprep.subr.bf16.mxu0 %v3933_v4  ;;  %v4003_v4 = vld [vmem:[#allocation3 + $0x270] ss:$8 sps:$4 sm:$0xff]  }
 0x16a   : > { %1260 = vmatpush1.bf16.msra.mxu0 %v3931_v5  ;;  %v4008_v5 = vld [vmem:[#allocation3 + $0x284] ss:$8 sps:$4 sm:$0xff]  }
 0x200   : > { %v749_v46 = vpop.f32.mrb[0].mxu0 }
 0x201   : > { %v750_v47 = vadd.f32 %v749_v46, %v548_v44  ;;  %v751_v48 = vpop.f32.mrb[1].mxu0  ;;  %v3970_v44 = vld [vmem:[#allocation8 + $0x1c0] ss:$8 sps:$4 sm:$0xff]   ;;  %v3973_v46 = vld [vmem:[#allocation8 + $0x1d0] ss:$8 sps:$4 sm:$0xff]  }
 0x202   : > { %v752_v49 = vadd.f32 %v751_v48, %v552_v45  ;;  %v753_v50 = vpop.f32.mrb[2].mxu0  ;;  %v3975_v45 = vld [vmem:[#allocation8 + $0x1d4] ss:$8 sps:$4 sm:$0xff]   ;;  %v3976_v48 = vld [vmem:[#allocation8 + $0x1e0] ss:$8 sps:$4 sm:$0xff]  }
 0x203   : > { %v3326_v51 = vmul.f32 -1.442695, %v750_v47  ;;  %v754_v53 = vpop.f32.mrb[3].mxu0  ;;  %v3979_v50 = vld [vmem:[#allocation8 + $0x1f0] ss:$8 sps:$4 sm:$0xff]  }
 0x204   : > { %v3327_v54 = vmul.f32 -1.442695, %v752_v49  ;;  %v3984_v53 = vld [vmem:[#allocation3 + $0x204] ss:$8 sps:$4 sm:$0xff]  }
 0x205   : > { %4078 = vpow2.f32 %v3326_v51  ;;  %v3982_v51 = vld [vmem:[#allocation3 + $0x200] ss:$8 sps:$4 sm:$0xff]   ;;  %1745 = vmatprep.subr.bf16.mxu0 %v3984_v53 }
 0x206   : > { %4080 = vpow2.f32 %v3327_v54  ;;  %v3987_v54 = vld [vmem:[#allocation3 + $0x214] ss:$8 sps:$4 sm:$0xff]  }
 0x207   : > { %v4044_v53 = vld [vmem:[#allocation8 + $0x244] ss:$8 sps:$4 sm:$0xff]  }
 0x20f   : > { %v4079_v55 = vpop.eup %4078 }
 0x210   : > { %v4081_v56 = vpop.eup %4080  ;;  %v762_v57 = vadd.f32 1.0, %v4079_v55  ;;  %v3985_v55 = vld [vmem:[#allocation3 + $0x210] ss:$8 sps:$4 sm:$0xff]  }
 0x211   : > { %v763_v59 = vadd.f32 1.0, %v4081_v56  ;;  %v3990_v56 = vld [vmem:[#allocation3 + $0x224] ss:$8 sps:$4 sm:$0xff]  }
 0x212   : > { %4082 = vrcp.f32 %v762_v57  ;;  %v3988_v57 = vld [vmem:[#allocation3 + $0x220] ss:$8 sps:$4 sm:$0xff]  }
 0x213   : > { %4084 = vrcp.f32 %v763_v59  ;;  %v3993_v59 = vld [vmem:[#allocation3 + $0x234] ss:$8 sps:$4 sm:$0xff]  }
 0x21c   : > { %v4083_v60 = vpop.eup %4082 }
 0x21d   : > { %v4085_v61 = vpop.eup %4084  ;;  %v768_v62 = vmul.f32 %v4083_v60, %v750_v47  ;;  %v3978_v47 = vld [vmem:[#allocation8 + $0x1e4] ss:$8 sps:$4 sm:$0xff]  }
 0x21e   : > { %v769_v63 = vmul.f32 %v4085_v61, %v752_v49  ;;  %v3981_v49 = vld [vmem:[#allocation8 + $0x1f4] ss:$8 sps:$4 sm:$0xff]  }
 0x21f   : > { %v770_v1 = vpack.c.bf16 %v768_v62, %v768_v62  ;;  %v3991_v60 = vld [vmem:[#allocation3 + $0x230] ss:$8 sps:$4 sm:$0xff]   ;;  %v3996_v61 = vld [vmem:[#allocation3 + $0x244] ss:$8 sps:$4 sm:$0xff]   ;;  %v3994_v62 = vld [vmem:[#allocation3 + $0x240] ss:$8 sps:$4 sm:$0xff]  }
 0x220   : > { %v771_v0 = vpack.c.bf16 %v769_v63, %v769_v63  ;;  %v3999_v63 = vld [vmem:[#allocation3 + $0x254] ss:$8 sps:$4 sm:$0xff]  }
 0x222   : > { %996 = vmatprep.mubr.bf16.mxu1 %v771_v0  ;;  %v3997_v0 = vld [vmem:[#allocation3 + $0x250] ss:$8 sps:$4 sm:$0xff]  }
 0x223   : > { %997 = vmatmul.mubr.bf16.vlgmr.msra.gmra.mrb[0].mxu1 %v770_v1  ;;  %v4002_v1 = vld [vmem:[#allocation3 + $0x264] ss:$8 sps:$4 sm:$0xff]  }
 0x224   : > { %1480 = vmatpush1.bf16.msra.mxu1 %v3934_v6  ;;  %v4006_v6 = vld [vmem:[#allocation3 + $0x280] ss:$8 sps:$4 sm:$0xff]  }
 0x225   : > { %1481 = vmatprep.subr.bf16.mxu1 %v3939_v8  ;;  %v4009_v8 = vld [vmem:[#allocation3 + $0x290] ss:$8 sps:$4 sm:$0xff]  }
 0x228   : > { %1482 = vmatpush1.bf16.msra.mxu1 %v3937_v9  ;;  %v4014_v9 = vld [vmem:[#allocation3 + $0x2a4] ss:$8 sps:$4 sm:$0xff]  }
 0x229   : > { %1483 = vmatprep.subr.bf16.mxu1 %v3942_v10  ;;  %v4012_v10 = vld [vmem:[#allocation3 + $0x2a0] ss:$8 sps:$4 sm:$0xff]  }
 0x22c   : > { %1484 = vmatpush1.bf16.msra.mxu1 %v3940_v11  ;;  %v4017_v11 = vld [vmem:[#allocation3 + $0x2b4] ss:$8 sps:$4 sm:$0xff]  }
 0x22d   : > { %1485 = vmatprep.subr.bf16.mxu1 %v3945_v12  ;;  %v4015_v12 = vld [vmem:[#allocation3 + $0x2b0] ss:$8 sps:$4 sm:$0xff]  }
 0x230   : > { %1486 = vmatpush1.bf16.msra.mxu1 %v3943_v14  ;;  %v4020_v14 = vld [vmem:[#allocation3 + $0x2c4] ss:$8 sps:$4 sm:$0xff]  }
 0x231   : > { %1487 = vmatprep.subr.bf16.mxu1 %v3948_v15  ;;  %v4018_v15 = vld [vmem:[#allocation3 + $0x2c0] ss:$8 sps:$4 sm:$0xff]  }
 0x234   : > { %1488 = vmatpush1.bf16.msra.mxu1 %v3946_v16  ;;  %v4023_v16 = vld [vmem:[#allocation3 + $0x2d4] ss:$8 sps:$4 sm:$0xff]  }
 0x235   : > { %1489 = vmatprep.subr.bf16.mxu1 %v3951_v17  ;;  %v4021_v17 = vld [vmem:[#allocation3 + $0x2d0] ss:$8 sps:$4 sm:$0xff]  }
 0x238   : > { %1490 = vmatpush1.bf16.msra.mxu1 %v3949_v18  ;;  %v1057_v18 = vld [vmem:[#allocation6 + $0x2] sm:$0x3] }
 0x239   : > { %1491 = vmatprep.subr.bf16.mxu1 %v3954_v19  ;;  %v1062_v19 = vrot.slane %v1057_v18, %v4817_v52 }
 0x23c   : > { %1492 = vmatpush1.bf16.msra.mxu1 %v3952_v20  ;;  %v1066_v20 = vrot.slane %v1057_v18, %v4804_v13  ;;  %v4068_v18 = vld [vmem:[#allocation8 + $0x2c4] ss:$8 sps:$4 sm:$0xff]  }
 0x23d   : > { %1493 = vmatprep.subr.bf16.mxu1 %v3957_v21 }
 0x240   : > { %1494 = vmatpush1.bf16.msra.mxu1 %v3955_v22 }
 0x241   : > { %1495 = vmatprep.subr.bf16.mxu1 %v3960_v37 }
 0x244   : > { %1496 = vmatpush1.bf16.msra.mxu1 %v3958_v38 }
 0x2f6   : > { %v998_v26 = vpop.f32.mrb[0].mxu1 }
 0x2f7   : > { %v1005_v28 = vadd.f32 %v998_v26, %v4822_v58  ;;  %v1000_v29 = vpop.f32.mrb[1].mxu1  ;;  %v3963_v58 = vld [vmem:[#allocation8 + $0x194] ss:$8 sps:$4 sm:$0xff]  }
 0x2f8   : > { %v1006_v30 = vadd.f32 %v1000_v29, %v4812_v23  ;;  %v1002_v31 = vpop.f32.mrb[2].mxu1  ;;  %v3961_v23 = vld [vmem:[#allocation8 + $0x190] ss:$8 sps:$4 sm:$0xff]   ;;  %1497 = vmatprep.subr.bf16.mxu1 %v3963_v58 }
 0x2f9   : > { %v4832_v32 = vadd.f32 %v1012_v25, %v1005_v28  ;;  %v1003_v33 = vpop.f32.mrb[3].mxu1  ;;  %1498 = vmatpush1.bf16.msra.mxu1 %v3961_v23 }
 0x2fa   : > { %v4834_v34 = vadd.f32 %v1016_v27, %v1006_v30  ;;  %1499 = vmatprep.subr.bf16.mxu1 %v3966_v39 }
 0x2fb   : > { %v1021_v36 = vpack.c.bf16 %v4832_v32, %v4832_v32 }
 0x2fc   : > { %v1022_v35 = vpack.c.bf16 %v4834_v34, %v4834_v34 }
 0x2fd   : > { %1500 = vmatpush1.bf16.msra.mxu1 %v3964_v40  ;;  %v4026_v40 = vld [vmem:[#allocation3 + $0x2e4] ss:$8 sps:$4 sm:$0xff]  }
 0x2fe   : > { %1261 = vmatprep.mubr.bf16.mxu0 %v1022_v35  ;;  %1501 = vmatprep.subr.bf16.mxu1 %v3969_v41  ;;  %v4024_v41 = vld [vmem:[#allocation3 + $0x2e0] ss:$8 sps:$4 sm:$0xff]  }
 0x2ff   : > { %1262 = vmatmul.mubr.bf16.vlgmr.msra.gmra.mrb[4].mxu0 %v1021_v36 }
 0x300   : > { %1746 = vmatpush1.bf16.msra.mxu0 %v3982_v51  ;;  %v4039_v51 = vld [vmem:[#allocation8 + $0x230] ss:$8 sps:$4 sm:$0xff]  }
 0x301   : > { %1502 = vmatpush1.bf16.msra.mxu1 %v3967_v42  ;;  %1747 = vmatprep.subr.bf16.mxu0 %v3987_v54  ;;  %v4029_v42 = vld [vmem:[#allocation3 + $0x2f4] ss:$8 sps:$4 sm:$0xff]   ;;  %v4042_v54 = vld [vmem:[#allocation8 + $0x240] ss:$8 sps:$4 sm:$0xff]  }
 0x302   : > { %1503 = vmatprep.subr.bf16.mxu1 %v3972_v43  ;;  %v4027_v43 = vld [vmem:[#allocation3 + $0x2f0] ss:$8 sps:$4 sm:$0xff]  }
 0x304   : > { %1748 = vmatpush1.bf16.msra.mxu0 %v3985_v55  ;;  %v4047_v55 = vld [vmem:[#allocation8 + $0x254] ss:$8 sps:$4 sm:$0xff]  }
 0x305   : > { %1504 = vmatpush1.bf16.msra.mxu1 %v3970_v44  ;;  %1749 = vmatprep.subr.bf16.mxu0 %v3990_v56  ;;  %v4030_v44 = vld [vmem:[#allocation8 + $0x200] ss:$8 sps:$4 sm:$0xff]   ;;  %v4045_v56 = vld [vmem:[#allocation8 + $0x250] ss:$8 sps:$4 sm:$0xff]  }
 0x306   : > { %1505 = vmatprep.subr.bf16.mxu1 %v3975_v45  ;;  %v4032_v45 = vld [vmem:[#allocation8 + $0x204] ss:$8 sps:$4 sm:$0xff]  }
 0x308   : > { %1750 = vmatpush1.bf16.msra.mxu0 %v3988_v57  ;;  %v4050_v57 = vld [vmem:[#allocation8 + $0x264] ss:$8 sps:$4 sm:$0xff]  }
 0x309   : > { %1506 = vmatpush1.bf16.msra.mxu1 %v3973_v46  ;;  %1751 = vmatprep.subr.bf16.mxu0 %v3993_v59  ;;  %v4035_v46 = vld [vmem:[#allocation8 + $0x214] ss:$8 sps:$4 sm:$0xff]   ;;  %v4048_v59 = vld [vmem:[#allocation8 + $0x260] ss:$8 sps:$4 sm:$0xff]  }
 0x30a   : > { %1507 = vmatprep.subr.bf16.mxu1 %v3978_v47  ;;  %v4033_v47 = vld [vmem:[#allocation8 + $0x210] ss:$8 sps:$4 sm:$0xff]  }
 0x30c   : > { %1752 = vmatpush1.bf16.msra.mxu0 %v3991_v60  ;;  %v4053_v60 = vld [vmem:[#allocation8 + $0x274] ss:$8 sps:$4 sm:$0xff]  }
 0x30d   : > { %1508 = vmatpush1.bf16.msra.mxu1 %v3976_v48  ;;  %1753 = vmatprep.subr.bf16.mxu0 %v3996_v61  ;;  %v4038_v48 = vld [vmem:[#allocation8 + $0x224] ss:$8 sps:$4 sm:$0xff]   ;;  %v4051_v61 = vld [vmem:[#allocation8 + $0x270] ss:$8 sps:$4 sm:$0xff]  }
 0x30e   : > { %1509 = vmatprep.subr.bf16.mxu1 %v3981_v49  ;;  %v4036_v49 = vld [vmem:[#allocation8 + $0x220] ss:$8 sps:$4 sm:$0xff]  }
 0x310   : > { %1754 = vmatpush1.bf16.msra.mxu0 %v3994_v62  ;;  %v1523_v62 = vld [vmem:[#allocation9 + $0x2] sm:$0x3] }
 0x311   : > { %1510 = vmatpush1.bf16.msra.mxu1 %v3979_v50  ;;  %1755 = vmatprep.subr.bf16.mxu0 %v3999_v63  ;;  %v4041_v50 = vld [vmem:[#allocation8 + $0x234] ss:$8 sps:$4 sm:$0xff]   ;;  %v1528_v63 = vrot.slane %v1523_v62, %v4817_v52 }
 0x312   : > { %1995 = vmatprep.subr.bf16.mxu1 %v4032_v45 }
 0x314   : > { %1756 = vmatpush1.bf16.msra.mxu0 %v3997_v0 }
 0x315   : > { %1757 = vmatprep.subr.bf16.mxu0 %v4002_v1  ;;  %v1532_v1 = vrot.slane %v1523_v62, %v4804_v13 }
 0x318   : > { %1758 = vmatpush1.bf16.msra.mxu0 %v4000_v2 }
 0x319   : > { %1759 = vmatprep.subr.bf16.mxu0 %v4005_v3 }
 0x31c   : > { %1760 = vmatpush1.bf16.msra.mxu0 %v4003_v4 }
 0x31d   : > { %1761 = vmatprep.subr.bf16.mxu0 %v4008_v5 }
 0x320   : > { %1762 = vmatpush1.bf16.msra.mxu0 %v4006_v6 }
 0x321   : > { %1763 = vmatprep.subr.bf16.mxu0 %v4011_v7 }
 0x324   : > { %1764 = vmatpush1.bf16.msra.mxu0 %v4009_v8 }
 0x325   : > { %1765 = vmatprep.subr.bf16.mxu0 %v4014_v9 }
 0x328   : > { %1766 = vmatpush1.bf16.msra.mxu0 %v4012_v10 }
 0x329   : > { %1767 = vmatprep.subr.bf16.mxu0 %v4017_v11  ;;  %v4056_v11 = vld [vmem:[#allocation8 + $0x284] ss:$8 sps:$4 sm:$0xff]  }
 0x32c   : > { %1768 = vmatpush1.bf16.msra.mxu0 %v4015_v12  ;;  %v4054_v12 = vld [vmem:[#allocation8 + $0x280] ss:$8 sps:$4 sm:$0xff]  }
 0x32d   : > { %1769 = vmatprep.subr.bf16.mxu0 %v4020_v14  ;;  %v4062_v14 = vld [vmem:[#allocation8 + $0x2a4] ss:$8 sps:$4 sm:$0xff]  }
 0x330   : > { %1770 = vmatpush1.bf16.msra.mxu0 %v4018_v15  ;;  %v4060_v15 = vld [vmem:[#allocation8 + $0x2a0] ss:$8 sps:$4 sm:$0xff]  }
 0x331   : > { %1771 = vmatprep.subr.bf16.mxu0 %v4023_v16  ;;  %v4065_v16 = vld [vmem:[#allocation8 + $0x2b4] ss:$8 sps:$4 sm:$0xff]  }
 0x334   : > { %1772 = vmatpush1.bf16.msra.mxu0 %v4021_v17  ;;  %v4063_v17 = vld [vmem:[#allocation8 + $0x2b0] ss:$8 sps:$4 sm:$0xff]  }
 0x335   : > { %1773 = vmatprep.subr.bf16.mxu0 %v4026_v40 }
 0x338   : > { %1774 = vmatpush1.bf16.msra.mxu0 %v4024_v41 }
 0x339   : > { %1775 = vmatprep.subr.bf16.mxu0 %v4029_v42 }
 0x33c   : > { %1776 = vmatpush1.bf16.msra.mxu0 %v4027_v43 }
 0x3d2   : > { %v1263_v21 = vpop.f32.mrb[4].mxu0 }
 0x3d3   : > { %v1264_v22 = vadd.f32 %v1263_v21, %v1062_v19  ;;  %v1265_v24 = vpop.f32.mrb[5].mxu0  ;;  %v4066_v19 = vld [vmem:[#allocation8 + $0x2c0] ss:$8 sps:$4 sm:$0xff]   ;;  %v4069_v21 = vld [vmem:[#allocation8 + $0x2d0] ss:$8 sps:$4 sm:$0xff]  }
 0x3d4   : > { %v1266_v25 = vadd.f32 %v1265_v24, %v1066_v20  ;;  %v1267_v26 = vpop.f32.mrb[6].mxu0  ;;  %v4071_v20 = vld [vmem:[#allocation8 + $0x2d4] ss:$8 sps:$4 sm:$0xff]   ;;  %v4072_v24 = vld [vmem:[#allocation8 + $0x2e0] ss:$8 sps:$4 sm:$0xff]  }
 0x3d5   : > { %v3392_v27 = vmul.f32 -1.442695, %v1264_v22  ;;  %v1268_v28 = vpop.f32.mrb[7].mxu0  ;;  %v4075_v26 = vld [vmem:[#allocation8 + $0x2f0] ss:$8 sps:$4 sm:$0xff]  }
 0x3d6   : > { %v3393_v29 = vmul.f32 -1.442695, %v1266_v25 }
 0x3d7   : > { %4086 = vpow2.f32 %v3392_v27  ;;  %v1573_v27 = vld [vmem:[#allocation6 + $0x4] sm:$0x3] }
 0x3d8   : > { %4088 = vpow2.f32 %v3393_v29  ;;  %v1578_v28 = vrot.slane %v1573_v27, %v4817_v52  ;;  %v1582_v29 = vrot.slane %v1573_v27, %v4804_v13 }
 0x3e1   : > { %v4087_v30 = vpop.eup %4086 }
 0x3e2   : > { %v4089_v31 = vpop.eup %4088  ;;  %v1276_v33 = vadd.f32 1.0, %v4087_v30 }
 0x3e3   : > { %v1277_v35 = vadd.f32 1.0, %v4089_v31 }
 0x3e4   : > { %4090 = vrcp.f32 %v1276_v33 }
 0x3e5   : > { %4092 = vrcp.f32 %v1277_v35 }
 0x3ee   : > { %v4091_v36 = vpop.eup %4090 }
 0x3ef   : > { %v4093_v37 = vpop.eup %4092  ;;  %v1282_v38 = vmul.f32 %v4091_v36, %v1264_v22  ;;  %v4074_v22 = vld [vmem:[#allocation8 + $0x2e4] ss:$8 sps:$4 sm:$0xff]  }
 0x3f0   : > { %v1283_v58 = vmul.f32 %v4093_v37, %v1266_v25  ;;  %v4077_v25 = vld [vmem:[#allocation8 + $0x2f4] ss:$8 sps:$4 sm:$0xff]  }
 0x3f1   : > { %v1284_v39 = vpack.c.bf16 %v1282_v38, %v1282_v38 }
 0x3f2   : > { %v1285_v23 = vpack.c.bf16 %v1283_v58, %v1283_v58 }
 0x3f4   : > { %1511 = vmatprep.mubr.bf16.mxu1 %v1285_v23 }
 0x3f5   : > { %1512 = vmatmul.mubr.bf16.vlgmr.msra.gmra.mrb[4].mxu1 %v1284_v39 }
 0x3f6   : > { %1996 = vmatpush1.bf16.msra.mxu1 %v4030_v44 }
 0x3f7   : > { %1997 = vmatprep.subr.bf16.mxu1 %v4035_v46 }
 0x3fa   : > { %1998 = vmatpush1.bf16.msra.mxu1 %v4033_v47 }
 0x3fb   : > { %1999 = vmatprep.subr.bf16.mxu1 %v4038_v48  ;;  %v2039_v48 = vld [vmem:[#allocation9 + $0x4] sm:$0x3] }
 0x3fe   : > { %2000 = vmatpush1.bf16.msra.mxu1 %v4036_v49  ;;  %v2044_v49 = vrot.slane %v2039_v48, %v4817_v52 }
 0x3ff   : > { %2001 = vmatprep.subr.bf16.mxu1 %v4041_v50 }
 0x402   : > { %2002 = vmatpush1.bf16.msra.mxu1 %v4039_v51  ;;  %v2048_v51 = vrot.slane %v2039_v48, %v4804_v13 }
 0x403   : > { %2003 = vmatprep.subr.bf16.mxu1 %v4044_v53 }
 0x406   : > { %2004 = vmatpush1.bf16.msra.mxu1 %v4042_v54 }
 0x407   : > { %2005 = vmatprep.subr.bf16.mxu1 %v4047_v55 }
 0x40a   : > { %2006 = vmatpush1.bf16.msra.mxu1 %v4045_v56 }
 0x40b   : > { %2007 = vmatprep.subr.bf16.mxu1 %v4050_v57 }
 0x40e   : > { %2008 = vmatpush1.bf16.msra.mxu1 %v4048_v59 }
 0x40f   : > { %2009 = vmatprep.subr.bf16.mxu1 %v4053_v60 }
 0x412   : > { %2010 = vmatpush1.bf16.msra.mxu1 %v4051_v61 }
 0x413   : > { %2011 = vmatprep.subr.bf16.mxu1 %v4056_v11 }
 0x416   : > { %2012 = vmatpush1.bf16.msra.mxu1 %v4054_v12 }
 0x4c8   : > { %v1513_v0 = vpop.f32.mrb[4].mxu1 }
 0x4c9   : > { %v1520_v2 = vadd.f32 %v1513_v0, %v4832_v32  ;;  %v1515_v3 = vpop.f32.mrb[5].mxu1  ;;  %v4059_v32 = vld [vmem:[#allocation8 + $0x294] ss:$8 sps:$4 sm:$0xff]  }
 0x4ca   : > { %v1521_v4 = vadd.f32 %v1515_v3, %v4834_v34  ;;  %v1517_v5 = vpop.f32.mrb[6].mxu1  ;;  %v4057_v34 = vld [vmem:[#allocation8 + $0x290] ss:$8 sps:$4 sm:$0xff]   ;;  %2013 = vmatprep.subr.bf16.mxu1 %v4059_v32 }
 0x4cb   : > { %v4846_v6 = vadd.f32 %v1528_v63, %v1520_v2  ;;  %v1518_v7 = vpop.f32.mrb[7].mxu1  ;;  %2014 = vmatpush1.bf16.msra.mxu1 %v4057_v34 }
 0x4cc   : > { %v4848_v8 = vadd.f32 %v1532_v1, %v1521_v4  ;;  %2015 = vmatprep.subr.bf16.mxu1 %v4062_v14 }
 0x4cd   : > { %v1537_v10 = vpack.c.bf16 %v4846_v6, %v4846_v6 }
 0x4ce   : > { %v1538_v9 = vpack.c.bf16 %v4848_v8, %v4848_v8 }
 0x4cf   : > { %2016 = vmatpush1.bf16.msra.mxu1 %v4060_v15 }
 0x4d0   : > { %1777 = vmatprep.mubr.bf16.mxu0 %v1538_v9  ;;  %2017 = vmatprep.subr.bf16.mxu1 %v4065_v16 }
 0x4d1   : > { %1778 = vmatmul.mubr.bf16.vlgmr.msra.gmra.mrb[8].mxu0 %v1537_v10 }
 0x4d3   : > { %2018 = vmatpush1.bf16.msra.mxu1 %v4063_v17 }
 0x4d4   : > { %2019 = vmatprep.subr.bf16.mxu1 %v4068_v18 }
 0x4d7   : > { %2020 = vmatpush1.bf16.msra.mxu1 %v4066_v19 }
 0x4d8   : > { %2021 = vmatprep.subr.bf16.mxu1 %v4071_v20 }
 0x4db   : > { %2022 = vmatpush1.bf16.msra.mxu1 %v4069_v21 }
 0x4dc   : > { %2023 = vmatprep.subr.bf16.mxu1 %v4074_v22 }
 0x4df   : > { %2024 = vmatpush1.bf16.msra.mxu1 %v4072_v24 }
 0x4e0   : > { %2025 = vmatprep.subr.bf16.mxu1 %v4077_v25 }
 0x4e3   : > { %2026 = vmatpush1.bf16.msra.mxu1 %v4075_v26 }
 0x5a4   : > { %v1779_v30 = vpop.f32.mrb[8].mxu0 }
 0x5a5   : > { %v1780_v31 = vadd.f32 %v1779_v30, %v1578_v28  ;;  %v1781_v33 = vpop.f32.mrb[9].mxu0 }
 0x5a6   : > { %v1782_v35 = vadd.f32 %v1781_v33, %v1582_v29  ;;  %v1783_v36 = vpop.f32.mrb[10].mxu0 }
 0x5a7   : > { %v3458_v37 = vmul.f32 -1.442695, %v1780_v31  ;;  %v1784_v38 = vpop.f32.mrb[11].mxu0 }
 0x5a8   : > { %v3459_v58 = vmul.f32 -1.442695, %v1782_v35 }
 0x5a9   : > { %4094 = vpow2.f32 %v3458_v37 }
 0x5aa   : > { %4096 = vpow2.f32 %v3459_v58 }
 0x5b3   : > { %v4095_v23 = vpop.eup %4094 }
 0x5b4   : > { %v4097_v39 = vpop.eup %4096  ;;  %v1792_v40 = vadd.f32 1.0, %v4095_v23 }
 0x5b5   : > { %v1793_v41 = vadd.f32 1.0, %v4097_v39 }
 0x5b6   : > { %4098 = vrcp.f32 %v1792_v40 }
 0x5b7   : > { %4100 = vrcp.f32 %v1793_v41 }
 0x5c0   : > { %v4099_v42 = vpop.eup %4098 }
 0x5c1   : > { %v4101_v43 = vpop.eup %4100  ;;  %v1798_v44 = vmul.f32 %v4099_v42, %v1780_v31 }
 0x5c2   : > { %v1799_v45 = vmul.f32 %v4101_v43, %v1782_v35 }
 0x5c3   : > { %v1800_v47 = vpack.c.bf16 %v1798_v44, %v1798_v44 }
 0x5c4   : > { %v1801_v46 = vpack.c.bf16 %v1799_v45, %v1799_v45 }
 0x5c6   : > { %2027 = vmatprep.mubr.bf16.mxu1 %v1801_v46 }
 0x5c7   : > { %2028 = vmatmul.mubr.bf16.vlgmr.msra.gmra.mrb[8].mxu1 %v1800_v47 }
 0x69a   : > { %v2029_v50 = vpop.f32.mrb[8].mxu1 }
 0x69b   : > { %v2036_v53 = vadd.f32 %v2029_v50, %v4846_v6  ;;  %v2031_v54 = vpop.f32.mrb[9].mxu1 }
 0x69c   : > { %v2037_v55 = vadd.f32 %v2031_v54, %v4848_v8  ;;  %v2033_v56 = vpop.f32.mrb[10].mxu1 }
 0x69d   : > { %v2051_v57 = vadd.f32 %v2044_v49, %v2036_v53  ;;  %v2034_v59 = vpop.f32.mrb[11].mxu1 }
 0x69e   : > { %v2052_v60 = vadd.f32 %v2048_v51, %v2037_v55 }
 0x69f   : > { %2053 = vst [vmem:[#allocation2] sm:$0xff] %v2051_v57 }
 0x6a0   : > { %2054 = vst [vmem:[#allocation2 + $0x8] sm:$0xff] %v2052_v60 }
 0x6a1 PF: > { %v2059_v13 = vld [vmem:[%s4774_s21] sm:$0xff]  ;;  %v2060_v61 = vld [vmem:[%s4774_s21 + $0x8] sm:$0xff]  ;;  %s5161_s26 = sld [smem:[#allocation21_spill]]  ;;  %s5162_s27 = sld [smem:[#allocation22_spill]] }
 0x6a2   : > { %v2063_v52 = vld [vmem:[%s4774_s21 + $0x20] sm:$0xff]  ;;  %v2064_v63 = vld [vmem:[%s4774_s21 + $0x28] sm:$0xff]  ;;  %s5164_s1 = sld [smem:[#allocation24_spill]]  ;;  %s3088_s18 = sshll.u32 %s4798_s24, 4  ;;  %s5012_s18 = int_to_ptr.vmem [resolvable:$true] %s3088_s18 }
 0x6a3   : > { %v3493_v62 = vcombine.high %v2059_v13, %v2063_v52  ;;  %v3492_v0 = vcombine.low %v2059_v13, %v2063_v52  ;;  %v2067_v1 = vld [vmem:[%s4774_s21 + $0x40] sm:$0xff]  ;;  %v3495_v3 = vcombine.high %v2060_v61, %v2064_v63  ;;  %v3494_v4 = vcombine.low %v2060_v61, %v2064_v63  ;;  %v2068_v6 = vld [vmem:[%s4774_s21 + $0x48] sm:$0xff]  ;;  %s5165_s0 = sld [smem:[#allocation34_spill]]  ;;  %s3070_s3 = scalar_lea.sflag [#allocation5], %s473_s6 }
 0x6a4   : > { %v2071_v2 = vld [vmem:[%s4774_s21 + $0x60] sm:$0xff]  ;;  %v2072_v7 = vld [vmem:[%s4774_s21 + $0x68] sm:$0xff]  ;;  %s4274_s19 = scalar_lea.vmem %s5012_s18, 512  ;;  %s4421_s11 = smov [#allocation13]  }
 0x6a5   : > { %v3501_v5 = vcombine.high %v2067_v1, %v2071_v2  ;;  %v2075_v8 = vld [vmem:[%s4774_s21 + $0x80] sm:$0xff]  ;;  %2869 = vmatprep.subr.bf16.mxu0 %v3493_v62  ;;  %v3503_v9 = vcombine.high %v2068_v6, %v2072_v7  ;;  %v2076_v11 = vld [vmem:[%s4774_s21 + $0x88] sm:$0xff]  ;;  %2910 = vmatprep.subr.bf16.mxu1 %v3495_v3  ;;  %v3500_v32 = vcombine.low %v2067_v1, %v2071_v2  ;;  %p4275_p10 = scmp.ne.s32.totalorder %s5012_s18, %s4274_s19  ;;  %s4278_s17 = sshll.u32 %s4421_s11, 4  ;;  %s4279_s17 = int_to_ptr.vmem [resolvable:$false] %s4278_s17 }
 0x6a6   : > { %v2079_v10 = vld [vmem:[%s4774_s21 + $0xa0] sm:$0xff]  ;;  %v2080_v12 = vld [vmem:[%s4774_s21 + $0xa8] sm:$0xff]  ;;  %2870 = vmatpush1.bf16.msra.mxu0 %v3492_v0  ;;  %2911 = vmatpush1.bf16.msra.mxu1 %v3494_v4  ;;  %v3502_v34 = vcombine.low %v2068_v6, %v2072_v7  ;;  %s4280_s8 = scalar_lea.vmem %s4279_s17, 1024  ;;  %p4281_p11 = scmp.lt.s32.totalorder %s5012_s18, %s4279_s17 }
 0x6a7   : > { %2871 = vmatprep.subr.bf16.mxu0 %v3501_v5  ;;  %v3509_v14 = vcombine.high %v2075_v8, %v2079_v10  ;;  %2912 = vmatprep.subr.bf16.mxu1 %v3503_v9  ;;  %v3511_v15 = vcombine.high %v2076_v11, %v2080_v12  ;;  %v2083_v16 = vld [vmem:[%s4774_s21 + $0xc0] sm:$0xff]  ;;  %v2084_v18 = vld [vmem:[%s4774_s21 + $0xc8] sm:$0xff]  ;;  %v3508_v20 = vcombine.low %v2075_v8, %v2079_v10  ;;  %s3625_s28 = sshll.u32 %s5161_s26, 3  ;;  %p4282_p4 = scmp.lt.s32.totalorder %s4280_s8, %s4274_s19 }
 0x6a8   : > { %v2087_v17 = vld [vmem:[%s4774_s21 + $0xe0] sm:$0xff]  ;;  %v2088_v19 = vld [vmem:[%s4774_s21 + $0xe8] sm:$0xff]  ;;  %v3510_v21 = vcombine.low %v2076_v11, %v2080_v12  ;;  %p5166_p1 = scmp.ne.s32.totalorder %s5164_s1, 0 }
 0x6a9   : > { %v3517_v22 = vcombine.high %v2083_v16, %v2087_v17  ;;  %v3519_v24 = vcombine.high %v2084_v18, %v2088_v19  ;;  %v2091_v25 = vld [vmem:[%s4774_s21 + $0x100] sm:$0xff]  ;;  %v2092_v27 = vld [vmem:[%s4774_s21 + $0x108] sm:$0xff]  ;;  %v3516_v29 = vcombine.low %v2083_v16, %v2087_v17  ;;  %v3518_v30 = vcombine.low %v2084_v18, %v2088_v19  ;;  %p4283_p5 = por %p4282_p4, %p4281_p11 }
 0x6aa   : > { %2872 = vmatpush1.bf16.msra.mxu0 %v3500_v32  ;;  %2913 = vmatpush1.bf16.msra.mxu1 %v3502_v34  ;;  %v2095_v26 = vld [vmem:[%s4774_s21 + $0x120] sm:$0xff]  ;;  %v2096_v28 = vld [vmem:[%s4774_s21 + $0x128] sm:$0xff]  ;;  %p4276_p0 = pnand %p4275_p10, %p5166_p1 }
 0x6ab   : > { %2873 = vmatprep.subr.bf16.mxu0 %v3509_v14  ;;  %2914 = vmatprep.subr.bf16.mxu1 %v3511_v15  ;;  %v3525_v31 = vcombine.high %v2091_v25, %v2095_v26  ;;  %v3527_v33 = vcombine.high %v2092_v27, %v2096_v28  ;;  %v2099_v35 = vld [vmem:[%s4774_s21 + $0x140] sm:$0xff]  ;;  %v2100_v37 = vld [vmem:[%s4774_s21 + $0x148] sm:$0xff]  ;;  %v3524_v58 = vcombine.low %v2091_v25, %v2095_v26 }
 0x6ac   : > { %v2103_v36 = vld [vmem:[%s4774_s21 + $0x160] sm:$0xff]  ;;  %v2104_v38 = vld [vmem:[%s4774_s21 + $0x168] sm:$0xff]  ;;  %v3526_v23 = vcombine.low %v2092_v27, %v2096_v28  ;;  %p4277_p13 = pneg %p4276_p0 }
 0x6ad   : > { %v3533_v39 = vcombine.high %v2099_v35, %v2103_v36  ;;  %v3535_v40 = vcombine.high %v2100_v37, %v2104_v38  ;;  %v2107_v41 = vld [vmem:[%s4774_s21 + $0x180] sm:$0xff]  ;;  %v2108_v43 = vld [vmem:[%s4774_s21 + $0x188] sm:$0xff]  ;;  %v3532_v45 = vcombine.low %v2099_v35, %v2103_v36  ;;  %v3534_v46 = vcombine.low %v2100_v37, %v2104_v38 }
 0x6ae   : > { %2874 = vmatpush1.bf16.msra.mxu0 %v3508_v20  ;;  %2915 = vmatpush1.bf16.msra.mxu1 %v3510_v21  ;;  %v2111_v42 = vld [vmem:[%s4774_s21 + $0x1a0] sm:$0xff]  ;;  %v2112_v44 = vld [vmem:[%s4774_s21 + $0x1a8] sm:$0xff]  ;;  %p4284_p8 = pnand %p4283_p5, %p4277_p13 }
 0x6af   : > { %2875 = vmatprep.subr.bf16.mxu0 %v3517_v22  ;;  %2916 = vmatprep.subr.bf16.mxu1 %v3519_v24  ;;  %v3541_v47 = vcombine.high %v2107_v41, %v2111_v42  ;;  %v2056_v48 = vld [vmem:[#allocation2 + $0x8] sm:$0xff]  ;;  %v3543_v49 = vcombine.high %v2108_v43, %v2112_v44  ;;  %v2115_v50 = vld [vmem:[%s4774_s21 + $0x1c0] sm:$0xff]  ;;  %v3540_v56 = vcombine.low %v2107_v41, %v2111_v42 }
 0x6b0   : > { %v2119_v51 = vld [vmem:[%s4774_s21 + $0x1e0] sm:$0xff]  ;;  %v4890_v53 = vpack.c.bf16 %v2056_v48, %v2056_v48  ;;  %v2116_v54 = vld [vmem:[%s4774_s21 + $0x1c8] sm:$0xff]  ;;  %v3542_v57 = vcombine.low %v2108_v43, %v2112_v44 }
 0x6b1   : > { %v2120_v55 = vld [vmem:[%s4774_s21 + $0x1e8] sm:$0xff]  ;;  %v3549_v59 = vcombine.high %v2115_v50, %v2119_v51  ;;  %v2123_v13 = vld [vmem:[%s4774_s21 + $0x200] sm:$0xff]  ;;  %v3548_v63 = vcombine.low %v2115_v50, %v2119_v51 }
 0x6b2   : > { %2876 = vmatpush1.bf16.msra.mxu0 %v3516_v29  ;;  %2917 = vmatpush1.bf16.msra.mxu1 %v3518_v30  ;;  %v3551_v60 = vcombine.high %v2116_v54, %v2120_v55  ;;  %v2127_v52 = vld [vmem:[%s4774_s21 + $0x220] sm:$0xff]  ;;  %v2124_v61 = vld [vmem:[%s4774_s21 + $0x208] sm:$0xff]  ;;  %v3550_v0 = vcombine.low %v2116_v54, %v2120_v55 }
 0x6b3   : > { %2877 = vmatprep.subr.bf16.mxu0 %v3525_v31  ;;  %2918 = vmatprep.subr.bf16.mxu1 %v3527_v33  ;;  %v2128_v62 = vld [vmem:[%s4774_s21 + $0x228] sm:$0xff]  ;;  %v3557_v1 = vcombine.high %v2123_v13, %v2127_v52  ;;  %v2131_v3 = vld [vmem:[%s4774_s21 + $0x240] sm:$0xff]  ;;  %v3556_v7 = vcombine.low %v2123_v13, %v2127_v52  ;;  %v2061_v52 = vld [vmem:[%s4774_s21 + $0x10] sm:$0xff] }
 0x6b4   : > { %2901 = vmatprep.mubr.bf16.mxu0 %v4890_v53  ;;  %2942 = vmatprep.mubr.bf16.mxu1 %v4890_v53  ;;  %v3559_v2 = vcombine.high %v2124_v61, %v2128_v62  ;;  %v2135_v4 = vld [vmem:[%s4774_s21 + $0x260] sm:$0xff]  ;;  %v2132_v5 = vld [vmem:[%s4774_s21 + $0x248] sm:$0xff]  ;;  %v3558_v8 = vcombine.low %v2124_v61, %v2128_v62  ;;  %v2065_v61 = vld [vmem:[%s4774_s21 + $0x30] sm:$0xff] }
 0x6b5   : > { %v2136_v6 = vld [vmem:[%s4774_s21 + $0x268] sm:$0xff]  ;;  %v3565_v9 = vcombine.high %v2131_v3, %v2135_v4  ;;  %v2139_v11 = vld [vmem:[%s4774_s21 + $0x280] sm:$0xff]  ;;  %v3564_v14 = vcombine.low %v2131_v3, %v2135_v4  ;;  %v2062_v62 = vld [vmem:[%s4774_s21 + $0x18] sm:$0xff]  ;;  %v3497_v3 = vcombine.high %v2061_v52, %v2065_v61 }
 0x6b6   : > { %2878 = vmatpush1.bf16.msra.mxu0 %v3524_v58  ;;  %2919 = vmatpush1.bf16.msra.mxu1 %v3526_v23  ;;  %v3567_v10 = vcombine.high %v2132_v5, %v2136_v6  ;;  %v2143_v12 = vld [vmem:[%s4774_s21 + $0x2a0] sm:$0xff]  ;;  %v2140_v32 = vld [vmem:[%s4774_s21 + $0x288] sm:$0xff]  ;;  %v3566_v15 = vcombine.low %v2132_v5, %v2136_v6  ;;  %v2069_v5 = vld [vmem:[%s4774_s21 + $0x50] sm:$0xff] }
 0x6b7   : > { %2879 = vmatprep.subr.bf16.mxu0 %v3533_v39  ;;  %2920 = vmatprep.subr.bf16.mxu1 %v3535_v40  ;;  %v2144_v34 = vld [vmem:[%s4774_s21 + $0x2a8] sm:$0xff]  ;;  %v3573_v16 = vcombine.high %v2139_v11, %v2143_v12  ;;  %v2147_v18 = vld [vmem:[%s4774_s21 + $0x2c0] sm:$0xff]  ;;  %v3572_v22 = vcombine.low %v2139_v11, %v2143_v12  ;;  %v2073_v6 = vld [vmem:[%s4774_s21 + $0x70] sm:$0xff] }
 0x6b8   : > { %v3575_v17 = vcombine.high %v2140_v32, %v2144_v34  ;;  %v2151_v19 = vld [vmem:[%s4774_s21 + $0x2e0] sm:$0xff]  ;;  %v2148_v20 = vld [vmem:[%s4774_s21 + $0x2c8] sm:$0xff]  ;;  %v3574_v24 = vcombine.low %v2140_v32, %v2144_v34  ;;  %v3505_v12 = vcombine.high %v2069_v5, %v2073_v6  ;;  %v2077_v34 = vld [vmem:[%s4774_s21 + $0x90] sm:$0xff] }
 0x6b9   : > { %v2152_v21 = vld [vmem:[%s4774_s21 + $0x2e8] sm:$0xff]  ;;  %v3581_v25 = vcombine.high %v2147_v18, %v2151_v19  ;;  %v2155_v27 = vld [vmem:[%s4774_s21 + $0x300] sm:$0xff]  ;;  %v3580_v31 = vcombine.low %v2147_v18, %v2151_v19 }
 0x6ba   : > { %2880 = vmatpush1.bf16.msra.mxu0 %v3532_v45  ;;  %2921 = vmatpush1.bf16.msra.mxu1 %v3534_v46  ;;  %v3583_v26 = vcombine.high %v2148_v20, %v2152_v21  ;;  %v2159_v28 = vld [vmem:[%s4774_s21 + $0x320] sm:$0xff]  ;;  %v2156_v29 = vld [vmem:[%s4774_s21 + $0x308] sm:$0xff]  ;;  %v3582_v33 = vcombine.low %v2148_v20, %v2152_v21  ;;  %v2085_v21 = vld [vmem:[%s4774_s21 + $0xd0] sm:$0xff] }
 0x6bb   : > { %2881 = vmatprep.subr.bf16.mxu0 %v3541_v47  ;;  %2922 = vmatprep.subr.bf16.mxu1 %v3543_v49  ;;  %v2160_v30 = vld [vmem:[%s4774_s21 + $0x328] sm:$0xff]  ;;  %v3589_v35 = vcombine.high %v2155_v27, %v2159_v28  ;;  %v2163_v37 = vld [vmem:[%s4774_s21 + $0x340] sm:$0xff]  ;;  %v3588_v39 = vcombine.low %v2155_v27, %v2159_v28 }
 0x6bc   : > { %v3591_v36 = vcombine.high %v2156_v29, %v2160_v30  ;;  %v2167_v38 = vld [vmem:[%s4774_s21 + $0x360] sm:$0xff]  ;;  %v2164_v58 = vld [vmem:[%s4774_s21 + $0x348] sm:$0xff]  ;;  %v3590_v40 = vcombine.low %v2156_v29, %v2160_v30  ;;  %v2093_v30 = vld [vmem:[%s4774_s21 + $0x110] sm:$0xff] }
 0x6bd   : > { %v2168_v23 = vld [vmem:[%s4774_s21 + $0x368] sm:$0xff]  ;;  %v3597_v41 = vcombine.high %v2163_v37, %v2167_v38  ;;  %v2171_v43 = vld [vmem:[%s4774_s21 + $0x380] sm:$0xff]  ;;  %v3596_v47 = vcombine.low %v2163_v37, %v2167_v38 }
 0x6be   : > { %2882 = vmatpush1.bf16.msra.mxu0 %v3540_v56  ;;  %2923 = vmatpush1.bf16.msra.mxu1 %v3542_v57  ;;  %v3599_v42 = vcombine.high %v2164_v58, %v2168_v23  ;;  %v2175_v44 = vld [vmem:[%s4774_s21 + $0x3a0] sm:$0xff]  ;;  %v2172_v45 = vld [vmem:[%s4774_s21 + $0x388] sm:$0xff]  ;;  %v3598_v48 = vcombine.low %v2164_v58, %v2168_v23  ;;  %v2101_v58 = vld [vmem:[%s4774_s21 + $0x150] sm:$0xff] }
 0x6bf   : > { %2883 = vmatprep.subr.bf16.mxu0 %v3549_v59  ;;  %2924 = vmatprep.subr.bf16.mxu1 %v3551_v60  ;;  %v2176_v46 = vld [vmem:[%s4774_s21 + $0x3a8] sm:$0xff]  ;;  %v3605_v49 = vcombine.high %v2171_v43, %v2175_v44  ;;  %v2179_v51 = vld [vmem:[%s4774_s21 + $0x3c0] sm:$0xff]  ;;  %v3604_v57 = vcombine.low %v2171_v43, %v2175_v44  ;;  %v2105_v23 = vld [vmem:[%s4774_s21 + $0x170] sm:$0xff] }
 0x6c0   : > { %v3607_v50 = vcombine.high %v2172_v45, %v2176_v46  ;;  %v2183_v54 = vld [vmem:[%s4774_s21 + $0x3e0] sm:$0xff]  ;;  %v2180_v55 = vld [vmem:[%s4774_s21 + $0x3c8] sm:$0xff]  ;;  %v3606_v59 = vcombine.low %v2172_v45, %v2176_v46  ;;  %v3537_v43 = vcombine.high %v2101_v58, %v2105_v23  ;;  %v2109_v45 = vld [vmem:[%s4774_s21 + $0x190] sm:$0xff] }
 0x6c1   : > { %v2184_v56 = vld [vmem:[%s4774_s21 + $0x3e8] sm:$0xff]  ;;  %v3613_v60 = vcombine.high %v2179_v51, %v2183_v54  ;;  %v2113_v46 = vld [vmem:[%s4774_s21 + $0x1b0] sm:$0xff] }
 0x6c2   : > { %2884 = vmatpush1.bf16.msra.mxu0 %v3548_v63  ;;  %2925 = vmatpush1.bf16.msra.mxu1 %v3550_v0  ;;  %v3615_v13 = vcombine.high %v2180_v55, %v2184_v56  ;;  %v2066_v63 = vld [vmem:[%s4774_s21 + $0x38] sm:$0xff]  ;;  %v3612_v0 = vcombine.low %v2179_v51, %v2183_v54  ;;  %v3545_v51 = vcombine.high %v2109_v45, %v2113_v46 }
 0x6c3   : > { %2885 = vmatprep.subr.bf16.mxu0 %v3557_v1  ;;  %2926 = vmatprep.subr.bf16.mxu1 %v3559_v2  ;;  %v2055_v1 = vld [vmem:[#allocation2] sm:$0xff]  ;;  %v3614_v2 = vcombine.low %v2180_v55, %v2184_v56  ;;  %v3499_v4 = vcombine.high %v2062_v62, %v2066_v63  ;;  %v3498_v11 = vcombine.low %v2062_v62, %v2066_v63  ;;  %v2117_v55 = vld [vmem:[%s4774_s21 + $0x1d0] sm:$0xff] }
 0x6c4   : > { %v2121_v56 = vld [vmem:[%s4774_s21 + $0x1f0] sm:$0xff] }
 0x6c5   : > { %v2125_v62 = vld [vmem:[%s4774_s21 + $0x210] sm:$0xff] }
 0x6c6   : > { %2886 = vmatpush1.bf16.msra.mxu0 %v3556_v7  ;;  %2927 = vmatpush1.bf16.msra.mxu1 %v3558_v8  ;;  %v4934_v7 = vpack.c.bf16 %v2055_v1, %v2055_v1  ;;  %v2070_v8 = vld [vmem:[%s4774_s21 + $0x58] sm:$0xff]  ;;  %v2129_v63 = vld [vmem:[%s4774_s21 + $0x230] sm:$0xff] }
 0x6c7   : > { %2887 = vmatprep.subr.bf16.mxu0 %v3565_v9  ;;  %2928 = vmatprep.subr.bf16.mxu1 %v3567_v10  ;;  %v2074_v9 = vld [vmem:[%s4774_s21 + $0x78] sm:$0xff]  ;;  %v3496_v10 = vcombine.low %v2061_v52, %v2065_v61  ;;  %v3553_v52 = vcombine.high %v2117_v55, %v2121_v56 }
 0x6c8   : > { %v3507_v32 = vcombine.high %v2070_v8, %v2074_v9  ;;  %v3506_v18 = vcombine.low %v2070_v8, %v2074_v9  ;;  %v2130_v1 = vld [vmem:[%s4774_s21 + $0x238] sm:$0xff]  ;;  %v2137_v8 = vld [vmem:[%s4774_s21 + $0x270] sm:$0xff] }
 0x6c9   : > { %v2134_v9 = vld [vmem:[%s4774_s21 + $0x258] sm:$0xff] }
 0x6ca   : > { %2888 = vmatpush1.bf16.msra.mxu0 %v3564_v14  ;;  %2929 = vmatpush1.bf16.msra.mxu1 %v3566_v15  ;;  %v2081_v14 = vld [vmem:[%s4774_s21 + $0xb0] sm:$0xff]  ;;  %v2078_v15 = vld [vmem:[%s4774_s21 + $0x98] sm:$0xff] }
 0x6cb   : > { %2889 = vmatprep.subr.bf16.mxu0 %v3573_v16  ;;  %2930 = vmatprep.subr.bf16.mxu1 %v3575_v17  ;;  %v2082_v16 = vld [vmem:[%s4774_s21 + $0xb8] sm:$0xff]  ;;  %v3504_v17 = vcombine.low %v2069_v5, %v2073_v6  ;;  %v3513_v19 = vcombine.high %v2077_v34, %v2081_v14  ;;  %v2133_v6 = vld [vmem:[%s4774_s21 + $0x250] sm:$0xff] }
 0x6cc   : > { %v3515_v20 = vcombine.high %v2078_v15, %v2082_v16  ;;  %v3514_v27 = vcombine.low %v2078_v15, %v2082_v16  ;;  %v2145_v15 = vld [vmem:[%s4774_s21 + $0x2b0] sm:$0xff]  ;;  %v2142_v16 = vld [vmem:[%s4774_s21 + $0x298] sm:$0xff] }
 0x6ce   : > { %2890 = vmatpush1.bf16.msra.mxu0 %v3572_v22  ;;  %2931 = vmatpush1.bf16.msra.mxu1 %v3574_v24  ;;  %v2089_v22 = vld [vmem:[%s4774_s21 + $0xf0] sm:$0xff]  ;;  %v2086_v24 = vld [vmem:[%s4774_s21 + $0xd8] sm:$0xff] }
 0x6cf   : > { %2891 = vmatprep.subr.bf16.mxu0 %v3581_v25  ;;  %2932 = vmatprep.subr.bf16.mxu1 %v3583_v26  ;;  %v2090_v25 = vld [vmem:[%s4774_s21 + $0xf8] sm:$0xff]  ;;  %v3512_v26 = vcombine.low %v2077_v34, %v2081_v14  ;;  %v3521_v28 = vcombine.high %v2085_v21, %v2089_v22  ;;  %v2141_v14 = vld [vmem:[%s4774_s21 + $0x290] sm:$0xff] }
 0x6d0   : > { %v3523_v29 = vcombine.high %v2086_v24, %v2090_v25 }
 0x6d2   : > { %2892 = vmatpush1.bf16.msra.mxu0 %v3580_v31  ;;  %2933 = vmatpush1.bf16.msra.mxu1 %v3582_v33  ;;  %v2097_v31 = vld [vmem:[%s4774_s21 + $0x130] sm:$0xff]  ;;  %v2094_v33 = vld [vmem:[%s4774_s21 + $0x118] sm:$0xff] }
 0x6d3   : > { %2893 = vmatprep.subr.bf16.mxu0 %v3589_v35  ;;  %2934 = vmatprep.subr.bf16.mxu1 %v3591_v36  ;;  %v2098_v35 = vld [vmem:[%s4774_s21 + $0x138] sm:$0xff]  ;;  %v3520_v36 = vcombine.low %v2085_v21, %v2089_v22  ;;  %v3529_v37 = vcombine.high %v2093_v30, %v2097_v31  ;;  %v2149_v22 = vld [vmem:[%s4774_s21 + $0x2d0] sm:$0xff] }
 0x6d4   : > { %v3531_v38 = vcombine.high %v2094_v33, %v2098_v35 }
 0x6d6   : > { %2894 = vmatpush1.bf16.msra.mxu0 %v3588_v39  ;;  %2935 = vmatpush1.bf16.msra.mxu1 %v3590_v40  ;;  %v2102_v39 = vld [vmem:[%s4774_s21 + $0x158] sm:$0xff] }
 0x6d7   : > { %2895 = vmatprep.subr.bf16.mxu0 %v3597_v41  ;;  %2936 = vmatprep.subr.bf16.mxu1 %v3599_v42  ;;  %v2106_v40 = vld [vmem:[%s4774_s21 + $0x178] sm:$0xff]  ;;  %v3528_v41 = vcombine.low %v2093_v30, %v2097_v31  ;;  %v3530_v42 = vcombine.low %v2094_v33, %v2098_v35  ;;  %v2157_v31 = vld [vmem:[%s4774_s21 + $0x310] sm:$0xff] }
 0x6d8   : > { %v3539_v44 = vcombine.high %v2102_v39, %v2106_v40  ;;  %v2161_v33 = vld [vmem:[%s4774_s21 + $0x330] sm:$0xff]  ;;  %v2158_v35 = vld [vmem:[%s4774_s21 + $0x318] sm:$0xff] }
 0x6da   : > { %2896 = vmatpush1.bf16.msra.mxu0 %v3596_v47  ;;  %2937 = vmatpush1.bf16.msra.mxu1 %v3598_v48  ;;  %v2110_v47 = vld [vmem:[%s4774_s21 + $0x198] sm:$0xff] }
 0x6db   : > { %2897 = vmatprep.subr.bf16.mxu0 %v3605_v49  ;;  %2938 = vmatprep.subr.bf16.mxu1 %v3607_v50  ;;  %v2114_v48 = vld [vmem:[%s4774_s21 + $0x1b8] sm:$0xff]  ;;  %v3536_v49 = vcombine.low %v2101_v58, %v2105_v23  ;;  %v3538_v50 = vcombine.low %v2102_v39, %v2106_v40  ;;  %v2165_v23 = vld [vmem:[%s4774_s21 + $0x350] sm:$0xff] }
 0x6dc   : > { %v3547_v54 = vcombine.high %v2110_v47, %v2114_v48  ;;  %v2169_v39 = vld [vmem:[%s4774_s21 + $0x370] sm:$0xff]  ;;  %v2166_v40 = vld [vmem:[%s4774_s21 + $0x358] sm:$0xff] }
 0x6de   : > { %2898 = vmatpush1.bf16.msra.mxu0 %v3604_v57  ;;  %2939 = vmatpush1.bf16.msra.mxu1 %v3606_v59  ;;  %v2118_v57 = vld [vmem:[%s4774_s21 + $0x1d8] sm:$0xff] }
 0x6df   : > { %2899 = vmatprep.subr.bf16.mxu0 %v3613_v60  ;;  %2940 = vmatprep.subr.bf16.mxu1 %v3615_v13  ;;  %v2122_v59 = vld [vmem:[%s4774_s21 + $0x1f8] sm:$0xff]  ;;  %v3544_v60 = vcombine.low %v2109_v45, %v2113_v46  ;;  %v3546_v13 = vcombine.low %v2110_v47, %v2114_v48  ;;  %v2173_v46 = vld [vmem:[%s4774_s21 + $0x390] sm:$0xff] }
 0x6e0   : > { %v3555_v61 = vcombine.high %v2118_v57, %v2122_v59  ;;  %v2177_v47 = vld [vmem:[%s4774_s21 + $0x3b0] sm:$0xff]  ;;  %v2174_v48 = vld [vmem:[%s4774_s21 + $0x398] sm:$0xff] }
 0x6e2   : > { %2900 = vmatpush1.bf16.msra.mxu0 %v3612_v0  ;;  %2941 = vmatpush1.bf16.msra.mxu1 %v3614_v2  ;;  %v2126_v0 = vld [vmem:[%s4774_s21 + $0x218] sm:$0xff]  ;;  %v3552_v2 = vcombine.low %v2117_v55, %v2121_v56  ;;  %v2181_v56 = vld [vmem:[%s4774_s21 + $0x3d0] sm:$0xff] }
 0x6e3   : > { %2951 = vmatprep.subr.bf16.mxu0 %v3497_v3  ;;  %2992 = vmatprep.subr.bf16.mxu1 %v3499_v4  ;;  %v3554_v3 = vcombine.low %v2118_v57, %v2122_v59  ;;  %v3561_v4 = vcombine.high %v2125_v62, %v2129_v63  ;;  %v3563_v5 = vcombine.high %v2126_v0, %v2130_v1  ;;  %v2185_v57 = vld [vmem:[%s4774_s21 + $0x3f0] sm:$0xff]  ;;  %v2182_v59 = vld [vmem:[%s4774_s21 + $0x3d8] sm:$0xff] }
 0x6e5   : > { %2902 = vmatmul.mubr.bf16.vlgmr.msra.gmra.mrb[0].mxu0 %v4934_v7  ;;  %2943 = vmatmul.mubr.bf16.vlgmr.msra.gmra.mrb[0].mxu1 %v4934_v7 }
 0x6e6   : > { %2952 = vmatpush1.bf16.msra.mxu0 %v3496_v10  ;;  %2993 = vmatpush1.bf16.msra.mxu1 %v3498_v11  ;;  %v2138_v10 = vld [vmem:[%s4774_s21 + $0x278] sm:$0xff]  ;;  %v3560_v11 = vcombine.low %v2125_v62, %v2129_v63  ;;  %v3616_v63 = vcombine.low %v2181_v56, %v2185_v57 }
 0x6e7   : > { %2953 = vmatprep.subr.bf16.mxu0 %v3505_v12  ;;  %2994 = vmatprep.subr.bf16.mxu1 %v3507_v32  ;;  %v3562_v12 = vcombine.low %v2126_v0, %v2130_v1  ;;  %v3569_v32 = vcombine.high %v2133_v6, %v2137_v8  ;;  %v3571_v34 = vcombine.high %v2134_v9, %v2138_v10  ;;  %v2189_v1 = vlaneseq }
 0x6e8   : > { %2983 = vmatprep.mubr.bf16.mxu0 %v4890_v53  ;;  %3024 = vmatprep.mubr.bf16.mxu1 %v4890_v53  ;;  %v3522_v53 = vcombine.low %v2086_v24, %v2090_v25  ;;  %v2153_v24 = vld [vmem:[%s4774_s21 + $0x2f0] sm:$0xff]  ;;  %v2150_v25 = vld [vmem:[%s4774_s21 + $0x2d8] sm:$0xff] }
 0x6ea   : > { %2954 = vmatpush1.bf16.msra.mxu0 %v3504_v17  ;;  %2995 = vmatpush1.bf16.msra.mxu1 %v3506_v18  ;;  %v2146_v17 = vld [vmem:[%s4774_s21 + $0x2b8] sm:$0xff]  ;;  %v3568_v18 = vcombine.low %v2133_v6, %v2137_v8 }
 0x6eb   : > { %2955 = vmatprep.subr.bf16.mxu0 %v3513_v19  ;;  %2996 = vmatprep.subr.bf16.mxu1 %v3515_v20  ;;  %v3570_v19 = vcombine.low %v2134_v9, %v2138_v10  ;;  %v3577_v20 = vcombine.high %v2141_v14, %v2145_v15  ;;  %v3579_v21 = vcombine.high %v2142_v16, %v2146_v17 }
 0x6ee   : > { %2956 = vmatpush1.bf16.msra.mxu0 %v3512_v26  ;;  %2997 = vmatpush1.bf16.msra.mxu1 %v3514_v27  ;;  %v2154_v26 = vld [vmem:[%s4774_s21 + $0x2f8] sm:$0xff]  ;;  %v3576_v27 = vcombine.low %v2141_v14, %v2145_v15 }
 0x6ef   : > { %2957 = vmatprep.subr.bf16.mxu0 %v3521_v28  ;;  %2998 = vmatprep.subr.bf16.mxu1 %v3523_v29  ;;  %v3578_v28 = vcombine.low %v2142_v16, %v2146_v17  ;;  %v3585_v29 = vcombine.high %v2149_v22, %v2153_v24  ;;  %v3587_v30 = vcombine.high %v2150_v25, %v2154_v26 }
 0x6f2   : > { %2958 = vmatpush1.bf16.msra.mxu0 %v3520_v36  ;;  %2999 = vmatpush1.bf16.msra.mxu1 %v3522_v53  ;;  %v2162_v36 = vld [vmem:[%s4774_s21 + $0x338] sm:$0xff]  ;;  %v3584_v53 = vcombine.low %v2149_v22, %v2153_v24 }
 0x6f3   : > { %2959 = vmatprep.subr.bf16.mxu0 %v3529_v37  ;;  %3000 = vmatprep.subr.bf16.mxu1 %v3531_v38  ;;  %v3586_v37 = vcombine.low %v2150_v25, %v2154_v26  ;;  %v3593_v38 = vcombine.high %v2157_v31, %v2161_v33  ;;  %v3595_v58 = vcombine.high %v2158_v35, %v2162_v36 }
 0x6f6   : > { %2960 = vmatpush1.bf16.msra.mxu0 %v3528_v41  ;;  %3001 = vmatpush1.bf16.msra.mxu1 %v3530_v42  ;;  %v2170_v41 = vld [vmem:[%s4774_s21 + $0x378] sm:$0xff]  ;;  %v3592_v42 = vcombine.low %v2157_v31, %v2161_v33 }
 0x6f7   : > { %2961 = vmatprep.subr.bf16.mxu0 %v3537_v43  ;;  %3002 = vmatprep.subr.bf16.mxu1 %v3539_v44  ;;  %v3594_v43 = vcombine.low %v2158_v35, %v2162_v36  ;;  %v3601_v44 = vcombine.high %v2165_v23, %v2169_v39  ;;  %v3603_v45 = vcombine.high %v2166_v40, %v2170_v41 }
 0x6fa   : > { %2962 = vmatpush1.bf16.msra.mxu0 %v3536_v49  ;;  %3003 = vmatpush1.bf16.msra.mxu1 %v3538_v50  ;;  %v2178_v49 = vld [vmem:[%s4774_s21 + $0x3b8] sm:$0xff]  ;;  %v3600_v50 = vcombine.low %v2165_v23, %v2169_v39 }
 0x6fb   : > { %2963 = vmatprep.subr.bf16.mxu0 %v3545_v51  ;;  %3004 = vmatprep.subr.bf16.mxu1 %v3547_v54  ;;  %v3602_v51 = vcombine.low %v2166_v40, %v2170_v41  ;;  %v3609_v54 = vcombine.high %v2173_v46, %v2177_v47  ;;  %v3611_v55 = vcombine.high %v2174_v48, %v2178_v49 }
 0x6fe   : > { %2964 = vmatpush1.bf16.msra.mxu0 %v3544_v60  ;;  %3005 = vmatpush1.bf16.msra.mxu1 %v3546_v13  ;;  %v2186_v60 = vld [vmem:[%s4774_s21 + $0x3f8] sm:$0xff]  ;;  %v3608_v13 = vcombine.low %v2173_v46, %v2177_v47  ;;  %s3626_s21 = sshll.u32 %s5162_s27, 5 }
 0x6ff   : > { %2965 = vmatprep.subr.bf16.mxu0 %v3553_v52  ;;  %3006 = vmatprep.subr.bf16.mxu1 %v3555_v61  ;;  %v3610_v52 = vcombine.low %v2174_v48, %v2178_v49  ;;  %v3617_v61 = vcombine.high %v2181_v56, %v2185_v57  ;;  %v3619_v62 = vcombine.high %v2182_v59, %v2186_v60  ;;  %s3084_s23 = sadd.s32 %s3626_s21, %s3625_s28 }
 0x700   : > { %v3618_v0 = vcombine.low %v2182_v59, %v2186_v60  ;;  %s3627_s16 = sshll.u32 %s3084_s23, 6 }
 0x701   : > { %s5010_s20 = scalar_lea.hbm %s5165_s0, %s3627_s16 }
 0x702   : > { %2966 = vmatpush1.bf16.msra.mxu0 %v3552_v2  ;;  %3007 = vmatpush1.bf16.msra.mxu1 %v3554_v3  ;;  %v2190_v2 = vshrl.u32 %v2189_v1, 7 }
 0x703   : > { %2967 = vmatprep.subr.bf16.mxu0 %v3561_v4  ;;  %3008 = vmatprep.subr.bf16.mxu1 %v3563_v5  ;;  %v2187_v4 = vld [vmem:[%s425_s14] sm:$0xff] }
 0x704   : > { %v2191_v3 = vsub.s32 0, %v2190_v2  ;;  %v2199_v5 = vsub.s32 2, %v2190_v2  ;;  %v2195_v6 = vsub.s32 1, %v2190_v2  ;;  %v2203_v8 = vsub.s32 3, %v2190_v2 }
 0x705   : > { %v2207_v26 = vsub.s32 4, %v2190_v2 }
 0x706   : > { %2968 = vmatpush1.bf16.msra.mxu0 %v3560_v11  ;;  %3009 = vmatpush1.bf16.msra.mxu1 %v3562_v12  ;;  %v2192_v9 = vrot.slane %v2187_v4, %v2191_v3  ;;  %v2200_v10 = vrot.slane %v2187_v4, %v2199_v5  ;;  %v2196_v11 = vrot.slane %v2187_v4, %v2195_v6 }
 0x707   : > { %2969 = vmatprep.subr.bf16.mxu0 %v3569_v32  ;;  %3010 = vmatprep.subr.bf16.mxu1 %v3571_v34  ;;  %v2204_v12 = vrot.slane %v2187_v4, %v2203_v8 }
 0x70a   : > { %2970 = vmatpush1.bf16.msra.mxu0 %v3568_v18  ;;  %3011 = vmatpush1.bf16.msra.mxu1 %v3570_v19 }
 0x70b   : > { %2971 = vmatprep.subr.bf16.mxu0 %v3577_v20  ;;  %3012 = vmatprep.subr.bf16.mxu1 %v3579_v21 }
 0x70e   : > { %2972 = vmatpush1.bf16.msra.mxu0 %v3576_v27  ;;  %3013 = vmatpush1.bf16.msra.mxu1 %v3578_v28  ;;  %v2215_v27 = vsub.s32 6, %v2190_v2  ;;  %v2211_v28 = vsub.s32 5, %v2190_v2 }
 0x70f   : > { %2973 = vmatprep.subr.bf16.mxu0 %v3585_v29  ;;  %3014 = vmatprep.subr.bf16.mxu1 %v3587_v30  ;;  %v2219_v29 = vsub.s32 7, %v2190_v2  ;;  %v2208_v30 = vrot.slane %v2187_v4, %v2207_v26 }
 0x710   : > { %v2216_v31 = vrot.slane %v2187_v4, %v2215_v27  ;;  %v2212_v33 = vrot.slane %v2187_v4, %v2211_v28 }
 0x711   : > { %v2220_v35 = vrot.slane %v2187_v4, %v2219_v29 }
 0x712   : > { %2974 = vmatpush1.bf16.msra.mxu0 %v3584_v53  ;;  %3015 = vmatpush1.bf16.msra.mxu1 %v3586_v37 }
 0x713   : > { %2975 = vmatprep.subr.bf16.mxu0 %v3593_v38  ;;  %3016 = vmatprep.subr.bf16.mxu1 %v3595_v58 }
 0x716   : > { %2976 = vmatpush1.bf16.msra.mxu0 %v3592_v42  ;;  %3017 = vmatpush1.bf16.msra.mxu1 %v3594_v43 }
 0x717   : > { %2977 = vmatprep.subr.bf16.mxu0 %v3601_v44  ;;  %3018 = vmatprep.subr.bf16.mxu1 %v3603_v45 }
 0x71a   : > { %2978 = vmatpush1.bf16.msra.mxu0 %v3600_v50  ;;  %3019 = vmatpush1.bf16.msra.mxu1 %v3602_v51 }
 0x71b   : > { %2979 = vmatprep.subr.bf16.mxu0 %v3609_v54  ;;  %3020 = vmatprep.subr.bf16.mxu1 %v3611_v55 }
 0x71e   : > { %2980 = vmatpush1.bf16.msra.mxu0 %v3608_v13  ;;  %3021 = vmatpush1.bf16.msra.mxu1 %v3610_v52 }
 0x71f   : > { %2981 = vmatprep.subr.bf16.mxu0 %v3617_v61  ;;  %3022 = vmatprep.subr.bf16.mxu1 %v3619_v62 }
 0x722   : > { %2982 = vmatpush1.bf16.msra.mxu0 %v3616_v63  ;;  %3023 = vmatpush1.bf16.msra.mxu1 %v3618_v0 }
 0x725   : > { %2984 = vmatmul.mubr.bf16.vlgmr.msra.gmra.mrb[4].mxu0 %v4934_v7  ;;  %3025 = vmatmul.mubr.bf16.vlgmr.msra.gmra.mrb[4].mxu1 %v4934_v7 }
 0x7b8   : > { %v2903_v32 = vpop.f32.mrb[0].mxu0  ;;  %v2944_v14 = vpop.f32.mrb[0].mxu1 }
 0x7b9   : > { %v2904_v34 = vadd.f32 %v2903_v32, %v2192_v9  ;;  %v2905_v15 = vpop.f32.mrb[1].mxu0  ;;  %v2945_v16 = vadd.f32 %v2944_v14, %v2200_v10  ;;  %v2946_v17 = vpop.f32.mrb[1].mxu1 }
 0x7ba   : > { %v2906_v7 = vadd.f32 %v2905_v15, %v2196_v11  ;;  %v2907_v18 = vpop.f32.mrb[2].mxu0  ;;  %v2947_v19 = vadd.f32 %v2946_v17, %v2204_v12  ;;  %v2948_v20 = vpop.f32.mrb[2].mxu1 }
 0x7bb   : > { %v2908_v21 = vpop.f32.mrb[3].mxu0  ;;  %v2949_v24 = vpop.f32.mrb[3].mxu1 }
 0x7bc   : > { %v3633_v22 = vpack.c.bf16 %v2906_v7, %v2904_v34  ;;  %v3634_v25 = vpack.c.bf16 %v2947_v19, %v2945_v16 }
 0x7be   : > { %3065 = vst [vmem:[%s4798_s24] sm:$0xff] %v3633_v22  ;;  %3066 = vst [vmem:[%s4798_s24 + $0x8] sm:$0xff] %v3634_v25 }
 0x7f8   : > { %v2985_v36 = vpop.f32.mrb[4].mxu0  ;;  %v3026_v37 = vpop.f32.mrb[4].mxu1 }
 0x7f9   : > { %v2986_v53 = vadd.f32 %v2985_v36, %v2208_v30  ;;  %v2987_v38 = vpop.f32.mrb[5].mxu0  ;;  %v3027_v58 = vadd.f32 %v3026_v37, %v2216_v31  ;;  %v3028_v39 = vpop.f32.mrb[5].mxu1 }
 0x7fa   : > { %v2988_v23 = vadd.f32 %v2987_v38, %v2212_v33  ;;  %v2989_v40 = vpop.f32.mrb[6].mxu0  ;;  %v3029_v41 = vadd.f32 %v3028_v39, %v2220_v35  ;;  %v3030_v42 = vpop.f32.mrb[6].mxu1 }
 0x7fb   : > { %v2990_v43 = vpop.f32.mrb[7].mxu0  ;;  %v3031_v45 = vpop.f32.mrb[7].mxu1 }
 0x7fc   : > { %v3635_v44 = vpack.c.bf16 %v2988_v23, %v2986_v53  ;;  %v3636_v46 = vpack.c.bf16 %v3029_v41, %v3027_v58 }
 0x7fe   : > { %3067 = vst [vmem:[%s4798_s24 + $0x10] sm:$0xff] %v3635_v44  ;;  %3068 = vst [vmem:[%s4798_s24 + $0x18] sm:$0xff] %v3636_v46 }
 0x7ff   : > { %4287 = shalt.err (!%p4284_p8)
}
 0x800   : > { %s4288_s6 = scalar_lea.hbm %s5010_s20, 512  ;;  %s4292_s22 = scalar_lea.hbm %s5165_s0, 4096 }
 0x801   : > { %p4289_p12 = scmp.ne.s32.totalorder %s5010_s20, %s4288_s6  ;;  %p4293_p7 = scmp.lt.u32.totalorder %s5010_s20, %s5165_s0 }
 0x802   : > { %p4294_p9 = scmp.lt.u32.totalorder %s4292_s22, %s4288_s6  ;;  %p4296_p10 = scmp.lt.u32.totalorder %s4288_s6, %s5010_s20 }
 0x803   : > { %p4290_p3 = pnand %p4289_p12, %p5166_p1 }
 0x804   : > { %p4295_p2 = por %p4294_p9, %p4293_p7 }
 0x805   : > { %p4291_p6 = pneg %p4290_p3 }
 0x806   : > { %p4297_p0 = por %p4296_p10, %p4295_p2 }
 0x808   : > { %p4298_p13 = pnand %p4297_p0, %p4291_p6 }
 0x80a   : > { %4301 = shalt.err (!%p4298_p13)
}
 0x80b   : > { %3657 = dma.vmem_to_hbm [thread:$0]  (%p5166_p1), %s5012_s18, 512, %s5010_s20, %s3070_s3  }
 0x80c PF: > { %s5167_s28 = sld [smem:[#allocation19_spill]]  ;;  %s5168_s21 = sld [smem:[#allocation25_spill]] }
 0x80d   : > { %p3692_p11 = scmp.ge.s32.totalorder %s4408_s15, 2 }
 0x812   : > { %s3100_s23 = sand.u32 1, %s5167_s28   ;;  %p5169_p4 = scmp.ne.s32.totalorder %s5168_s21, 0 }
 0x813   : > { %s3101_s12 = scalar_lea.sflag [#allocation5], %s3100_s23 }
 0x814   : > { %p3680_p5 = pnand %p3692_p11, %p5169_p4 }
 0x816   : > { %4363 = dma.done.wait (!%p3680_p5), %s3101_s12, 512  }
 0x817   : > { %4365 = vsyncadd (!%p3680_p5), %s3101_s12, 4294966784  ;;  %s24_s15 = sadd.s32 1, %s4408_s15   ;;  %s5170_s27 = sld [smem:[#allocation20_spill]] }
 0x818   : > { %p21_p8 = scmp.ge.s32.totalorder %s24_s15, 10   ;;  %s5171_s1 = sld [smem:[#allocation28_spill]] }
 0x819   : > { %s5172_s12 = sld [smem:[#allocation23_spill]]  ;;  %s5173_s16 = sld [smem:[#allocation26_spill]] }
 0x81a   : > { %s5174_s14 = sld [smem:[#allocation27_spill]]  ;;  %s5175_s28 = smov %s4376_s29 }
 0x81b   : > { %s5176_s29 = smov %s4646_s2  ;;  %s5177_s30 = smov %s4384_s9 }
 0x81c   : > { %s5178_s9 = smov %s4388_s10  ;;  %s5180_s11 = smov %s4400_s13 }
 0x81d   :  { %23 = sbr.rel (!%p21_p8) target bundleno = 17 (0x11), region = 141 }
 0x81e   : > { %s5179_s10 = smov %s5171_s1 }
 0x81f   : > { %s5181_s13 = smov %s5173_s16 }
 0x824   :  { %3106 = vsyncpa [#allocation4], 1 }
 0x825   :  { %3108 = vsyncpa [#allocation4 + $0x1], 1 }
 0x826   :  { %3109 = vsyncpa [#allocation7], 1 }
 0x827   :  { %3110 = vsyncpa [#allocation10], 1 }
 0x828   :  { %3111 = vsyncpa [#allocation5], 1 }
 0x829   :  { %3113 = vsyncpa [#allocation5 + $0x1], 1 }

</bundles_post_ra>
